<compile_context>
chip_gen: v5e
topology: v5e:2x2
jax: 0.10.0
libtpu: 0.0.40
codegen_flags: <defaults>
</compile_context>

<pallas_src>
import functools

import jax
import jax.numpy as jnp
from jax.experimental import pallas as pl
from jax.experimental.pallas import tpu as pltpu


# ----------------------------------------------------------------------------
# helpers
# ----------------------------------------------------------------------------
def _round_up(x, m):
    return (x + m - 1) // m * m


def _pick_k_tile(kp, max_tk=640):
    """Largest multiple of 128 that divides kp (kp % 128 == 0) and is <= max_tk."""
    best = 128
    d = kp // 128
    for t in range(1, d + 1):
        if d % t == 0 and 128 * t <= max_tk:
            best = 128 * t
    return best


def _pick_m_tiles(m):
    mp = _round_up(m, 8)
    if mp <= 256:
        return mp, mp           # single M tile, no extra padding
    tm = 256
    return tm, _round_up(mp, tm)


# ----------------------------------------------------------------------------
# Pallas kernel 1: tiled GEMM + bias + (optional) ReLU
#   grid = (M_tiles, K_tiles); f32 accumulator resident in VMEM scratch.
# ----------------------------------------------------------------------------
def _gemm_bias_act_kernel(a_ref, w_ref, b_ref, o_ref, acc_ref, *, relu):
    k = pl.program_id(1)

    @pl.when(k == 0)
    def _():
        acc_ref[...] = jnp.zeros_like(acc_ref)

    acc_ref[...] += jnp.dot(a_ref[...], w_ref[...],
                            preferred_element_type=jnp.float32)

    @pl.when(k == pl.num_programs(1) - 1)
    def _():
        r = acc_ref[...] + b_ref[...]          # (TM, Np) + (1, Np)
        if relu:
            r = jnp.maximum(r, 0.0)
        o_ref[...] = r.astype(o_ref.dtype)


def gemm_bias_act(a, w_pad, b_pad, *, relu, out_dtype=jnp.bfloat16):
    """a: (M, K) float; w_pad: (Kp, Np) bf16 (Kp,Np multiples of 128, zero
    padded); b_pad: (1, Np) f32.  Returns (M, Np) out_dtype."""
    m, k = a.shape
    kp, np_ = w_pad.shape
    a = a.astype(jnp.bfloat16)
    if kp != k:
        a = jnp.pad(a, ((0, 0), (0, kp - k)))
    tm, mp = _pick_m_tiles(m)
    if mp != m:
        a = jnp.pad(a, ((0, mp - m), (0, 0)))
    tk = _pick_k_tile(kp)
    grid = (mp // tm, kp // tk)

    out = pl.pallas_call(
        functools.partial(_gemm_bias_act_kernel, relu=relu),
        out_shape=jax.ShapeDtypeStruct((mp, np_), out_dtype),
        grid=grid,
        in_specs=[
            pl.BlockSpec((tm, tk), lambda i, kk: (i, kk)),
            pl.BlockSpec((tk, np_), lambda i, kk: (kk, 0)),
            pl.BlockSpec((1, np_), lambda i, kk: (0, 0)),
        ],
        out_specs=pl.BlockSpec((tm, np_), lambda i, kk: (i, 0)),
        scratch_shapes=[pltpu.VMEM((tm, np_), jnp.float32)],
        compiler_params=pltpu.CompilerParams(
            dimension_semantics=("parallel", "arbitrary"),
        ),
    )(a, w_pad, b_pad)
    return out[:m]


# ----------------------------------------------------------------------------
# Pallas kernel 2: fused FC head  (3136 -> 512 ReLU -> n_actions_padded)
#   Hidden activation lives only in the VMEM accumulator; K tiled so the big
#   dense weight streams through the double-buffered pipeline.
# ----------------------------------------------------------------------------
def _fc_fused_kernel(x_ref, w1_ref, b1_ref, w2_ref, b2_ref, o_ref, acc_ref):
    k = pl.program_id(1)

    @pl.when(k == 0)
    def _():
        acc_ref[...] = jnp.zeros_like(acc_ref)

    acc_ref[...] += jnp.dot(x_ref[...], w1_ref[...],
                            preferred_element_type=jnp.float32)

    @pl.when(k == pl.num_programs(1) - 1)
    def _():
        h = jnp.maximum(acc_ref[...] + b1_ref[...], 0.0)          # (TM, 512)
        o = jnp.dot(h.astype(jnp.bfloat16), w2_ref[...],
                    preferred_element_type=jnp.float32) + b2_ref[...]
        o_ref[...] = o.astype(o_ref.dtype)


def fc_head(x, w1_pad, b1_pad, w2_pad, b2_pad):
    """x: (B, 3136); w1_pad: (Kp, 512) bf16; b1_pad: (1,512) f32;
    w2_pad: (512, Np) bf16; b2_pad: (1, Np) f32.  Returns (B, Np) f32."""
    m, k = x.shape
    kp, h = w1_pad.shape
    _, np_ = w2_pad.shape
    x = x.astype(jnp.bfloat16)
    if kp != k:
        x = jnp.pad(x, ((0, 0), (0, kp - k)))
    tm, mp = _pick_m_tiles(m)
    if mp != m:
        x = jnp.pad(x, ((0, mp - m), (0, 0)))
    tk = _pick_k_tile(kp)
    grid = (mp // tm, kp // tk)

    out = pl.pallas_call(
        _fc_fused_kernel,
        out_shape=jax.ShapeDtypeStruct((mp, np_), jnp.float32),
        grid=grid,
        in_specs=[
            pl.BlockSpec((tm, tk), lambda i, kk: (i, kk)),
            pl.BlockSpec((tk, h), lambda i, kk: (kk, 0)),
            pl.BlockSpec((1, h), lambda i, kk: (0, 0)),
            pl.BlockSpec((h, np_), lambda i, kk: (0, 0)),
            pl.BlockSpec((1, np_), lambda i, kk: (0, 0)),
        ],
        out_specs=pl.BlockSpec((tm, np_), lambda i, kk: (i, 0)),
        scratch_shapes=[pltpu.VMEM((tm, h), jnp.float32)],
        compiler_params=pltpu.CompilerParams(
            dimension_semantics=("parallel", "arbitrary"),
        ),
    )(x, w1_pad, b1_pad, w2_pad, b2_pad)
    return out[:m]


# ----------------------------------------------------------------------------
# Conv-as-GEMM plumbing (NHWC, plain JAX glue)
# ----------------------------------------------------------------------------
def _im2col_nhwc(x, kh, kw, stride):
    """x: (B, H, W, C) -> (B*OH*OW, KH*KW*C), patch flatten order (KH, KW, C)."""
    b, h, w, c = x.shape
    oh = (h - kh) // stride + 1
    ow = (w - kw) // stride + 1
    cols = []
    for di in range(kh):
        for dj in range(kw):
            cols.append(x[:, di:di + stride * oh:stride,
                           dj:dj + stride * ow:stride, :])
    p = jnp.concatenate(cols, axis=-1)          # (B, OH, OW, KH*KW*C)
    return p.reshape(b * oh * ow, kh * kw * c), oh, ow


def conv2d_bias_relu(x_nhwc, w_pad, b_pad, cout, kh, kw, stride):
    b = x_nhwc.shape[0]
    patches, oh, ow = _im2col_nhwc(x_nhwc, kh, kw, stride)
    y = gemm_bias_act(patches, w_pad, b_pad, relu=True)   # (B*OH*OW, 128) bf16
    return y[:, :cout].reshape(b, oh, ow, cout)


# ----------------------------------------------------------------------------
# Parameter preparation: pad to lane-dense layouts, cast to bf16, reorder the
# dense-layer rows from torch's (C,H,W) flatten to our NHWC (H,W,C) flatten.
# ----------------------------------------------------------------------------
def prepare_params(params, n_actions):
    def conv_w(w):
        cout, cin, kh, kw = w.shape
        k = kh * kw * cin
        wm = jnp.transpose(w, (2, 3, 1, 0)).reshape(k, cout)   # (KH,KW,Cin)->rows
        kp, npad = _round_up(k, 128), _round_up(cout, 128)
        wm = jnp.pad(wm, ((0, kp - k), (0, npad - cout)))
        return wm.astype(jnp.bfloat16)

    def pad_bias(bias, n):
        npad = _round_up(n, 128)
        return jnp.pad(bias, (0, npad - n)).reshape(1, npad).astype(jnp.float32)

    wd = params["wd"]                                   # (3136, 512), torch (C,H,W) rows
    wd = wd.reshape(64, 7, 7, 512).transpose(1, 2, 0, 3).reshape(3136, 512)
    kp = _round_up(3136, 128)                           # 3200
    wd = jnp.pad(wd, ((0, kp - 3136), (0, 0))).astype(jnp.bfloat16)
    bd = pad_bias(params["bd"], 512)

    npad = _round_up(n_actions, 128)
    wo = jnp.pad(params["wo"], ((0, 0), (0, npad - n_actions))).astype(jnp.bfloat16)
    bo = pad_bias(params["bo"], n_actions)

    return {
        "w1": conv_w(params["w1"]), "b1": pad_bias(params["b1"], 32),
        "w2": conv_w(params["w2"]), "b2": pad_bias(params["b2"], 64),
        "w3": conv_w(params["w3"]), "b3": pad_bias(params["b3"], 64),
        "wd": wd, "bd": bd, "wo": wo, "bo": bo,
    }


# ----------------------------------------------------------------------------
# Model
# ----------------------------------------------------------------------------
def init_params(key, n_actions):
    ks = jax.random.split(key, 10)

    def normal(k, shape, fan_in):
        return (jax.random.normal(k, shape, jnp.float32)
                * (1.0 / jnp.sqrt(jnp.float32(fan_in))))

    return {
        "w1": normal(ks[0], (32, 4, 8, 8), 4 * 8 * 8),
        "b1": jnp.zeros((32,), jnp.float32),
        "w2": normal(ks[1], (64, 32, 4, 4), 32 * 4 * 4),
        "b2": jnp.zeros((64,), jnp.float32),
        "w3": normal(ks[2], (64, 64, 3, 3), 64 * 3 * 3),
        "b3": jnp.zeros((64,), jnp.float32),
        "wd": normal(ks[3], (3136, 512), 3136),   # stored (in, out)
        "bd": normal(ks[4], (512,), 3136),
        "wo": normal(ks[5], (512, n_actions), 512),
        "bo": normal(ks[6], (n_actions,), 512),
    }


@functools.partial(jax.jit, static_argnames=("n_actions",))
def forward(prep, x, n_actions):
    # x: (B, 4, 84, 84) f32 NCHW (same as the PyTorch module); go NHWC once.
    x = jnp.transpose(x, (0, 2, 3, 1)).astype(jnp.bfloat16)
    x = conv2d_bias_relu(x, prep["w1"], prep["b1"], 32, 8, 8, 4)   # (B,20,20,32)
    x = conv2d_bias_relu(x, prep["w2"], prep["b2"], 64, 4, 4, 2)   # (B, 9, 9,64)
    x = conv2d_bias_relu(x, prep["w3"], prep["b3"], 64, 3, 3, 1)   # (B, 7, 7,64)
    b = x.shape[0]
    x = x.reshape(b, 7 * 7 * 64)      # (H,W,C) flatten; wd rows were reordered to match
    y = fc_head(x, prep["wd"], prep["bd"], prep["wo"], prep["bo"])  # (B, 128) f32
    return y[:, :n_actions]


# Pure-JAX reference (f32 HIGHEST, torch layouts) for the correctness check.
def ref_forward(params, x):
    def conv(x, w, bias, s):
        y = jax.lax.conv_general_dilated(
            x, w, (s, s), "VALID",
            dimension_numbers=("NCHW", "OIHW", "NCHW"),
            precision=jax.lax.Precision.HIGHEST,
        )
        return jax.nn.relu(y + bias[None, :, None, None])

    x = conv(x, params["w1"], params["b1"], 4)
    x = conv(x, params["w2"], params["b2"], 2)
    x = conv(x, params["w3"], params["b3"], 1)
    x = x.reshape(x.shape[0], -1)
    x = jax.nn.relu(
        jnp.dot(x, params["wd"], precision=jax.lax.Precision.HIGHEST) + params["bd"])
    return jnp.dot(x, params["wo"], precision=jax.lax.Precision.HIGHEST) + params["bo"]


if __name__ == "__main__":
    n_actions = 6
    batch = 2

    key = jax.random.PRNGKey(0)
    k_param, k_x = jax.random.split(key)
    params = init_params(k_param, n_actions)
    # 84x84 is forced by the hard-coded 3136 (= 64 * 7 * 7) flatten in the module.
    x = jax.random.normal(k_x, (batch, 4, 84, 84), jnp.float32)

    prep = prepare_params(params, n_actions)
    out = jax.block_until_ready(forward(prep, x, n_actions=n_actions))
    assert out.shape == (batch, n_actions), out.shape

    ref = jax.block_until_ready(ref_forward(params, x))
    # bf16 MXU inputs with f32 accumulation -> looser tolerance than full f32.
    max_err = float(jnp.max(jnp.abs(out - ref)))
    assert jnp.allclose(out, ref, atol=5e-2, rtol=5e-2), max_err

    print("KERNEL_OK")
</pallas_src>

<mosaic_0001>
module attributes {stable_mosaic.version = 11 : i64} {
  func.func @_gemm_bias_act_kernel(%arg0: i32, %arg1: i32, %arg2: memref<256x256xbf16, #tpu.memory_space<vmem>>, %arg3: memref<256x128xbf16, #tpu.memory_space<vmem>>, %arg4: memref<1x128xf32, #tpu.memory_space<vmem>>, %arg5: memref<256x128xbf16, #tpu.memory_space<vmem>>, %arg6: memref<256x128xf32, #tpu.memory_space<vmem>>) attributes {dimension_semantics = [#tpu.dimension_semantics<parallel>, #tpu.dimension_semantics<arbitrary>], iteration_bounds = array<i64: 4, 1>, scalar_prefetch = 0 : i64, scratch_operands = 1 : i64, tpu.core_type = #tpu.core_type<tc>, window_params = [{transform_indices = @transform_0, window_bounds = array<i64: 256, 256>}, {transform_indices = @transform_1, window_bounds = array<i64: 256, 128>}, {pipeline_mode = #tpu.pipeline_mode<synchronous>, transform_indices = @transform_2, window_bounds = array<i64: 1, 128>}, {transform_indices = @transform_3, window_bounds = array<i64: 256, 128>}]} {
    %c0_i32 = arith.constant 0 : i32
    %0 = arith.cmpi eq, %arg1, %c0_i32 : i32
    %1 = arith.extui %0 : i1 to i32
    %c0_i32_0 = arith.constant 0 : i32
    %2 = arith.cmpi ne, %1, %c0_i32_0 : i32
    scf.if %2 {
      %cst_10 = arith.constant 0.000000e+00 : f32
      %12 = vector.broadcast %cst_10 : f32 to vector<256x128xf32>
      %c0_11 = arith.constant 0 : index
      %c0_12 = arith.constant 0 : index
      %13 = vector.load %arg6[%c0_11, %c0_12] : memref<256x128xf32, #tpu.memory_space<vmem>>, vector<256x128xf32>
      tpu.vector_store %arg6[%c0_11, %c0_12], %12 {strides = array<i32>} : memref<256x128xf32, #tpu.memory_space<vmem>>, vector<256x128xf32>,
    } else {
    }
    %c0 = arith.constant 0 : index
    %c0_1 = arith.constant 0 : index
    %3 = vector.load %arg6[%c0, %c0_1] : memref<256x128xf32, #tpu.memory_space<vmem>>, vector<256x128xf32>
    %c0_2 = arith.constant 0 : index
    %c0_3 = arith.constant 0 : index
    %4 = vector.load %arg2[%c0_2, %c0_3] : memref<256x256xbf16, #tpu.memory_space<vmem>>, vector<256x256xbf16>
    %c0_4 = arith.constant 0 : index
    %c0_5 = arith.constant 0 : index
    %5 = vector.load %arg3[%c0_4, %c0_5] : memref<256x128xbf16, #tpu.memory_space<vmem>>, vector<256x128xbf16>
    %cst = arith.constant dense<0.000000e+00> : vector<256x128xf32>
    %6 = tpu.matmul %4, %5, %cst {dimension_numbers = #tpu.dot_dimension_numbers<[1], [0], [0], [1], [0, 0, 1, 1], [], []>} : vector<256x256xbf16>, vector<256x128xbf16>, vector<256x128xf32> -> vector<256x128xf32>
    %7 = arith.addf %3, %6 : vector<256x128xf32>
    %c0_6 = arith.constant 0 : index
    %c0_7 = arith.constant 0 : index
    %8 = vector.load %arg6[%c0_6, %c0_7] : memref<256x128xf32, #tpu.memory_space<vmem>>, vector<256x128xf32>
    tpu.vector_store %arg6[%c0_6, %c0_7], %7 {strides = array<i32>} : memref<256x128xf32, #tpu.memory_space<vmem>>, vector<256x128xf32>,
    %c0_i32_8 = arith.constant 0 : i32
    %9 = arith.cmpi eq, %arg1, %c0_i32_8 : i32
    %10 = arith.extui %9 : i1 to i32
    %c0_i32_9 = arith.constant 0 : i32
    %11 = arith.cmpi ne, %10, %c0_i32_9 : i32
    scf.if %11 {
      %c0_10 = arith.constant 0 : index
      %c0_11 = arith.constant 0 : index
      %12 = vector.load %arg6[%c0_10, %c0_11] : memref<256x128xf32, #tpu.memory_space<vmem>>, vector<256x128xf32>
      %c0_12 = arith.constant 0 : index
      %c0_13 = arith.constant 0 : index
      %13 = vector.load %arg4[%c0_12, %c0_13] : memref<1x128xf32, #tpu.memory_space<vmem>>, vector<1x128xf32>
      %14 = vector.broadcast %13 : vector<1x128xf32> to vector<256x128xf32>
      %15 = arith.addf %12, %14 : vector<256x128xf32>
      %cst_14 = arith.constant 0.000000e+00 : f32
      %16 = vector.broadcast %cst_14 : f32 to vector<256x128xf32>
      %17 = arith.maximumf %15, %16 : vector<256x128xf32>
      %18 = arith.truncf %17 : vector<256x128xf32> to vector<256x128xbf16>
      %c0_15 = arith.constant 0 : index
      %c0_16 = arith.constant 0 : index
      %19 = vector.load %arg5[%c0_15, %c0_16] : memref<256x128xbf16, #tpu.memory_space<vmem>>, vector<256x128xbf16>
      tpu.vector_store %arg5[%c0_15, %c0_16], %18 {strides = array<i32>} : memref<256x128xbf16, #tpu.memory_space<vmem>>, vector<256x128xbf16>,
    } else {
    }
    return
  }
  func.func @transform_0(%arg0: i32, %arg1: i32) -> (i32, i32) {
    %c0_i32 = arith.constant 0 : i32
    return %arg0, %arg1 : i32, i32
  }
  func.func @transform_1(%arg0: i32, %arg1: i32) -> (i32, i32) {
    %c0_i32 = arith.constant 0 : i32
    %c0_i32_0 = arith.constant 0 : i32
    return %arg1, %c0_i32 : i32, i32
  }
  func.func @transform_2(%arg0: i32, %arg1: i32) -> (i32, i32) {
    %c0_i32 = arith.constant 0 : i32
    %c0_i32_0 = arith.constant 0 : i32
    %c0_i32_1 = arith.constant 0 : i32
    return %c0_i32, %c0_i32_0 : i32, i32
  }
  func.func @transform_3(%arg0: i32, %arg1: i32) -> (i32, i32) {
    %c0_i32 = arith.constant 0 : i32
    %c0_i32_0 = arith.constant 0 : i32
    return %arg0, %c0_i32 : i32, i32
  }
}

module attributes {stable_mosaic.version = 11 : i64} {
  func.func @_gemm_bias_act_kernel(%arg0: i32, %arg1: i32, %arg2: memref<168x512xbf16, #tpu.memory_space<vmem>>, %arg3: memref<512x128xbf16, #tpu.memory_space<vmem>>, %arg4: memref<1x128xf32, #tpu.memory_space<vmem>>, %arg5: memref<168x128xbf16, #tpu.memory_space<vmem>>, %arg6: memref<168x128xf32, #tpu.memory_space<vmem>>) attributes {dimension_semantics = [#tpu.dimension_semantics<parallel>, #tpu.dimension_semantics<arbitrary>], iteration_bounds = array<i64: 1, 1>, scalar_prefetch = 0 : i64, scratch_operands = 1 : i64, tpu.core_type = #tpu.core_type<tc>, window_params = [{transform_indices = @transform_0, window_bounds = array<i64: 168, 512>}, {transform_indices = @transform_1, window_bounds = array<i64: 512, 128>}, {pipeline_mode = #tpu.pipeline_mode<synchronous>, transform_indices = @transform_2, window_bounds = array<i64: 1, 128>}, {transform_indices = @transform_3, window_bounds = array<i64: 168, 128>}]} {
    %c0_i32 = arith.constant 0 : i32
    %0 = arith.cmpi eq, %arg1, %c0_i32 : i32
    %1 = arith.extui %0 : i1 to i32
    %c0_i32_0 = arith.constant 0 : i32
    %2 = arith.cmpi ne, %1, %c0_i32_0 : i32
    scf.if %2 {
      %cst_10 = arith.constant 0.000000e+00 : f32
      %12 = vector.broadcast %cst_10 : f32 to vector<168x128xf32>
      %c0_11 = arith.constant 0 : index
      %c0_12 = arith.constant 0 : index
      %13 = vector.load %arg6[%c0_11, %c0_12] : memref<168x128xf32, #tpu.memory_space<vmem>>, vector<168x128xf32>
      tpu.vector_store %arg6[%c0_11, %c0_12], %12 {strides = array<i32>} : memref<168x128xf32, #tpu.memory_space<vmem>>, vector<168x128xf32>,
    } else {
    }
    %c0 = arith.constant 0 : index
    %c0_1 = arith.constant 0 : index
    %3 = vector.load %arg6[%c0, %c0_1] : memref<168x128xf32, #tpu.memory_space<vmem>>, vector<168x128xf32>
    %c0_2 = arith.constant 0 : index
    %c0_3 = arith.constant 0 : index
    %4 = vector.load %arg2[%c0_2, %c0_3] : memref<168x512xbf16, #tpu.memory_space<vmem>>, vector<168x512xbf16>
    %c0_4 = arith.constant 0 : index
    %c0_5 = arith.constant 0 : index
    %5 = vector.load %arg3[%c0_4, %c0_5] : memref<512x128xbf16, #tpu.memory_space<vmem>>, vector<512x128xbf16>
    %cst = arith.constant dense<0.000000e+00> : vector<168x128xf32>
    %6 = tpu.matmul %4, %5, %cst {dimension_numbers = #tpu.dot_dimension_numbers<[1], [0], [0], [1], [0, 0, 1, 1], [], []>} : vector<168x512xbf16>, vector<512x128xbf16>, vector<168x128xf32> -> vector<168x128xf32>
    %7 = arith.addf %3, %6 : vector<168x128xf32>
    %c0_6 = arith.constant 0 : index
    %c0_7 = arith.constant 0 : index
    %8 = vector.load %arg6[%c0_6, %c0_7] : memref<168x128xf32, #tpu.memory_space<vmem>>, vector<168x128xf32>
    tpu.vector_store %arg6[%c0_6, %c0_7], %7 {strides = array<i32>} : memref<168x128xf32, #tpu.memory_space<vmem>>, vector<168x128xf32>,
    %c0_i32_8 = arith.constant 0 : i32
    %9 = arith.cmpi eq, %arg1, %c0_i32_8 : i32
    %10 = arith.extui %9 : i1 to i32
    %c0_i32_9 = arith.constant 0 : i32
    %11 = arith.cmpi ne, %10, %c0_i32_9 : i32
    scf.if %11 {
      %c0_10 = arith.constant 0 : index
      %c0_11 = arith.constant 0 : index
      %12 = vector.load %arg6[%c0_10, %c0_11] : memref<168x128xf32, #tpu.memory_space<vmem>>, vector<168x128xf32>
      %c0_12 = arith.constant 0 : index
      %c0_13 = arith.constant 0 : index
      %13 = vector.load %arg4[%c0_12, %c0_13] : memref<1x128xf32, #tpu.memory_space<vmem>>, vector<1x128xf32>
      %14 = vector.broadcast %13 : vector<1x128xf32> to vector<168x128xf32>
      %15 = arith.addf %12, %14 : vector<168x128xf32>
      %cst_14 = arith.constant 0.000000e+00 : f32
      %16 = vector.broadcast %cst_14 : f32 to vector<168x128xf32>
      %17 = arith.maximumf %15, %16 : vector<168x128xf32>
      %18 = arith.truncf %17 : vector<168x128xf32> to vector<168x128xbf16>
      %c0_15 = arith.constant 0 : index
      %c0_16 = arith.constant 0 : index
      %19 = vector.load %arg5[%c0_15, %c0_16] : memref<168x128xbf16, #tpu.memory_space<vmem>>, vector<168x128xbf16>
      tpu.vector_store %arg5[%c0_15, %c0_16], %18 {strides = array<i32>} : memref<168x128xbf16, #tpu.memory_space<vmem>>, vector<168x128xbf16>,
    } else {
    }
    return
  }
  func.func @transform_0(%arg0: i32, %arg1: i32) -> (i32, i32) {
    %c0_i32 = arith.constant 0 : i32
    return %arg0, %arg1 : i32, i32
  }
  func.func @transform_1(%arg0: i32, %arg1: i32) -> (i32, i32) {
    %c0_i32 = arith.constant 0 : i32
    %c0_i32_0 = arith.constant 0 : i32
    return %arg1, %c0_i32 : i32, i32
  }
  func.func @transform_2(%arg0: i32, %arg1: i32) -> (i32, i32) {
    %c0_i32 = arith.constant 0 : i32
    %c0_i32_0 = arith.constant 0 : i32
    %c0_i32_1 = arith.constant 0 : i32
    return %c0_i32, %c0_i32_0 : i32, i32
  }
  func.func @transform_3(%arg0: i32, %arg1: i32) -> (i32, i32) {
    %c0_i32 = arith.constant 0 : i32
    %c0_i32_0 = arith.constant 0 : i32
    return %arg0, %c0_i32 : i32, i32
  }
}

module attributes {stable_mosaic.version = 11 : i64} {
  func.func @_gemm_bias_act_kernel(%arg0: i32, %arg1: i32, %arg2: memref<104x640xbf16, #tpu.memory_space<vmem>>, %arg3: memref<640x128xbf16, #tpu.memory_space<vmem>>, %arg4: memref<1x128xf32, #tpu.memory_space<vmem>>, %arg5: memref<104x128xbf16, #tpu.memory_space<vmem>>, %arg6: memref<104x128xf32, #tpu.memory_space<vmem>>) attributes {dimension_semantics = [#tpu.dimension_semantics<parallel>, #tpu.dimension_semantics<arbitrary>], iteration_bounds = array<i64: 1, 1>, scalar_prefetch = 0 : i64, scratch_operands = 1 : i64, tpu.core_type = #tpu.core_type<tc>, window_params = [{transform_indices = @transform_0, window_bounds = array<i64: 104, 640>}, {transform_indices = @transform_1, window_bounds = array<i64: 640, 128>}, {pipeline_mode = #tpu.pipeline_mode<synchronous>, transform_indices = @transform_2, window_bounds = array<i64: 1, 128>}, {transform_indices = @transform_3, window_bounds = array<i64: 104, 128>}]} {
    %c0_i32 = arith.constant 0 : i32
    %0 = arith.cmpi eq, %arg1, %c0_i32 : i32
    %1 = arith.extui %0 : i1 to i32
    %c0_i32_0 = arith.constant 0 : i32
    %2 = arith.cmpi ne, %1, %c0_i32_0 : i32
    scf.if %2 {
      %cst_10 = arith.constant 0.000000e+00 : f32
      %12 = vector.broadcast %cst_10 : f32 to vector<104x128xf32>
      %c0_11 = arith.constant 0 : index
      %c0_12 = arith.constant 0 : index
      %13 = vector.load %arg6[%c0_11, %c0_12] : memref<104x128xf32, #tpu.memory_space<vmem>>, vector<104x128xf32>
      tpu.vector_store %arg6[%c0_11, %c0_12], %12 {strides = array<i32>} : memref<104x128xf32, #tpu.memory_space<vmem>>, vector<104x128xf32>,
    } else {
    }
    %c0 = arith.constant 0 : index
    %c0_1 = arith.constant 0 : index
    %3 = vector.load %arg6[%c0, %c0_1] : memref<104x128xf32, #tpu.memory_space<vmem>>, vector<104x128xf32>
    %c0_2 = arith.constant 0 : index
    %c0_3 = arith.constant 0 : index
    %4 = vector.load %arg2[%c0_2, %c0_3] : memref<104x640xbf16, #tpu.memory_space<vmem>>, vector<104x640xbf16>
    %c0_4 = arith.constant 0 : index
    %c0_5 = arith.constant 0 : index
    %5 = vector.load %arg3[%c0_4, %c0_5] : memref<640x128xbf16, #tpu.memory_space<vmem>>, vector<640x128xbf16>
    %cst = arith.constant dense<0.000000e+00> : vector<104x128xf32>
    %6 = tpu.matmul %4, %5, %cst {dimension_numbers = #tpu.dot_dimension_numbers<[1], [0], [0], [1], [0, 0, 1, 1], [], []>} : vector<104x640xbf16>, vector<640x128xbf16>, vector<104x128xf32> -> vector<104x128xf32>
    %7 = arith.addf %3, %6 : vector<104x128xf32>
    %c0_6 = arith.constant 0 : index
    %c0_7 = arith.constant 0 : index
    %8 = vector.load %arg6[%c0_6, %c0_7] : memref<104x128xf32, #tpu.memory_space<vmem>>, vector<104x128xf32>
    tpu.vector_store %arg6[%c0_6, %c0_7], %7 {strides = array<i32>} : memref<104x128xf32, #tpu.memory_space<vmem>>, vector<104x128xf32>,
    %c0_i32_8 = arith.constant 0 : i32
    %9 = arith.cmpi eq, %arg1, %c0_i32_8 : i32
    %10 = arith.extui %9 : i1 to i32
    %c0_i32_9 = arith.constant 0 : i32
    %11 = arith.cmpi ne, %10, %c0_i32_9 : i32
    scf.if %11 {
      %c0_10 = arith.constant 0 : index
      %c0_11 = arith.constant 0 : index
      %12 = vector.load %arg6[%c0_10, %c0_11] : memref<104x128xf32, #tpu.memory_space<vmem>>, vector<104x128xf32>
      %c0_12 = arith.constant 0 : index
      %c0_13 = arith.constant 0 : index
      %13 = vector.load %arg4[%c0_12, %c0_13] : memref<1x128xf32, #tpu.memory_space<vmem>>, vector<1x128xf32>
      %14 = vector.broadcast %13 : vector<1x128xf32> to vector<104x128xf32>
      %15 = arith.addf %12, %14 : vector<104x128xf32>
      %cst_14 = arith.constant 0.000000e+00 : f32
      %16 = vector.broadcast %cst_14 : f32 to vector<104x128xf32>
      %17 = arith.maximumf %15, %16 : vector<104x128xf32>
      %18 = arith.truncf %17 : vector<104x128xf32> to vector<104x128xbf16>
      %c0_15 = arith.constant 0 : index
      %c0_16 = arith.constant 0 : index
      %19 = vector.load %arg5[%c0_15, %c0_16] : memref<104x128xbf16, #tpu.memory_space<vmem>>, vector<104x128xbf16>
      tpu.vector_store %arg5[%c0_15, %c0_16], %18 {strides = array<i32>} : memref<104x128xbf16, #tpu.memory_space<vmem>>, vector<104x128xbf16>,
    } else {
    }
    return
  }
  func.func @transform_0(%arg0: i32, %arg1: i32) -> (i32, i32) {
    %c0_i32 = arith.constant 0 : i32
    return %arg0, %arg1 : i32, i32
  }
  func.func @transform_1(%arg0: i32, %arg1: i32) -> (i32, i32) {
    %c0_i32 = arith.constant 0 : i32
    %c0_i32_0 = arith.constant 0 : i32
    return %arg1, %c0_i32 : i32, i32
  }
  func.func @transform_2(%arg0: i32, %arg1: i32) -> (i32, i32) {
    %c0_i32 = arith.constant 0 : i32
    %c0_i32_0 = arith.constant 0 : i32
    %c0_i32_1 = arith.constant 0 : i32
    return %c0_i32, %c0_i32_0 : i32, i32
  }
  func.func @transform_3(%arg0: i32, %arg1: i32) -> (i32, i32) {
    %c0_i32 = arith.constant 0 : i32
    %c0_i32_0 = arith.constant 0 : i32
    return %arg0, %c0_i32 : i32, i32
  }
}

module attributes {stable_mosaic.version = 11 : i64} {
  func.func @_fc_fused_kernel(%arg0: i32, %arg1: i32, %arg2: memref<8x640xbf16, #tpu.memory_space<vmem>>, %arg3: memref<640x512xbf16, #tpu.memory_space<vmem>>, %arg4: memref<1x512xf32, #tpu.memory_space<vmem>>, %arg5: memref<512x128xbf16, #tpu.memory_space<vmem>>, %arg6: memref<1x128xf32, #tpu.memory_space<vmem>>, %arg7: memref<8x128xf32, #tpu.memory_space<vmem>>, %arg8: memref<8x512xf32, #tpu.memory_space<vmem>>) attributes {dimension_semantics = [#tpu.dimension_semantics<parallel>, #tpu.dimension_semantics<arbitrary>], iteration_bounds = array<i64: 1, 5>, scalar_prefetch = 0 : i64, scratch_operands = 1 : i64, tpu.core_type = #tpu.core_type<tc>, window_params = [{transform_indices = @transform_0, window_bounds = array<i64: 8, 640>}, {transform_indices = @transform_1, window_bounds = array<i64: 640, 512>}, {pipeline_mode = #tpu.pipeline_mode<synchronous>, transform_indices = @transform_2, window_bounds = array<i64: 1, 512>}, {pipeline_mode = #tpu.pipeline_mode<synchronous>, transform_indices = @transform_3, window_bounds = array<i64: 512, 128>}, {pipeline_mode = #tpu.pipeline_mode<synchronous>, transform_indices = @transform_4, window_bounds = array<i64: 1, 128>}, {transform_indices = @transform_5, window_bounds = array<i64: 8, 128>}]} {
    %c0_i32 = arith.constant 0 : i32
    %0 = arith.cmpi eq, %arg1, %c0_i32 : i32
    %1 = arith.extui %0 : i1 to i32
    %c0_i32_0 = arith.constant 0 : i32
    %2 = arith.cmpi ne, %1, %c0_i32_0 : i32
    scf.if %2 {
      %cst_9 = arith.constant 0.000000e+00 : f32
      %12 = vector.broadcast %cst_9 : f32 to vector<8x512xf32>
      %c0_10 = arith.constant 0 : index
      %c0_11 = arith.constant 0 : index
      %13 = vector.load %arg8[%c0_10, %c0_11] : memref<8x512xf32, #tpu.memory_space<vmem>>, vector<8x512xf32>
      tpu.vector_store %arg8[%c0_10, %c0_11], %12 {strides = array<i32>} : memref<8x512xf32, #tpu.memory_space<vmem>>, vector<8x512xf32>,
    } else {
    }
    %c0 = arith.constant 0 : index
    %c0_1 = arith.constant 0 : index
    %3 = vector.load %arg8[%c0, %c0_1] : memref<8x512xf32, #tpu.memory_space<vmem>>, vector<8x512xf32>
    %c0_2 = arith.constant 0 : index
    %c0_3 = arith.constant 0 : index
    %4 = vector.load %arg2[%c0_2, %c0_3] : memref<8x640xbf16, #tpu.memory_space<vmem>>, vector<8x640xbf16>
    %c0_4 = arith.constant 0 : index
    %c0_5 = arith.constant 0 : index
    %5 = vector.load %arg3[%c0_4, %c0_5] : memref<640x512xbf16, #tpu.memory_space<vmem>>, vector<640x512xbf16>
    %cst = arith.constant dense<0.000000e+00> : vector<8x512xf32>
    %6 = tpu.matmul %4, %5, %cst {dimension_numbers = #tpu.dot_dimension_numbers<[1], [0], [0], [1], [0, 0, 1, 1], [], []>} : vector<8x640xbf16>, vector<640x512xbf16>, vector<8x512xf32> -> vector<8x512xf32>
    %7 = arith.addf %3, %6 : vector<8x512xf32>
    %c0_6 = arith.constant 0 : index
    %c0_7 = arith.constant 0 : index
    %8 = vector.load %arg8[%c0_6, %c0_7] : memref<8x512xf32, #tpu.memory_space<vmem>>, vector<8x512xf32>
    tpu.vector_store %arg8[%c0_6, %c0_7], %7 {strides = array<i32>} : memref<8x512xf32, #tpu.memory_space<vmem>>, vector<8x512xf32>,
    %c4_i32 = arith.constant 4 : i32
    %9 = arith.cmpi eq, %arg1, %c4_i32 : i32
    %10 = arith.extui %9 : i1 to i32
    %c0_i32_8 = arith.constant 0 : i32
    %11 = arith.cmpi ne, %10, %c0_i32_8 : i32
    scf.if %11 {
      %c0_9 = arith.constant 0 : index
      %c0_10 = arith.constant 0 : index
      %12 = vector.load %arg8[%c0_9, %c0_10] : memref<8x512xf32, #tpu.memory_space<vmem>>, vector<8x512xf32>
      %c0_11 = arith.constant 0 : index
      %c0_12 = arith.constant 0 : index
      %13 = vector.load %arg4[%c0_11, %c0_12] : memref<1x512xf32, #tpu.memory_space<vmem>>, vector<1x512xf32>
      %14 = vector.broadcast %13 : vector<1x512xf32> to vector<8x512xf32>
      %15 = arith.addf %12, %14 : vector<8x512xf32>
      %cst_13 = arith.constant 0.000000e+00 : f32
      %16 = vector.broadcast %cst_13 : f32 to vector<8x512xf32>
      %17 = arith.maximumf %15, %16 : vector<8x512xf32>
      %18 = arith.truncf %17 : vector<8x512xf32> to vector<8x512xbf16>
      %c0_14 = arith.constant 0 : index
      %c0_15 = arith.constant 0 : index
      %19 = vector.load %arg5[%c0_14, %c0_15] : memref<512x128xbf16, #tpu.memory_space<vmem>>, vector<512x128xbf16>
      %cst_16 = arith.constant dense<0.000000e+00> : vector<8x128xf32>
      %20 = tpu.matmul %18, %19, %cst_16 {dimension_numbers = #tpu.dot_dimension_numbers<[1], [0], [0], [1], [0, 0, 1, 1], [], []>} : vector<8x512xbf16>, vector<512x128xbf16>, vector<8x128xf32> -> vector<8x128xf32>
      %c0_17 = arith.constant 0 : index
      %c0_18 = arith.constant 0 : index
      %21 = vector.load %arg6[%c0_17, %c0_18] : memref<1x128xf32, #tpu.memory_space<vmem>>, vector<1x128xf32>
      %22 = vector.broadcast %21 : vector<1x128xf32> to vector<8x128xf32>
      %23 = arith.addf %20, %22 : vector<8x128xf32>
      %c0_19 = arith.constant 0 : index
      %c0_20 = arith.constant 0 : index
      %24 = vector.load %arg7[%c0_19, %c0_20] : memref<8x128xf32, #tpu.memory_space<vmem>>, vector<8x128xf32>
      tpu.vector_store %arg7[%c0_19, %c0_20], %23 {strides = array<i32>} : memref<8x128xf32, #tpu.memory_space<vmem>>, vector<8x128xf32>,
    } else {
    }
    return
  }
  func.func @transform_0(%arg0: i32, %arg1: i32) -> (i32, i32) {
    %c0_i32 = arith.constant 0 : i32
    return %arg0, %arg1 : i32, i32
  }
  func.func @transform_1(%arg0: i32, %arg1: i32) -> (i32, i32) {
    %c0_i32 = arith.constant 0 : i32
    %c0_i32_0 = arith.constant 0 : i32
    return %arg1, %c0_i32 : i32, i32
  }
  func.func @transform_2(%arg0: i32, %arg1: i32) -> (i32, i32) {
    %c0_i32 = arith.constant 0 : i32
    %c0_i32_0 = arith.constant 0 : i32
    %c0_i32_1 = arith.constant 0 : i32
    return %c0_i32, %c0_i32_0 : i32, i32
  }
  func.func @transform_3(%arg0: i32, %arg1: i32) -> (i32, i32) {
    %c0_i32 = arith.constant 0 : i32
    %c0_i32_0 = arith.constant 0 : i32
    %c0_i32_1 = arith.constant 0 : i32
    return %c0_i32, %c0_i32_0 : i32, i32
  }
  func.func @transform_4(%arg0: i32, %arg1: i32) -> (i32, i32) {
    %c0_i32 = arith.constant 0 : i32
    %c0_i32_0 = arith.constant 0 : i32
    %c0_i32_1 = arith.constant 0 : i32
    return %c0_i32, %c0_i32_0 : i32, i32
  }
  func.func @transform_5(%arg0: i32, %arg1: i32) -> (i32, i32) {
    %c0_i32 = arith.constant 0 : i32
    %c0_i32_0 = arith.constant 0 : i32
    return %arg0, %c0_i32 : i32, i32
  }
}

</mosaic_0001>

<bundles_post_ra>
// kernel: forward.4
= control target key start
LH: loop header
LB: loop body
LE: loop exit
PB: predicated region body
PF: predicated region fallthrough
CT: control target
= control target key end

     0   :  { %s1544_s12 = smov 0   ;;  %s1546_s13 = smov 0   ;;  %s1753_s0 = inlined_call_operand.vmem [shape: bf16[1024,256], index: 0, kind: input, shape index: {}]   ;;  %s1754_s1 = inlined_call_operand.vmem [shape: bf16[256,128], index: 1, kind: input, shape index: {}]   ;;  %s1755_s2 = inlined_call_operand.vmem [shape: f32[1,128], index: 2, kind: input, shape index: {}]   ;;  %s1756_s3 = inlined_call_operand.vmem [shape: bf16[1024,128], index: 3, kind: output, shape index: {}]  }
   0x1   :  { %s1548_s14 = smov 0  }
   0x2 LB: > { %s25_s15 = sadd.s32 1, %s1518_s13  ;;  %p1115_p0 = scmp.ge.s32.totalorder %s1522_s14, 1  ;;  %s1522_s14 = sphi %s1548_s14, %s13_s14   ;;  %s1518_s13 = sphi %s1546_s13, %s1758_s13   ;;  %s1514_s12 = sphi %s1544_s12, %s1757_s12  }
   0x3   : > { %p27_p1 = scmp.ge.s32.totalorder %s25_s15, 4  ;;  %p169_p2 = scmp.lt.s32.totalorder %s1522_s14, 5 }
   0x5   : > { %s1760_s15 = smov (%p27_p1, %s25_s15), 0  ;;  %p170_p3 = pnand %p1115_p0, %p169_p2 }
   0x6   : > { %s1116_s28 = sshll.u32 (!%p170_p3), %s1514_s12, 5 }
   0x7   : > { %173 = sbr.rel (%p170_p3) target bundleno = 306 (0x132), region = 32  ;;  %p205_p4 = scmp.lt.s32.totalorder (!%p170_p3), %s1116_s28, 127 }
   0xc   : > { %v1355_v0 = vld [vmem:[%s1754_s1 + $0x38] sm:$0xff]  ;;  %v1354_v2 = vld [vmem:[%s1754_s1 + $0x30] sm:$0xff]  ;;  %v1353_v4 = vld [vmem:[%s1754_s1 + $0x28] sm:$0xff]  ;;  %s1762_s28 = smov (!%p205_p4, %s1116_s28), 127 }
   0xd   : > { %v1363_v1 = vld [vmem:[%s1754_s1 + $0x78] sm:$0xff]  ;;  %615 = vmatpush.bf16.msra.mxu0 %v1355_v0  ;;  %1459 = vmatpush.bf16.msra.mxu2 %v1355_v0  ;;  %v1362_v3 = vld [vmem:[%s1754_s1 + $0x70] sm:$0xff]  ;;  %v1361_v5 = vld [vmem:[%s1754_s1 + $0x68] sm:$0xff]  ;;  %s1315_s17 = sshll.u32 %s1762_s28, 3  ;;  %s1120_s5 = sshll.u32 %s1762_s28, 2 }
   0xe   : > { %704 = vmatpush.bf16.msra.mxu1 %v1363_v1  ;;  %1467 = vmatpush.bf16.msra.mxu3 %v1363_v1  ;;  %v1352_v6 = vld [vmem:[%s1754_s1 + $0x20] sm:$0xff]  ;;  %v1351_v8 = vld [vmem:[%s1754_s1 + $0x18] sm:$0xff]  ;;  %v1350_v10 = vld [vmem:[%s1754_s1 + $0x10] sm:$0xff]  ;;  %s1610_s22 = scalar_lea.vmem %s1753_s0, %s1315_s17  ;;  %s1696_s8 = scalar_lea.vmem %s1756_s3, %s1120_s5 }
   0xf   : > { %v1360_v7 = vld [vmem:[%s1754_s1 + $0x60] sm:$0xff]  ;;  %v1359_v9 = vld [vmem:[%s1754_s1 + $0x58] sm:$0xff]  ;;  %v1358_v11 = vld [vmem:[%s1754_s1 + $0x50] sm:$0xff] }
  0x10   : > { %v1349_v12 = vld [vmem:[%s1754_s1 + $0x8] sm:$0xff]  ;;  %v1348_v14 = vld [vmem:[%s1754_s1] sm:$0xff]  ;;  %v1131_v28 = vld [vmem:[%s1610_s22 + $0x10] sm:$0xf] }
  0x11   : > { %616 = vmatpush.bf16.msra.mxu0 %v1354_v2  ;;  %1460 = vmatpush.bf16.msra.mxu2 %v1354_v2  ;;  %v1357_v13 = vld [vmem:[%s1754_s1 + $0x48] sm:$0xff]  ;;  %v1356_v15 = vld [vmem:[%s1754_s1 + $0x40] sm:$0xff]  ;;  %v1319_v29 = vld [vmem:[%s1610_s22 + $0x14] sm:$0xf0] }
  0x12   : > { %705 = vmatpush.bf16.msra.mxu1 %v1362_v3  ;;  %1468 = vmatpush.bf16.msra.mxu3 %v1362_v3  ;;  %v1123_v16 = vld [vmem:[%s1610_s22] sm:$0xf]  ;;  %v1317_v17 = vld [vmem:[%s1610_s22 + $0x4] sm:$0xf0]  ;;  %v1316_v20 = vld [vmem:[%s1610_s22 + $0x4] sm:$0xf]  ;;  %v1132_v36 = vor.u32 %v1319_v29, %v1131_v28 }
  0x13   : > { %v1187_v18 = vld [vmem:[%s1610_s22 + $0x80] sm:$0xf]  ;;  %v1333_v19 = vld [vmem:[%s1610_s22 + $0x84] sm:$0xf0]  ;;  %v1125_v21 = vld [vmem:[%s1610_s22 + $0x8] sm:$0xf0]  ;;  %v1124_v24 = vor.u32 %v1317_v17, %v1123_v16 }
  0x14   : > { %v1332_v22 = vld [vmem:[%s1610_s22 + $0x84] sm:$0xf]  ;;  %v1189_v23 = vld [vmem:[%s1610_s22 + $0x88] sm:$0xf0]  ;;  %v1188_v25 = vor.u32 %v1333_v19, %v1187_v18  ;;  %v1128_v26 = vor.u32 %v1316_v20, %v1125_v21  ;;  %v1195_v30 = vld [vmem:[%s1610_s22 + $0x90] sm:$0xf] }
  0x15   : > { %617 = vmatpush.bf16.msra.mxu0 %v1353_v4  ;;  %1461 = vmatpush.bf16.msra.mxu2 %v1353_v4  ;;  %v1192_v27 = vor.u32 %v1332_v22, %v1189_v23  ;;  %v1335_v31 = vld [vmem:[%s1610_s22 + $0x94] sm:$0xf0]  ;;  %v1318_v32 = vld [vmem:[%s1610_s22 + $0x14] sm:$0xf]  ;;  %v1133_v33 = vld [vmem:[%s1610_s22 + $0x18] sm:$0xf0] }
  0x16   : > { %706 = vmatpush.bf16.msra.mxu1 %v1361_v5  ;;  %1469 = vmatpush.bf16.msra.mxu3 %v1361_v5  ;;  %v1334_v34 = vld [vmem:[%s1610_s22 + $0x94] sm:$0xf]  ;;  %v1197_v35 = vld [vmem:[%s1610_s22 + $0x98] sm:$0xf0]  ;;  %v1196_v37 = vor.u32 %v1335_v31, %v1195_v30  ;;  %v1136_v38 = vor.u32 %v1318_v32, %v1133_v33  ;;  %v1139_v40 = vld [vmem:[%s1610_s22 + $0x20] sm:$0xf] }
  0x17   : > { %v1200_v39 = vor.u32 %v1334_v34, %v1197_v35  ;;  %v1321_v41 = vld [vmem:[%s1610_s22 + $0x24] sm:$0xf0]  ;;  %v1203_v42 = vld [vmem:[%s1610_s22 + $0xa0] sm:$0xf]  ;;  %v1320_v44 = vld [vmem:[%s1610_s22 + $0x24] sm:$0xf] }
  0x18   : > { %v1337_v43 = vld [vmem:[%s1610_s22 + $0xa4] sm:$0xf0]  ;;  %v1141_v45 = vld [vmem:[%s1610_s22 + $0x28] sm:$0xf0]  ;;  %v1336_v46 = vld [vmem:[%s1610_s22 + $0xa4] sm:$0xf]  ;;  %v1140_v48 = vor.u32 %v1321_v41, %v1139_v40 }
  0x19   : > { %618 = vmatpush.bf16.msra.mxu0 %v1352_v6  ;;  %1462 = vmatpush.bf16.msra.mxu2 %v1352_v6  ;;  %v1205_v47 = vld [vmem:[%s1610_s22 + $0xa8] sm:$0xf0]  ;;  %v1204_v49 = vor.u32 %v1337_v43, %v1203_v42  ;;  %v1144_v50 = vor.u32 %v1320_v44, %v1141_v45  ;;  %v1147_v52 = vld [vmem:[%s1610_s22 + $0x30] sm:$0xf]  ;;  %v1323_v53 = vld [vmem:[%s1610_s22 + $0x34] sm:$0xf0] }
  0x1a   : > { %707 = vmatpush.bf16.msra.mxu1 %v1360_v7  ;;  %1470 = vmatpush.bf16.msra.mxu3 %v1360_v7  ;;  %v1208_v51 = vor.u32 %v1336_v46, %v1205_v47  ;;  %v1211_v54 = vld [vmem:[%s1610_s22 + $0xb0] sm:$0xf]  ;;  %v1339_v55 = vld [vmem:[%s1610_s22 + $0xb4] sm:$0xf0]  ;;  %v1322_v56 = vld [vmem:[%s1610_s22 + $0x34] sm:$0xf]  ;;  %v1148_v60 = vor.u32 %v1323_v53, %v1147_v52 }
  0x1b   : > { %v1149_v57 = vld [vmem:[%s1610_s22 + $0x38] sm:$0xf0]  ;;  %v1338_v58 = vld [vmem:[%s1610_s22 + $0xb4] sm:$0xf]  ;;  %v1212_v61 = vor.u32 %v1339_v55, %v1211_v54  ;;  %v1155_v0 = vld [vmem:[%s1610_s22 + $0x40] sm:$0xf] }
  0x1c   : > { %v1213_v59 = vld [vmem:[%s1610_s22 + $0xb8] sm:$0xf0]  ;;  %v1152_v62 = vor.u32 %v1322_v56, %v1149_v57  ;;  %v1325_v1 = vld [vmem:[%s1610_s22 + $0x44] sm:$0xf0]  ;;  %v1219_v2 = vld [vmem:[%s1610_s22 + $0xc0] sm:$0xf] }
  0x1d   : > { %619 = vmatpush.bf16.msra.mxu0 %v1351_v8  ;;  %1463 = vmatpush.bf16.msra.mxu2 %v1351_v8  ;;  %v1216_v63 = vor.u32 %v1338_v58, %v1213_v59  ;;  %v1341_v3 = vld [vmem:[%s1610_s22 + $0xc4] sm:$0xf0]  ;;  %v1324_v4 = vld [vmem:[%s1610_s22 + $0x44] sm:$0xf]  ;;  %v1157_v5 = vld [vmem:[%s1610_s22 + $0x48] sm:$0xf0]  ;;  %v1156_v8 = vor.u32 %v1325_v1, %v1155_v0 }
  0x1e   : > { %708 = vmatpush.bf16.msra.mxu1 %v1359_v9  ;;  %1471 = vmatpush.bf16.msra.mxu3 %v1359_v9  ;;  %v1340_v6 = vld [vmem:[%s1610_s22 + $0xc4] sm:$0xf]  ;;  %v1221_v7 = vld [vmem:[%s1610_s22 + $0xc8] sm:$0xf0]  ;;  %v1220_v9 = vor.u32 %v1341_v3, %v1219_v2  ;;  %v1326_v16 = vld [vmem:[%s1610_s22 + $0x54] sm:$0xf] }
  0x1f   : > { %v1165_v17 = vld [vmem:[%s1610_s22 + $0x58] sm:$0xf0]  ;;  %v1342_v18 = vld [vmem:[%s1610_s22 + $0xd4] sm:$0xf]  ;;  %v1328_v28 = vld [vmem:[%s1610_s22 + $0x64] sm:$0xf] }
  0x20   : > { %v1229_v19 = vld [vmem:[%s1610_s22 + $0xd8] sm:$0xf0]  ;;  %v1168_v22 = vor.u32 %v1326_v16, %v1165_v17  ;;  %v1173_v29 = vld [vmem:[%s1610_s22 + $0x68] sm:$0xf0]  ;;  %v1344_v30 = vld [vmem:[%s1610_s22 + $0xe4] sm:$0xf] }
  0x21   : > { %620 = vmatpush.bf16.msra.mxu0 %v1350_v10  ;;  %1464 = vmatpush.bf16.msra.mxu2 %v1350_v10  ;;  %v1160_v10 = vor.u32 %v1324_v4, %v1157_v5  ;;  %v1232_v23 = vor.u32 %v1342_v18, %v1229_v19  ;;  %v1237_v31 = vld [vmem:[%s1610_s22 + $0xe8] sm:$0xf0]  ;;  %v1176_v34 = vor.u32 %v1328_v28, %v1173_v29  ;;  %v1330_v40 = vld [vmem:[%s1610_s22 + $0x74] sm:$0xf]  ;;  %v1181_v41 = vld [vmem:[%s1610_s22 + $0x78] sm:$0xf0] }
  0x22   : > { %709 = vmatpush.bf16.msra.mxu1 %v1358_v11  ;;  %1472 = vmatpush.bf16.msra.mxu3 %v1358_v11  ;;  %v1224_v11 = vor.u32 %v1340_v6, %v1221_v7  ;;  %v1240_v35 = vor.u32 %v1344_v30, %v1237_v31  ;;  %v1346_v42 = vld [vmem:[%s1610_s22 + $0xf4] sm:$0xf]  ;;  %v1245_v43 = vld [vmem:[%s1610_s22 + $0xf8] sm:$0xf0]  ;;  %v1184_v46 = vor.u32 %v1330_v40, %v1181_v41 }
  0x23   : > { %v1248_v47 = vor.u32 %v1346_v42, %v1245_v43 }
  0x25   : > { %621 = vmatpush.bf16.msra.mxu0 %v1349_v12  ;;  %1465 = vmatpush.bf16.msra.mxu2 %v1349_v12  ;;  %v1163_v12 = vld [vmem:[%s1610_s22 + $0x50] sm:$0xf] }
  0x26   : > { %710 = vmatpush.bf16.msra.mxu1 %v1357_v13  ;;  %1473 = vmatpush.bf16.msra.mxu3 %v1357_v13  ;;  %v1327_v13 = vld [vmem:[%s1610_s22 + $0x54] sm:$0xf0] }
  0x27   : > { %v1164_v20 = vor.u32 %v1327_v13, %v1163_v12 }
  0x29   : > { %622 = vmatpush.bf16.msra.mxu0 %v1348_v14  ;;  %1466 = vmatpush.bf16.msra.mxu2 %v1348_v14  ;;  %v1227_v14 = vld [vmem:[%s1610_s22 + $0xd0] sm:$0xf] }
  0x2a   : > { %711 = vmatpush.bf16.msra.mxu1 %v1356_v15  ;;  %1474 = vmatpush.bf16.msra.mxu3 %v1356_v15  ;;  %v1343_v15 = vld [vmem:[%s1610_s22 + $0xd4] sm:$0xf0] }
  0x2b   : > { %v1228_v21 = vor.u32 %v1343_v15, %v1227_v14 }
  0x2c   : > { %623 = vmatmul.bf16.vlgmr.msra.gmra.mxu0 %v1124_v24  ;;  %663 = vmatmul.bf16.vlgmr.msra.gmra.mxu2 %v1188_v25  ;;  %v1171_v24 = vld [vmem:[%s1610_s22 + $0x60] sm:$0xf]  ;;  %v1329_v25 = vld [vmem:[%s1610_s22 + $0x64] sm:$0xf0] }
  0x2d   : > { %712 = vmatmul.bf16.vlgmr.msra.gmra.mxu1 %v1128_v26  ;;  %752 = vmatmul.bf16.vlgmr.msra.gmra.mxu3 %v1192_v27  ;;  %v1235_v26 = vld [vmem:[%s1610_s22 + $0xe0] sm:$0xf]  ;;  %v1345_v27 = vld [vmem:[%s1610_s22 + $0xe4] sm:$0xf0]  ;;  %v1172_v32 = vor.u32 %v1329_v25, %v1171_v24 }
  0x2e   : > { %v1236_v33 = vor.u32 %v1345_v27, %v1235_v26 }
  0x3c   : > { %628 = vmatmul.bf16.gmra.mxu0 %v1132_v36  ;;  %668 = vmatmul.bf16.gmra.mxu2 %v1196_v37  ;;  %v1179_v36 = vld [vmem:[%s1610_s22 + $0x70] sm:$0xf]  ;;  %v1331_v37 = vld [vmem:[%s1610_s22 + $0x74] sm:$0xf0] }
  0x3d   : > { %717 = vmatmul.bf16.gmra.mxu1 %v1136_v38  ;;  %757 = vmatmul.bf16.gmra.mxu3 %v1200_v39  ;;  %v1243_v38 = vld [vmem:[%s1610_s22 + $0xf0] sm:$0xf]  ;;  %v1347_v39 = vld [vmem:[%s1610_s22 + $0xf4] sm:$0xf0]  ;;  %v1180_v44 = vor.u32 %v1331_v37, %v1179_v36 }
  0x3e   : > { %v1244_v45 = vor.u32 %v1347_v39, %v1243_v38 }
  0x4c   : > { %633 = vmatmul.bf16.gmra.mxu0 %v1140_v48  ;;  %673 = vmatmul.bf16.gmra.mxu2 %v1204_v49 }
  0x4d   : > { %722 = vmatmul.bf16.gmra.mxu1 %v1144_v50  ;;  %762 = vmatmul.bf16.gmra.mxu3 %v1208_v51  ;;  %v1688_v51 = vld [vmem:[%s1755_s2] ss:$0 sm:$0xff] }
  0x5c   : > { %638 = vmatmul.bf16.gmra.mxu0 %v1148_v60  ;;  %678 = vmatmul.bf16.gmra.mxu2 %v1212_v61 }
  0x5d   : > { %727 = vmatmul.bf16.gmra.mxu1 %v1152_v62  ;;  %767 = vmatmul.bf16.gmra.mxu3 %v1216_v63 }
  0x6c   : > { %643 = vmatmul.bf16.gmra.mxu0 %v1156_v8  ;;  %683 = vmatmul.bf16.gmra.mxu2 %v1220_v9 }
  0x6d   : > { %732 = vmatmul.bf16.gmra.mxu1 %v1160_v10  ;;  %772 = vmatmul.bf16.gmra.mxu3 %v1224_v11 }
  0x7c   : > { %648 = vmatmul.bf16.gmra.mxu0 %v1164_v20  ;;  %688 = vmatmul.bf16.gmra.mxu2 %v1228_v21 }
  0x7d   : > { %737 = vmatmul.bf16.gmra.mxu1 %v1168_v22  ;;  %777 = vmatmul.bf16.gmra.mxu3 %v1232_v23 }
  0x8c   : > { %653 = vmatmul.bf16.gmra.mxu0 %v1172_v32  ;;  %693 = vmatmul.bf16.gmra.mxu2 %v1236_v33 }
  0x8d   : > { %742 = vmatmul.bf16.gmra.mxu1 %v1176_v34  ;;  %782 = vmatmul.bf16.gmra.mxu3 %v1240_v35 }
  0x9c   : > { %658 = vmatmul.bf16.gmra.mxu0 %v1180_v44  ;;  %698 = vmatmul.bf16.gmra.mxu2 %v1244_v45 }
  0x9d   : > { %747 = vmatmul.bf16.gmra.mxu1 %v1184_v46  ;;  %787 = vmatmul.bf16.gmra.mxu3 %v1248_v47 }
  0xa9   : > { %v624_v48 = vpop.f32.mrf.mxu0 }
  0xaa   : > { %v713_v49 = vpop.f32.mrf.mxu1 }
  0xab   : > { %v714_v50 = vadd.f32 %v713_v49, %v624_v48 }
  0xad   : > { %v896_v56 = vadd.f32 %v1688_v51, %v714_v50 }
  0xaf   : > { %v664_v52 = vpop.f32.mrf.mxu2  ;;  %v928_v60 = vmax.f32 %v896_v56, 0.0 }
  0xb0   : > { %v753_v53 = vpop.f32.mrf.mxu3 }
  0xb1   : > { %v626_v54 = vpop.f32.mrf.mxu0  ;;  %v754_v58 = vadd.f32 %v753_v53, %v664_v52 }
  0xb2   : > { %v715_v55 = vpop.f32.mrf.mxu1 }
  0xb3   : > { %v716_v57 = vadd.f32 %v715_v55, %v626_v54  ;;  %v912_v0 = vadd.f32 %v1688_v51, %v754_v58 }
  0xb5   : > { %v897_v59 = vadd.f32 %v1688_v51, %v716_v57  ;;  %v944_v6 = vmax.f32 %v912_v0, 0.0 }
  0xb7   : > { %v929_v61 = vmax.f32 %v897_v59, 0.0  ;;  %v666_v62 = vpop.f32.mrf.mxu2 }
  0xb8   : > { %v755_v63 = vpop.f32.mrf.mxu3 }
  0xb9   : > { %v1367_v1 = vpack.c.bf16 %v929_v61, %v928_v60  ;;  %v756_v2 = vadd.f32 %v755_v63, %v666_v62  ;;  %v629_v3 = vpop.f32.mrf.mxu0 }
  0xba   : > { %v718_v4 = vpop.f32.mrf.mxu1 }
  0xbb   : > { %1368 = vst [vmem:[%s1696_s8] sm:$0xff] %v1367_v1   ;;  %v913_v5 = vadd.f32 %v1688_v51, %v756_v2  ;;  %v719_v9 = vadd.f32 %v718_v4, %v629_v3 }
  0xbd   : > { %v945_v7 = vmax.f32 %v913_v5, 0.0  ;;  %v898_v14 = vadd.f32 %v1688_v51, %v719_v9 }
  0xbf   : > { %v1407_v8 = vpack.c.bf16 %v945_v7, %v944_v6  ;;  %v669_v10 = vpop.f32.mrf.mxu2  ;;  %v930_v18 = vmax.f32 %v898_v14, 0.0 }
  0xc0   : > { %v758_v11 = vpop.f32.mrf.mxu3 }
  0xc1   : > { %1451 = vst [vmem:[%s1696_s8 + $0x40] sm:$0xff] %v1407_v8   ;;  %v631_v12 = vpop.f32.mrf.mxu0  ;;  %v759_v16 = vadd.f32 %v758_v11, %v669_v10 }
  0xc2   : > { %v720_v13 = vpop.f32.mrf.mxu1 }
  0xc3   : > { %v721_v15 = vadd.f32 %v720_v13, %v631_v12  ;;  %v914_v22 = vadd.f32 %v1688_v51, %v759_v16 }
  0xc5   : > { %v899_v17 = vadd.f32 %v1688_v51, %v721_v15  ;;  %v946_v28 = vmax.f32 %v914_v22, 0.0 }
  0xc7   : > { %v931_v19 = vmax.f32 %v899_v17, 0.0  ;;  %v671_v20 = vpop.f32.mrf.mxu2 }
  0xc8   : > { %v760_v21 = vpop.f32.mrf.mxu3 }
  0xc9   : > { %v1372_v23 = vpack.c.bf16 %v931_v19, %v930_v18  ;;  %v761_v24 = vadd.f32 %v760_v21, %v671_v20  ;;  %v634_v25 = vpop.f32.mrf.mxu0 }
  0xca   : > { %v723_v26 = vpop.f32.mrf.mxu1 }
  0xcb   : > { %1444 = vst [vmem:[%s1696_s8 + $0x8] sm:$0xff] %v1372_v23   ;;  %v915_v27 = vadd.f32 %v1688_v51, %v761_v24  ;;  %v724_v31 = vadd.f32 %v723_v26, %v634_v25 }
  0xcd   : > { %v947_v29 = vmax.f32 %v915_v27, 0.0  ;;  %v900_v36 = vadd.f32 %v1688_v51, %v724_v31 }
  0xcf   : > { %v1412_v30 = vpack.c.bf16 %v947_v29, %v946_v28  ;;  %v674_v32 = vpop.f32.mrf.mxu2  ;;  %v932_v40 = vmax.f32 %v900_v36, 0.0 }
  0xd0   : > { %v763_v33 = vpop.f32.mrf.mxu3 }
  0xd1   : > { %1452 = vst [vmem:[%s1696_s8 + $0x48] sm:$0xff] %v1412_v30   ;;  %v636_v34 = vpop.f32.mrf.mxu0  ;;  %v764_v38 = vadd.f32 %v763_v33, %v674_v32 }
  0xd2   : > { %v725_v35 = vpop.f32.mrf.mxu1 }
  0xd3   : > { %v726_v37 = vadd.f32 %v725_v35, %v636_v34  ;;  %v916_v44 = vadd.f32 %v1688_v51, %v764_v38 }
  0xd5   : > { %v901_v39 = vadd.f32 %v1688_v51, %v726_v37  ;;  %v948_v50 = vmax.f32 %v916_v44, 0.0 }
  0xd7   : > { %v933_v41 = vmax.f32 %v901_v39, 0.0  ;;  %v676_v42 = vpop.f32.mrf.mxu2 }
  0xd8   : > { %v765_v43 = vpop.f32.mrf.mxu3 }
  0xd9   : > { %v1377_v45 = vpack.c.bf16 %v933_v41, %v932_v40  ;;  %v766_v46 = vadd.f32 %v765_v43, %v676_v42  ;;  %v639_v47 = vpop.f32.mrf.mxu0 }
  0xda   : > { %v728_v48 = vpop.f32.mrf.mxu1 }
  0xdb   : > { %1445 = vst [vmem:[%s1696_s8 + $0x10] sm:$0xff] %v1377_v45   ;;  %v917_v49 = vadd.f32 %v1688_v51, %v766_v46  ;;  %v729_v54 = vadd.f32 %v728_v48, %v639_v47 }
  0xdd   : > { %v949_v52 = vmax.f32 %v917_v49, 0.0  ;;  %v902_v59 = vadd.f32 %v1688_v51, %v729_v54 }
  0xdf   : > { %v1417_v53 = vpack.c.bf16 %v949_v52, %v948_v50  ;;  %v679_v55 = vpop.f32.mrf.mxu2  ;;  %v934_v63 = vmax.f32 %v902_v59, 0.0 }
  0xe0   : > { %v768_v56 = vpop.f32.mrf.mxu3 }
  0xe1   : > { %1453 = vst [vmem:[%s1696_s8 + $0x50] sm:$0xff] %v1417_v53   ;;  %v641_v57 = vpop.f32.mrf.mxu0  ;;  %v769_v61 = vadd.f32 %v768_v56, %v679_v55 }
  0xe2   : > { %v730_v58 = vpop.f32.mrf.mxu1 }
  0xe3   : > { %v731_v60 = vadd.f32 %v730_v58, %v641_v57  ;;  %v918_v3 = vadd.f32 %v1688_v51, %v769_v61 }
  0xe5   : > { %v903_v62 = vadd.f32 %v1688_v51, %v731_v60  ;;  %v950_v9 = vmax.f32 %v918_v3, 0.0 }
  0xe7   : > { %v935_v0 = vmax.f32 %v903_v62, 0.0  ;;  %v681_v1 = vpop.f32.mrf.mxu2 }
  0xe8   : > { %v770_v2 = vpop.f32.mrf.mxu3 }
  0xe9   : > { %v1382_v4 = vpack.c.bf16 %v935_v0, %v934_v63  ;;  %v771_v5 = vadd.f32 %v770_v2, %v681_v1  ;;  %v644_v6 = vpop.f32.mrf.mxu0 }
  0xea   : > { %v733_v7 = vpop.f32.mrf.mxu1 }
  0xeb   : > { %1446 = vst [vmem:[%s1696_s8 + $0x18] sm:$0xff] %v1382_v4   ;;  %v919_v8 = vadd.f32 %v1688_v51, %v771_v5  ;;  %v734_v12 = vadd.f32 %v733_v7, %v644_v6 }
  0xed   : > { %v951_v10 = vmax.f32 %v919_v8, 0.0  ;;  %v904_v17 = vadd.f32 %v1688_v51, %v734_v12 }
  0xef   : > { %v1422_v11 = vpack.c.bf16 %v951_v10, %v950_v9  ;;  %v684_v13 = vpop.f32.mrf.mxu2  ;;  %v936_v21 = vmax.f32 %v904_v17, 0.0 }
  0xf0   : > { %v773_v14 = vpop.f32.mrf.mxu3 }
  0xf1   : > { %1454 = vst [vmem:[%s1696_s8 + $0x58] sm:$0xff] %v1422_v11   ;;  %v646_v15 = vpop.f32.mrf.mxu0  ;;  %v774_v19 = vadd.f32 %v773_v14, %v684_v13 }
  0xf2   : > { %v735_v16 = vpop.f32.mrf.mxu1 }
  0xf3   : > { %v736_v18 = vadd.f32 %v735_v16, %v646_v15  ;;  %v920_v25 = vadd.f32 %v1688_v51, %v774_v19 }
  0xf5   : > { %v905_v20 = vadd.f32 %v1688_v51, %v736_v18  ;;  %v952_v31 = vmax.f32 %v920_v25, 0.0 }
  0xf7   : > { %v937_v22 = vmax.f32 %v905_v20, 0.0  ;;  %v686_v23 = vpop.f32.mrf.mxu2 }
  0xf8   : > { %v775_v24 = vpop.f32.mrf.mxu3 }
  0xf9   : > { %v1387_v26 = vpack.c.bf16 %v937_v22, %v936_v21  ;;  %v776_v27 = vadd.f32 %v775_v24, %v686_v23  ;;  %v649_v28 = vpop.f32.mrf.mxu0 }
  0xfa   : > { %v738_v29 = vpop.f32.mrf.mxu1 }
  0xfb   : > { %1447 = vst [vmem:[%s1696_s8 + $0x20] sm:$0xff] %v1387_v26   ;;  %v921_v30 = vadd.f32 %v1688_v51, %v776_v27  ;;  %v739_v34 = vadd.f32 %v738_v29, %v649_v28 }
  0xfd   : > { %v953_v32 = vmax.f32 %v921_v30, 0.0  ;;  %v906_v39 = vadd.f32 %v1688_v51, %v739_v34 }
  0xff   : > { %v1427_v33 = vpack.c.bf16 %v953_v32, %v952_v31  ;;  %v689_v35 = vpop.f32.mrf.mxu2  ;;  %v938_v43 = vmax.f32 %v906_v39, 0.0 }
 0x100   : > { %v778_v36 = vpop.f32.mrf.mxu3 }
 0x101   : > { %1455 = vst [vmem:[%s1696_s8 + $0x60] sm:$0xff] %v1427_v33   ;;  %v651_v37 = vpop.f32.mrf.mxu0  ;;  %v779_v41 = vadd.f32 %v778_v36, %v689_v35 }
 0x102   : > { %v740_v38 = vpop.f32.mrf.mxu1 }
 0x103   : > { %v741_v40 = vadd.f32 %v740_v38, %v651_v37  ;;  %v922_v47 = vadd.f32 %v1688_v51, %v779_v41 }
 0x105   : > { %v907_v42 = vadd.f32 %v1688_v51, %v741_v40  ;;  %v954_v54 = vmax.f32 %v922_v47, 0.0 }
 0x107   : > { %v939_v44 = vmax.f32 %v907_v42, 0.0  ;;  %v691_v45 = vpop.f32.mrf.mxu2 }
 0x108   : > { %v780_v46 = vpop.f32.mrf.mxu3 }
 0x109   : > { %v1392_v48 = vpack.c.bf16 %v939_v44, %v938_v43  ;;  %v781_v49 = vadd.f32 %v780_v46, %v691_v45  ;;  %v654_v50 = vpop.f32.mrf.mxu0 }
 0x10a   : > { %v743_v52 = vpop.f32.mrf.mxu1 }
 0x10b   : > { %1448 = vst [vmem:[%s1696_s8 + $0x28] sm:$0xff] %v1392_v48   ;;  %v923_v53 = vadd.f32 %v1688_v51, %v781_v49  ;;  %v744_v57 = vadd.f32 %v743_v52, %v654_v50 }
 0x10d   : > { %v955_v55 = vmax.f32 %v923_v53, 0.0  ;;  %v908_v62 = vadd.f32 %v1688_v51, %v744_v57 }
 0x10f   : > { %v1432_v56 = vpack.c.bf16 %v955_v55, %v954_v54  ;;  %v694_v58 = vpop.f32.mrf.mxu2  ;;  %v940_v2 = vmax.f32 %v908_v62, 0.0 }
 0x110   : > { %v783_v59 = vpop.f32.mrf.mxu3 }
 0x111   : > { %1456 = vst [vmem:[%s1696_s8 + $0x68] sm:$0xff] %v1432_v56   ;;  %v656_v60 = vpop.f32.mrf.mxu0  ;;  %v784_v0 = vadd.f32 %v783_v59, %v694_v58 }
 0x112   : > { %v745_v61 = vpop.f32.mrf.mxu1 }
 0x113   : > { %v746_v63 = vadd.f32 %v745_v61, %v656_v60  ;;  %v924_v6 = vadd.f32 %v1688_v51, %v784_v0 }
 0x115   : > { %v909_v1 = vadd.f32 %v1688_v51, %v746_v63  ;;  %v956_v12 = vmax.f32 %v924_v6, 0.0 }
 0x117   : > { %v941_v3 = vmax.f32 %v909_v1, 0.0  ;;  %v696_v4 = vpop.f32.mrf.mxu2 }
 0x118   : > { %v785_v5 = vpop.f32.mrf.mxu3 }
 0x119   : > { %v1397_v7 = vpack.c.bf16 %v941_v3, %v940_v2  ;;  %v786_v8 = vadd.f32 %v785_v5, %v696_v4  ;;  %v659_v9 = vpop.f32.mrf.mxu0 }
 0x11a   : > { %v748_v10 = vpop.f32.mrf.mxu1 }
 0x11b   : > { %1449 = vst [vmem:[%s1696_s8 + $0x30] sm:$0xff] %v1397_v7   ;;  %v925_v11 = vadd.f32 %v1688_v51, %v786_v8  ;;  %v749_v15 = vadd.f32 %v748_v10, %v659_v9 }
 0x11d   : > { %v957_v13 = vmax.f32 %v925_v11, 0.0  ;;  %v910_v20 = vadd.f32 %v1688_v51, %v749_v15 }
 0x11f   : > { %v1437_v14 = vpack.c.bf16 %v957_v13, %v956_v12  ;;  %v699_v16 = vpop.f32.mrf.mxu2  ;;  %v942_v24 = vmax.f32 %v910_v20, 0.0 }
 0x120   : > { %v788_v17 = vpop.f32.mrf.mxu3 }
 0x121   : > { %1457 = vst [vmem:[%s1696_s8 + $0x70] sm:$0xff] %v1437_v14   ;;  %v661_v18 = vpop.f32.mrf.mxu0  ;;  %v789_v22 = vadd.f32 %v788_v17, %v699_v16 }
 0x122   : > { %v750_v19 = vpop.f32.mrf.mxu1 }
 0x123   : > { %v751_v21 = vadd.f32 %v750_v19, %v661_v18  ;;  %v926_v28 = vadd.f32 %v1688_v51, %v789_v22 }
 0x125   : > { %v911_v23 = vadd.f32 %v1688_v51, %v751_v21  ;;  %v958_v32 = vmax.f32 %v926_v28, 0.0 }
 0x127   : > { %v943_v25 = vmax.f32 %v911_v23, 0.0  ;;  %v701_v26 = vpop.f32.mrf.mxu2 }
 0x128   : > { %v790_v27 = vpop.f32.mrf.mxu3 }
 0x129   : > { %v1402_v29 = vpack.c.bf16 %v943_v25, %v942_v24  ;;  %v791_v30 = vadd.f32 %v790_v27, %v701_v26 }
 0x12b   : > { %1450 = vst [vmem:[%s1696_s8 + $0x38] sm:$0xff] %v1402_v29   ;;  %v927_v31 = vadd.f32 %v1688_v51, %v791_v30 }
 0x12d   : > { %v959_v33 = vmax.f32 %v927_v31, 0.0 }
 0x12f   : > { %v1442_v34 = vpack.c.bf16 %v959_v33, %v958_v32 }
 0x131   : > { %1458 = vst [vmem:[%s1696_s8 + $0x78] sm:$0xff] %v1442_v34  }
 0x132 PF: > { %s13_s14 = sadd.s32 1, %s1522_s14   ;;  %s1757_s12 = smov %s1518_s13 }
 0x133   : > { %p10_p5 = scmp.ge.s32.totalorder %s13_s14, 6   ;;  %s1758_s13 = smov %s1760_s15 }
 0x135   :  { %12 = sbr.rel (!%p10_p5) target bundleno = 2 (0x2), region = 73 }

// kernel: forward.5
= control target key start
LH: loop header
LB: loop body
LE: loop exit
PB: predicated region body
PF: predicated region fallthrough
CT: control target
= control target key end

     0   :  { %s1823_s1 = inlined_call_operand.vmem [shape: bf16[512,128], index: 1, kind: input, shape index: {}]   ;;  %s1824_s0 = inlined_call_operand.vmem [shape: bf16[168,512], index: 0, kind: input, shape index: {}]   ;;  %s1825_s2 = inlined_call_operand.vmem [shape: f32[1,128], index: 2, kind: input, shape index: {}]   ;;  %s1826_s3 = inlined_call_operand.vmem [shape: bf16[168,128], index: 3, kind: output, shape index: {}]  }
   0x1   :  { %v1317_v0 = vld [vmem:[%s1823_s1 + $0x38] sm:$0xff]  ;;  %v1316_v4 = vld [vmem:[%s1823_s1 + $0x30] sm:$0xff]  ;;  %v1315_v8 = vld [vmem:[%s1823_s1 + $0x28] sm:$0xff] }
   0x2   :  { %v1325_v1 = vld [vmem:[%s1823_s1 + $0x78] sm:$0xff]  ;;  %572 = vmatpush.bf16.msra.mxu0 %v1317_v0  ;;  %v1324_v5 = vld [vmem:[%s1823_s1 + $0x70] sm:$0xff]  ;;  %v1323_v9 = vld [vmem:[%s1823_s1 + $0x68] sm:$0xff] }
   0x3   :  { %v1333_v2 = vld [vmem:[%s1823_s1 + $0xb8] sm:$0xff]  ;;  %635 = vmatpush.bf16.msra.mxu1 %v1325_v1  ;;  %v1332_v6 = vld [vmem:[%s1823_s1 + $0xb0] sm:$0xff]  ;;  %v1331_v10 = vld [vmem:[%s1823_s1 + $0xa8] sm:$0xff] }
   0x4   :  { %v1341_v3 = vld [vmem:[%s1823_s1 + $0xf8] sm:$0xff]  ;;  %698 = vmatpush.bf16.msra.mxu2 %v1333_v2  ;;  %v1340_v7 = vld [vmem:[%s1823_s1 + $0xf0] sm:$0xff]  ;;  %v1339_v11 = vld [vmem:[%s1823_s1 + $0xe8] sm:$0xff] }
   0x5   :  { %761 = vmatpush.bf16.msra.mxu3 %v1341_v3  ;;  %v1314_v12 = vld [vmem:[%s1823_s1 + $0x20] sm:$0xff]  ;;  %v1313_v16 = vld [vmem:[%s1823_s1 + $0x18] sm:$0xff]  ;;  %v1312_v20 = vld [vmem:[%s1823_s1 + $0x10] sm:$0xff] }
   0x6   :  { %573 = vmatpush.bf16.msra.mxu0 %v1316_v4  ;;  %v1322_v13 = vld [vmem:[%s1823_s1 + $0x60] sm:$0xff]  ;;  %v1321_v17 = vld [vmem:[%s1823_s1 + $0x58] sm:$0xff]  ;;  %v1320_v21 = vld [vmem:[%s1823_s1 + $0x50] sm:$0xff] }
   0x7   :  { %636 = vmatpush.bf16.msra.mxu1 %v1324_v5  ;;  %v1330_v14 = vld [vmem:[%s1823_s1 + $0xa0] sm:$0xff]  ;;  %v1329_v18 = vld [vmem:[%s1823_s1 + $0x98] sm:$0xff]  ;;  %v1328_v22 = vld [vmem:[%s1823_s1 + $0x90] sm:$0xff] }
   0x8   :  { %699 = vmatpush.bf16.msra.mxu2 %v1332_v6  ;;  %v1338_v15 = vld [vmem:[%s1823_s1 + $0xe0] sm:$0xff]  ;;  %v1337_v19 = vld [vmem:[%s1823_s1 + $0xd8] sm:$0xff]  ;;  %v1336_v23 = vld [vmem:[%s1823_s1 + $0xd0] sm:$0xff] }
   0x9   :  { %762 = vmatpush.bf16.msra.mxu3 %v1340_v7  ;;  %v1311_v24 = vld [vmem:[%s1823_s1 + $0x8] sm:$0xff]  ;;  %v1310_v28 = vld [vmem:[%s1823_s1] sm:$0xff]  ;;  %v1272_v33 = vld [vmem:[%s1824_s0 + $0xc] sm:$0xf0] }
   0xa   :  { %574 = vmatpush.bf16.msra.mxu0 %v1315_v8  ;;  %v1319_v25 = vld [vmem:[%s1823_s1 + $0x48] sm:$0xff]  ;;  %v1318_v29 = vld [vmem:[%s1823_s1 + $0x40] sm:$0xff]  ;;  %v986_v35 = vld [vmem:[%s1824_s0 + $0x10] sm:$0xf0] }
   0xb   :  { %637 = vmatpush.bf16.msra.mxu1 %v1323_v9  ;;  %v1327_v26 = vld [vmem:[%s1823_s1 + $0x88] sm:$0xff]  ;;  %v1326_v30 = vld [vmem:[%s1823_s1 + $0x80] sm:$0xff]  ;;  %v1273_v37 = vld [vmem:[%s1824_s0 + $0x14] sm:$0xf0] }
   0xc   :  { %700 = vmatpush.bf16.msra.mxu2 %v1331_v10  ;;  %v1335_v27 = vld [vmem:[%s1823_s1 + $0xc8] sm:$0xff]  ;;  %v1334_v31 = vld [vmem:[%s1823_s1 + $0xc0] sm:$0xff]  ;;  %v994_v39 = vld [vmem:[%s1824_s0 + $0x18] sm:$0xf0] }
   0xd   :  { %763 = vmatpush.bf16.msra.mxu3 %v1339_v11  ;;  %v984_v32 = vld [vmem:[%s1824_s0] sm:$0xf]  ;;  %v1270_v34 = vld [vmem:[%s1824_s0 + $0x4] sm:$0xf]  ;;  %v992_v36 = vld [vmem:[%s1824_s0 + $0x8] sm:$0xf] }
   0xe   :  { %575 = vmatpush.bf16.msra.mxu0 %v1314_v12  ;;  %v1271_v38 = vld [vmem:[%s1824_s0 + $0xc] sm:$0xf]  ;;  %v985_v40 = vor.u32 %v1272_v33, %v984_v32  ;;  %v989_v41 = vor.u32 %v1270_v34, %v986_v35  ;;  %v993_v42 = vor.u32 %v1273_v37, %v992_v36  ;;  %v1000_v44 = vld [vmem:[%s1824_s0 + $0x20] sm:$0xf]  ;;  %v1276_v45 = vld [vmem:[%s1824_s0 + $0x2c] sm:$0xf0] }
   0xf   :  { %638 = vmatpush.bf16.msra.mxu1 %v1322_v13  ;;  %v997_v43 = vor.u32 %v1271_v38, %v994_v39  ;;  %v1274_v46 = vld [vmem:[%s1824_s0 + $0x24] sm:$0xf]  ;;  %v1002_v47 = vld [vmem:[%s1824_s0 + $0x30] sm:$0xf0]  ;;  %v1008_v48 = vld [vmem:[%s1824_s0 + $0x28] sm:$0xf]  ;;  %v1001_v52 = vor.u32 %v1276_v45, %v1000_v44 }
  0x10   :  { %701 = vmatpush.bf16.msra.mxu2 %v1330_v14  ;;  %v1277_v49 = vld [vmem:[%s1824_s0 + $0x34] sm:$0xf0]  ;;  %v1275_v50 = vld [vmem:[%s1824_s0 + $0x2c] sm:$0xf]  ;;  %v1010_v51 = vld [vmem:[%s1824_s0 + $0x38] sm:$0xf0]  ;;  %v1005_v53 = vor.u32 %v1274_v46, %v1002_v47 }
  0x11   :  { %764 = vmatpush.bf16.msra.mxu3 %v1338_v15  ;;  %v1009_v54 = vor.u32 %v1277_v49, %v1008_v48  ;;  %v1013_v55 = vor.u32 %v1275_v50, %v1010_v51  ;;  %v1016_v56 = vld [vmem:[%s1824_s0 + $0x40] sm:$0xf]  ;;  %v1280_v57 = vld [vmem:[%s1824_s0 + $0x4c] sm:$0xf0]  ;;  %v1278_v58 = vld [vmem:[%s1824_s0 + $0x44] sm:$0xf] }
  0x12   :  { %576 = vmatpush.bf16.msra.mxu0 %v1313_v16  ;;  %v1018_v59 = vld [vmem:[%s1824_s0 + $0x50] sm:$0xf0]  ;;  %v1024_v60 = vld [vmem:[%s1824_s0 + $0x48] sm:$0xf]  ;;  %v1281_v61 = vld [vmem:[%s1824_s0 + $0x54] sm:$0xf0]  ;;  %v1017_v0 = vor.u32 %v1280_v57, %v1016_v56 }
  0x13   :  { %639 = vmatpush.bf16.msra.mxu1 %v1321_v17  ;;  %v1279_v62 = vld [vmem:[%s1824_s0 + $0x4c] sm:$0xf]  ;;  %v1026_v63 = vld [vmem:[%s1824_s0 + $0x58] sm:$0xf0]  ;;  %v1021_v1 = vor.u32 %v1278_v58, %v1018_v59  ;;  %v1025_v2 = vor.u32 %v1281_v61, %v1024_v60  ;;  %v1032_v4 = vld [vmem:[%s1824_s0 + $0x60] sm:$0xf] }
  0x14   :  { %702 = vmatpush.bf16.msra.mxu2 %v1329_v18  ;;  %v1029_v3 = vor.u32 %v1279_v62, %v1026_v63  ;;  %v1284_v5 = vld [vmem:[%s1824_s0 + $0x6c] sm:$0xf0]  ;;  %v1282_v6 = vld [vmem:[%s1824_s0 + $0x64] sm:$0xf]  ;;  %v1034_v7 = vld [vmem:[%s1824_s0 + $0x70] sm:$0xf0] }
  0x15   :  { %765 = vmatpush.bf16.msra.mxu3 %v1337_v19  ;;  %v1040_v8 = vld [vmem:[%s1824_s0 + $0x68] sm:$0xf]  ;;  %v1285_v9 = vld [vmem:[%s1824_s0 + $0x74] sm:$0xf0]  ;;  %v1283_v10 = vld [vmem:[%s1824_s0 + $0x6c] sm:$0xf]  ;;  %v1033_v12 = vor.u32 %v1284_v5, %v1032_v4  ;;  %v1037_v13 = vor.u32 %v1282_v6, %v1034_v7 }
  0x16   :  { %577 = vmatpush.bf16.msra.mxu0 %v1312_v20  ;;  %v1042_v11 = vld [vmem:[%s1824_s0 + $0x78] sm:$0xf0]  ;;  %v1041_v14 = vor.u32 %v1285_v9, %v1040_v8  ;;  %v1048_v16 = vld [vmem:[%s1824_s0 + $0x80] sm:$0xf]  ;;  %v1288_v17 = vld [vmem:[%s1824_s0 + $0x8c] sm:$0xf0] }
  0x17   :  { %640 = vmatpush.bf16.msra.mxu1 %v1320_v21  ;;  %v1045_v15 = vor.u32 %v1283_v10, %v1042_v11  ;;  %v1286_v18 = vld [vmem:[%s1824_s0 + $0x84] sm:$0xf]  ;;  %v1050_v19 = vld [vmem:[%s1824_s0 + $0x90] sm:$0xf0]  ;;  %v1056_v20 = vld [vmem:[%s1824_s0 + $0x88] sm:$0xf] }
  0x18   :  { %703 = vmatpush.bf16.msra.mxu2 %v1328_v22  ;;  %v1289_v21 = vld [vmem:[%s1824_s0 + $0x94] sm:$0xf0]  ;;  %v1287_v22 = vld [vmem:[%s1824_s0 + $0x8c] sm:$0xf]  ;;  %v1072_v32 = vld [vmem:[%s1824_s0 + $0xa8] sm:$0xf] }
  0x19   :  { %766 = vmatpush.bf16.msra.mxu3 %v1336_v23  ;;  %v1058_v23 = vld [vmem:[%s1824_s0 + $0x98] sm:$0xf0]  ;;  %v1293_v33 = vld [vmem:[%s1824_s0 + $0xb4] sm:$0xf0]  ;;  %v1291_v34 = vld [vmem:[%s1824_s0 + $0xac] sm:$0xf] }
  0x1a   :  { %578 = vmatpush.bf16.msra.mxu0 %v1311_v24  ;;  %v1049_v24 = vor.u32 %v1288_v17, %v1048_v16  ;;  %v1074_v35 = vld [vmem:[%s1824_s0 + $0xb8] sm:$0xf0]  ;;  %v1073_v38 = vor.u32 %v1293_v33, %v1072_v32  ;;  %v1088_v44 = vld [vmem:[%s1824_s0 + $0xc8] sm:$0xf]  ;;  %v1297_v45 = vld [vmem:[%s1824_s0 + $0xd4] sm:$0xf0] }
  0x1b   :  { %641 = vmatpush.bf16.msra.mxu1 %v1319_v25  ;;  %v1053_v25 = vor.u32 %v1286_v18, %v1050_v19  ;;  %v1077_v39 = vor.u32 %v1291_v34, %v1074_v35  ;;  %v1295_v46 = vld [vmem:[%s1824_s0 + $0xcc] sm:$0xf]  ;;  %v1090_v47 = vld [vmem:[%s1824_s0 + $0xd8] sm:$0xf0]  ;;  %v1089_v50 = vor.u32 %v1297_v45, %v1088_v44  ;;  %v1104_v56 = vld [vmem:[%s1824_s0 + $0xe8] sm:$0xf] }
  0x1c   :  { %704 = vmatpush.bf16.msra.mxu2 %v1327_v26  ;;  %v1057_v26 = vor.u32 %v1289_v21, %v1056_v20  ;;  %v1093_v51 = vor.u32 %v1295_v46, %v1090_v47  ;;  %v1301_v57 = vld [vmem:[%s1824_s0 + $0xf4] sm:$0xf0]  ;;  %v1299_v58 = vld [vmem:[%s1824_s0 + $0xec] sm:$0xf]  ;;  %v1106_v59 = vld [vmem:[%s1824_s0 + $0xf8] sm:$0xf0] }
  0x1d   :  { %767 = vmatpush.bf16.msra.mxu3 %v1335_v27  ;;  %v1061_v27 = vor.u32 %v1287_v22, %v1058_v23  ;;  %v1105_v62 = vor.u32 %v1301_v57, %v1104_v56  ;;  %v1109_v63 = vor.u32 %v1299_v58, %v1106_v59  ;;  %v1120_v4 = vld [vmem:[%s1824_s0 + $0x108] sm:$0xf]  ;;  %v1305_v5 = vld [vmem:[%s1824_s0 + $0x114] sm:$0xf0]  ;;  %v1303_v6 = vld [vmem:[%s1824_s0 + $0x10c] sm:$0xf] }
  0x1e   :  { %579 = vmatpush.bf16.msra.mxu0 %v1310_v28  ;;  %v1064_v28 = vld [vmem:[%s1824_s0 + $0xa0] sm:$0xf]  ;;  %v1122_v7 = vld [vmem:[%s1824_s0 + $0x118] sm:$0xf0]  ;;  %v1308_v21 = vld [vmem:[%s1824_s0 + $0x12c] sm:$0xf0] }
  0x1f   :  { %642 = vmatpush.bf16.msra.mxu1 %v1318_v29  ;;  %v1292_v29 = vld [vmem:[%s1824_s0 + $0xac] sm:$0xf0]  ;;  %v1128_v20 = vld [vmem:[%s1824_s0 + $0x120] sm:$0xf]  ;;  %v1306_v22 = vld [vmem:[%s1824_s0 + $0x124] sm:$0xf] }
  0x20   :  { %705 = vmatpush.bf16.msra.mxu2 %v1326_v30  ;;  %v1290_v30 = vld [vmem:[%s1824_s0 + $0xa4] sm:$0xf]  ;;  %v1065_v36 = vor.u32 %v1292_v29, %v1064_v28  ;;  %v1130_v23 = vld [vmem:[%s1824_s0 + $0x130] sm:$0xf0]  ;;  %v1761_v29 = vld [vmem:[%s1825_s2] ss:$0 sm:$0xff]  ;;  %v1129_v33 = vor.u32 %v1308_v21, %v1128_v20 }
  0x21   :  { %768 = vmatpush.bf16.msra.mxu3 %v1334_v31  ;;  %580 = vmatmul.bf16.vlgmr.msra.gmra.mxu0 %v985_v40  ;;  %v1066_v31 = vld [vmem:[%s1824_s0 + $0xb0] sm:$0xf0]  ;;  %v1080_v40 = vld [vmem:[%s1824_s0 + $0xc0] sm:$0xf]  ;;  %v1133_v34 = vor.u32 %v1306_v22, %v1130_v23 }
  0x22   :  { %643 = vmatmul.bf16.vlgmr.msra.gmra.mxu1 %v989_v41  ;;  %v1069_v37 = vor.u32 %v1290_v30, %v1066_v31  ;;  %v1296_v41 = vld [vmem:[%s1824_s0 + $0xcc] sm:$0xf0] }
  0x23   :  { %706 = vmatmul.bf16.vlgmr.msra.gmra.mxu2 %v993_v42  ;;  %v1294_v42 = vld [vmem:[%s1824_s0 + $0xc4] sm:$0xf]  ;;  %v1081_v48 = vor.u32 %v1296_v41, %v1080_v40 }
  0x24   :  { %769 = vmatmul.bf16.vlgmr.msra.gmra.mxu3 %v997_v43  ;;  %v1082_v43 = vld [vmem:[%s1824_s0 + $0xd0] sm:$0xf0] }
  0x25   :  { %v1085_v49 = vor.u32 %v1294_v42, %v1082_v43 }
  0x31   :  { %585 = vmatmul.bf16.gmra.mxu0 %v1001_v52  ;;  %v1096_v52 = vld [vmem:[%s1824_s0 + $0xe0] sm:$0xf] }
  0x32   :  { %648 = vmatmul.bf16.gmra.mxu1 %v1005_v53  ;;  %v1300_v53 = vld [vmem:[%s1824_s0 + $0xec] sm:$0xf0] }
  0x33   :  { %711 = vmatmul.bf16.gmra.mxu2 %v1009_v54  ;;  %v1298_v54 = vld [vmem:[%s1824_s0 + $0xe4] sm:$0xf]  ;;  %v1097_v60 = vor.u32 %v1300_v53, %v1096_v52  ;;  %v101_v52 = vld [vmem:[%s1824_s0 + $0x148] sm:$0xff] }
  0x34   :  { %774 = vmatmul.bf16.gmra.mxu3 %v1013_v55  ;;  %v1098_v55 = vld [vmem:[%s1824_s0 + $0xf0] sm:$0xf0]  ;;  %v290_v56 = vunpack.c.l.b16 %v101_v52  ;;  %v291_v57 = vunpack.c.h.b16 %v101_v52 }
  0x35   :  { %v1101_v61 = vor.u32 %v1298_v54, %v1098_v55 }
  0x41   :  { %590 = vmatmul.bf16.gmra.mxu0 %v1017_v0  ;;  %v1112_v0 = vld [vmem:[%s1824_s0 + $0x100] sm:$0xf] }
  0x42   :  { %653 = vmatmul.bf16.gmra.mxu1 %v1021_v1  ;;  %v1304_v1 = vld [vmem:[%s1824_s0 + $0x10c] sm:$0xf0] }
  0x43   :  { %716 = vmatmul.bf16.gmra.mxu2 %v1025_v2  ;;  %v1302_v2 = vld [vmem:[%s1824_s0 + $0x104] sm:$0xf]  ;;  %v1113_v8 = vor.u32 %v1304_v1, %v1112_v0 }
  0x44   :  { %779 = vmatmul.bf16.gmra.mxu3 %v1029_v3  ;;  %v1114_v3 = vld [vmem:[%s1824_s0 + $0x110] sm:$0xf0] }
  0x45   :  { %v1117_v9 = vor.u32 %v1302_v2, %v1114_v3  ;;  %v334_v3 = vpack.c.b16 %v290_v56, %v290_v56 }
  0x51   :  { %595 = vmatmul.bf16.gmra.mxu0 %v1033_v12  ;;  %v1121_v12 = vor.u32 %v1305_v5, %v1120_v4  ;;  %v335_v4 = vpack.c.b16 %v291_v57, %v291_v57 }
  0x52   :  { %658 = vmatmul.bf16.gmra.mxu1 %v1037_v13  ;;  %v1125_v13 = vor.u32 %v1303_v6, %v1122_v7 }
  0x53   :  { %721 = vmatmul.bf16.gmra.mxu2 %v1041_v14 }
  0x54   :  { %784 = vmatmul.bf16.gmra.mxu3 %v1045_v15 }
  0x61   :  { %600 = vmatmul.bf16.gmra.mxu0 %v1049_v24  ;;  %v1136_v24 = vld [vmem:[%s1824_s0 + $0x128] sm:$0xf] }
  0x62   :  { %663 = vmatmul.bf16.gmra.mxu1 %v1053_v25  ;;  %v1309_v25 = vld [vmem:[%s1824_s0 + $0x134] sm:$0xf0] }
  0x63   :  { %726 = vmatmul.bf16.gmra.mxu2 %v1057_v26  ;;  %v1307_v26 = vld [vmem:[%s1824_s0 + $0x12c] sm:$0xf] }
  0x64   :  { %789 = vmatmul.bf16.gmra.mxu3 %v1061_v27  ;;  %v1138_v27 = vld [vmem:[%s1824_s0 + $0x138] sm:$0xf0] }
  0x71   :  { %605 = vmatmul.bf16.gmra.mxu0 %v1065_v36 }
  0x72   :  { %668 = vmatmul.bf16.gmra.mxu1 %v1069_v37 }
  0x73   :  { %731 = vmatmul.bf16.gmra.mxu2 %v1073_v38  ;;  %v1137_v38 = vor.u32 %v1309_v25, %v1136_v24 }
  0x74   :  { %794 = vmatmul.bf16.gmra.mxu3 %v1077_v39  ;;  %v1141_v39 = vor.u32 %v1307_v26, %v1138_v27 }
  0x81   :  { %610 = vmatmul.bf16.gmra.mxu0 %v1081_v48 }
  0x82   :  { %673 = vmatmul.bf16.gmra.mxu1 %v1085_v49 }
  0x83   :  { %736 = vmatmul.bf16.gmra.mxu2 %v1089_v50 }
  0x84   :  { %799 = vmatmul.bf16.gmra.mxu3 %v1093_v51  ;;  %v100_v51 = vld [vmem:[%s1824_s0 + $0x140] sm:$0xff] }
  0x85   :  { %v288_v54 = vunpack.c.l.b16 %v100_v51  ;;  %v289_v55 = vunpack.c.h.b16 %v100_v51 }
  0x91   :  { %615 = vmatmul.bf16.gmra.mxu0 %v1097_v60 }
  0x92   :  { %678 = vmatmul.bf16.gmra.mxu1 %v1101_v61 }
  0x93   :  { %741 = vmatmul.bf16.gmra.mxu2 %v1105_v62  ;;  %v332_v62 = vpack.c.b16 %v288_v54, %v288_v54 }
  0x94   :  { %804 = vmatmul.bf16.gmra.mxu3 %v1109_v63  ;;  %v333_v63 = vpack.c.b16 %v289_v55, %v289_v55 }
  0x9e   :  { %v581_v10 = vpop.f32.mrf.mxu0 }
  0x9f   :  { %v644_v11 = vpop.f32.mrf.mxu1 }
  0xa0   :  { %v645_v14 = vadd.f32 %v644_v11, %v581_v10 }
  0xa1   :  { %620 = vmatmul.bf16.gmra.mxu0 %v1113_v8 }
  0xa2   :  { %683 = vmatmul.bf16.gmra.mxu1 %v1117_v9 }
  0xa3   :  { %746 = vmatmul.bf16.gmra.mxu2 %v1121_v12 }
  0xa4   :  { %809 = vmatmul.bf16.gmra.mxu3 %v1125_v13 }
  0xa6   :  { %v707_v15 = vpop.f32.mrf.mxu2  ;;  %v583_v17 = vpop.f32.mrf.mxu0 }
  0xa7   :  { %v770_v16 = vpop.f32.mrf.mxu3  ;;  %v646_v18 = vpop.f32.mrf.mxu1  ;;  %v708_v19 = vadd.f32 %v707_v15, %v645_v14 }
  0xa8   :  { %v647_v30 = vadd.f32 %v646_v18, %v583_v17 }
  0xa9   :  { %v771_v28 = vadd.f32 %v770_v16, %v708_v19 }
  0xab   :  { %v894_v40 = vadd.f32 %v1761_v29, %v771_v28 }
  0xad   :  { %v915_v43 = vmax.f32 %v894_v40, 0.0 }
  0xae   :  { %v709_v31 = vpop.f32.mrf.mxu2  ;;  %v586_v36 = vpop.f32.mrf.mxu0 }
  0xaf   :  { %v772_v32 = vpop.f32.mrf.mxu3  ;;  %v710_v35 = vadd.f32 %v709_v31, %v647_v30  ;;  %v649_v37 = vpop.f32.mrf.mxu1 }
  0xb0   :  { %v650_v45 = vadd.f32 %v649_v37, %v586_v36 }
  0xb1   :  { %v773_v41 = vadd.f32 %v772_v32, %v710_v35  ;;  %625 = vmatmul.bf16.gmra.mxu0 %v1129_v33 }
  0xb2   :  { %688 = vmatmul.bf16.gmra.mxu1 %v1133_v34 }
  0xb3   :  { %v895_v42 = vadd.f32 %v1761_v29, %v773_v41  ;;  %751 = vmatmul.bf16.gmra.mxu2 %v1137_v38 }
  0xb4   :  { %814 = vmatmul.bf16.gmra.mxu3 %v1141_v39 }
  0xb5   :  { %v916_v44 = vmax.f32 %v895_v42, 0.0 }
  0xb6   :  { %v712_v46 = vpop.f32.mrf.mxu2  ;;  %v588_v49 = vpop.f32.mrf.mxu0 }
  0xb7   :  { %v775_v47 = vpop.f32.mrf.mxu3  ;;  %v1345_v48 = vpack.c.bf16 %v916_v44, %v915_v43  ;;  %v651_v50 = vpop.f32.mrf.mxu1  ;;  %v713_v53 = vadd.f32 %v712_v46, %v650_v45 }
  0xb8   :  { %v652_v59 = vadd.f32 %v651_v50, %v588_v49 }
  0xb9   :  { %1346 = vst [vmem:[%s1826_s3] sm:$0xff] %v1345_v48   ;;  %v776_v58 = vadd.f32 %v775_v47, %v713_v53 }
  0xbb   :  { %v896_v5 = vadd.f32 %v1761_v29, %v776_v58 }
  0xbd   :  { %v917_v8 = vmax.f32 %v896_v5, 0.0 }
  0xbe   :  { %v714_v60 = vpop.f32.mrf.mxu2  ;;  %v591_v1 = vpop.f32.mrf.mxu0 }
  0xbf   :  { %v777_v61 = vpop.f32.mrf.mxu3  ;;  %v715_v0 = vadd.f32 %v714_v60, %v652_v59  ;;  %v654_v2 = vpop.f32.mrf.mxu1 }
  0xc0   :  { %v655_v10 = vadd.f32 %v654_v2, %v591_v1 }
  0xc1   :  { %v778_v6 = vadd.f32 %v777_v61, %v715_v0  ;;  %630 = vmatmul.bf16.gmra.mxu0 %v332_v62 }
  0xc2   :  { %693 = vmatmul.bf16.gmra.mxu1 %v333_v63 }
  0xc3   :  { %v897_v7 = vadd.f32 %v1761_v29, %v778_v6  ;;  %756 = vmatmul.bf16.gmra.mxu2 %v334_v3 }
  0xc4   :  { %819 = vmatmul.bf16.gmra.mxu3 %v335_v4 }
  0xc5   :  { %v918_v9 = vmax.f32 %v897_v7, 0.0 }
  0xc6   :  { %v717_v11 = vpop.f32.mrf.mxu2  ;;  %v593_v14 = vpop.f32.mrf.mxu0 }
  0xc7   :  { %v780_v12 = vpop.f32.mrf.mxu3  ;;  %v1350_v13 = vpack.c.bf16 %v918_v9, %v917_v8  ;;  %v656_v15 = vpop.f32.mrf.mxu1  ;;  %v718_v16 = vadd.f32 %v717_v11, %v655_v10 }
  0xc8   :  { %v657_v18 = vadd.f32 %v656_v15, %v593_v14 }
  0xc9   :  { %1392 = vst [vmem:[%s1826_s3 + $0x8] sm:$0xff] %v1350_v13   ;;  %v781_v17 = vadd.f32 %v780_v12, %v718_v16 }
  0xcb   :  { %v898_v24 = vadd.f32 %v1761_v29, %v781_v17 }
  0xcd   :  { %v919_v27 = vmax.f32 %v898_v24, 0.0 }
  0xce   :  { %v719_v19 = vpop.f32.mrf.mxu2  ;;  %v596_v22 = vpop.f32.mrf.mxu0 }
  0xcf   :  { %v782_v20 = vpop.f32.mrf.mxu3  ;;  %v720_v21 = vadd.f32 %v719_v19, %v657_v18  ;;  %v659_v23 = vpop.f32.mrf.mxu1 }
  0xd0   :  { %v660_v30 = vadd.f32 %v659_v23, %v596_v22 }
  0xd1   :  { %v783_v25 = vadd.f32 %v782_v20, %v720_v21 }
  0xd3   :  { %v899_v26 = vadd.f32 %v1761_v29, %v783_v25 }
  0xd5   :  { %v920_v28 = vmax.f32 %v899_v26, 0.0 }
  0xd6   :  { %v722_v31 = vpop.f32.mrf.mxu2  ;;  %v598_v34 = vpop.f32.mrf.mxu0 }
  0xd7   :  { %v785_v32 = vpop.f32.mrf.mxu3  ;;  %v1355_v33 = vpack.c.bf16 %v920_v28, %v919_v27  ;;  %v661_v35 = vpop.f32.mrf.mxu1  ;;  %v723_v36 = vadd.f32 %v722_v31, %v660_v30 }
  0xd8   :  { %v662_v38 = vadd.f32 %v661_v35, %v598_v34 }
  0xd9   :  { %1393 = vst [vmem:[%s1826_s3 + $0x10] sm:$0xff] %v1355_v33   ;;  %v786_v37 = vadd.f32 %v785_v32, %v723_v36 }
  0xdb   :  { %v900_v44 = vadd.f32 %v1761_v29, %v786_v37 }
  0xdd   :  { %v921_v47 = vmax.f32 %v900_v44, 0.0 }
  0xde   :  { %v724_v39 = vpop.f32.mrf.mxu2  ;;  %v601_v42 = vpop.f32.mrf.mxu0 }
  0xdf   :  { %v787_v40 = vpop.f32.mrf.mxu3  ;;  %v725_v41 = vadd.f32 %v724_v39, %v662_v38  ;;  %v664_v43 = vpop.f32.mrf.mxu1 }
  0xe0   :  { %v665_v49 = vadd.f32 %v664_v43, %v601_v42 }
  0xe1   :  { %v788_v45 = vadd.f32 %v787_v40, %v725_v41 }
  0xe3   :  { %v901_v46 = vadd.f32 %v1761_v29, %v788_v45 }
  0xe5   :  { %v922_v48 = vmax.f32 %v901_v46, 0.0 }
  0xe6   :  { %v727_v50 = vpop.f32.mrf.mxu2  ;;  %v603_v53 = vpop.f32.mrf.mxu0 }
  0xe7   :  { %v790_v51 = vpop.f32.mrf.mxu3  ;;  %v1360_v52 = vpack.c.bf16 %v922_v48, %v921_v47  ;;  %v666_v54 = vpop.f32.mrf.mxu1  ;;  %v728_v55 = vadd.f32 %v727_v50, %v665_v49 }
  0xe8   :  { %v667_v57 = vadd.f32 %v666_v54, %v603_v53 }
  0xe9   :  { %1394 = vst [vmem:[%s1826_s3 + $0x18] sm:$0xff] %v1360_v52   ;;  %v791_v56 = vadd.f32 %v790_v51, %v728_v55 }
  0xeb   :  { %v902_v63 = vadd.f32 %v1761_v29, %v791_v56 }
  0xed   :  { %v923_v2 = vmax.f32 %v902_v63, 0.0 }
  0xee   :  { %v729_v58 = vpop.f32.mrf.mxu2  ;;  %v606_v61 = vpop.f32.mrf.mxu0 }
  0xef   :  { %v792_v59 = vpop.f32.mrf.mxu3  ;;  %v730_v60 = vadd.f32 %v729_v58, %v667_v57  ;;  %v669_v62 = vpop.f32.mrf.mxu1 }
  0xf0   :  { %v670_v4 = vadd.f32 %v669_v62, %v606_v61 }
  0xf1   :  { %v793_v0 = vadd.f32 %v792_v59, %v730_v60 }
  0xf3   :  { %v903_v1 = vadd.f32 %v1761_v29, %v793_v0 }
  0xf5   :  { %v924_v3 = vmax.f32 %v903_v1, 0.0 }
  0xf6   :  { %v732_v5 = vpop.f32.mrf.mxu2  ;;  %v608_v8 = vpop.f32.mrf.mxu0 }
  0xf7   :  { %v795_v6 = vpop.f32.mrf.mxu3  ;;  %v1365_v7 = vpack.c.bf16 %v924_v3, %v923_v2  ;;  %v671_v9 = vpop.f32.mrf.mxu1  ;;  %v733_v10 = vadd.f32 %v732_v5, %v670_v4 }
  0xf8   :  { %v672_v12 = vadd.f32 %v671_v9, %v608_v8 }
  0xf9   :  { %1395 = vst [vmem:[%s1826_s3 + $0x20] sm:$0xff] %v1365_v7   ;;  %v796_v11 = vadd.f32 %v795_v6, %v733_v10 }
  0xfb   :  { %v904_v18 = vadd.f32 %v1761_v29, %v796_v11 }
  0xfd   :  { %v925_v21 = vmax.f32 %v904_v18, 0.0 }
  0xfe   :  { %v734_v13 = vpop.f32.mrf.mxu2  ;;  %v611_v16 = vpop.f32.mrf.mxu0 }
  0xff   :  { %v797_v14 = vpop.f32.mrf.mxu3  ;;  %v735_v15 = vadd.f32 %v734_v13, %v672_v12  ;;  %v674_v17 = vpop.f32.mrf.mxu1 }
 0x100   :  { %v675_v23 = vadd.f32 %v674_v17, %v611_v16 }
 0x101   :  { %v798_v19 = vadd.f32 %v797_v14, %v735_v15 }
 0x103   :  { %v905_v20 = vadd.f32 %v1761_v29, %v798_v19 }
 0x105   :  { %v926_v22 = vmax.f32 %v905_v20, 0.0 }
 0x106   :  { %v737_v24 = vpop.f32.mrf.mxu2  ;;  %v613_v27 = vpop.f32.mrf.mxu0 }
 0x107   :  { %v800_v25 = vpop.f32.mrf.mxu3  ;;  %v1370_v26 = vpack.c.bf16 %v926_v22, %v925_v21  ;;  %v676_v28 = vpop.f32.mrf.mxu1  ;;  %v738_v30 = vadd.f32 %v737_v24, %v675_v23 }
 0x108   :  { %v677_v32 = vadd.f32 %v676_v28, %v613_v27 }
 0x109   :  { %1396 = vst [vmem:[%s1826_s3 + $0x28] sm:$0xff] %v1370_v26   ;;  %v801_v31 = vadd.f32 %v800_v25, %v738_v30 }
 0x10b   :  { %v906_v38 = vadd.f32 %v1761_v29, %v801_v31 }
 0x10d   :  { %v927_v41 = vmax.f32 %v906_v38, 0.0 }
 0x10e   :  { %v739_v33 = vpop.f32.mrf.mxu2  ;;  %v616_v36 = vpop.f32.mrf.mxu0 }
 0x10f   :  { %v802_v34 = vpop.f32.mrf.mxu3  ;;  %v740_v35 = vadd.f32 %v739_v33, %v677_v32  ;;  %v679_v37 = vpop.f32.mrf.mxu1 }
 0x110   :  { %v680_v43 = vadd.f32 %v679_v37, %v616_v36 }
 0x111   :  { %v803_v39 = vadd.f32 %v802_v34, %v740_v35 }
 0x113   :  { %v907_v40 = vadd.f32 %v1761_v29, %v803_v39 }
 0x115   :  { %v928_v42 = vmax.f32 %v907_v40, 0.0 }
 0x116   :  { %v742_v44 = vpop.f32.mrf.mxu2  ;;  %v618_v47 = vpop.f32.mrf.mxu0 }
 0x117   :  { %v805_v45 = vpop.f32.mrf.mxu3  ;;  %v1375_v46 = vpack.c.bf16 %v928_v42, %v927_v41  ;;  %v681_v48 = vpop.f32.mrf.mxu1  ;;  %v743_v49 = vadd.f32 %v742_v44, %v680_v43 }
 0x118   :  { %v682_v51 = vadd.f32 %v681_v48, %v618_v47 }
 0x119   :  { %1397 = vst [vmem:[%s1826_s3 + $0x30] sm:$0xff] %v1375_v46   ;;  %v806_v50 = vadd.f32 %v805_v45, %v743_v49 }
 0x11b   :  { %v908_v57 = vadd.f32 %v1761_v29, %v806_v50 }
 0x11d   :  { %v929_v60 = vmax.f32 %v908_v57, 0.0 }
 0x11e   :  { %v744_v52 = vpop.f32.mrf.mxu2  ;;  %v621_v55 = vpop.f32.mrf.mxu0 }
 0x11f   :  { %v807_v53 = vpop.f32.mrf.mxu3  ;;  %v745_v54 = vadd.f32 %v744_v52, %v682_v51  ;;  %v684_v56 = vpop.f32.mrf.mxu1 }
 0x120   :  { %v685_v62 = vadd.f32 %v684_v56, %v621_v55 }
 0x121   :  { %v808_v58 = vadd.f32 %v807_v53, %v745_v54 }
 0x123   :  { %v909_v59 = vadd.f32 %v1761_v29, %v808_v58 }
 0x125   :  { %v930_v61 = vmax.f32 %v909_v59, 0.0 }
 0x126   :  { %v747_v63 = vpop.f32.mrf.mxu2  ;;  %v623_v2 = vpop.f32.mrf.mxu0 }
 0x127   :  { %v810_v0 = vpop.f32.mrf.mxu3  ;;  %v1380_v1 = vpack.c.bf16 %v930_v61, %v929_v60  ;;  %v686_v3 = vpop.f32.mrf.mxu1  ;;  %v748_v4 = vadd.f32 %v747_v63, %v685_v62 }
 0x128   :  { %v687_v6 = vadd.f32 %v686_v3, %v623_v2 }
 0x129   :  { %1398 = vst [vmem:[%s1826_s3 + $0x38] sm:$0xff] %v1380_v1   ;;  %v811_v5 = vadd.f32 %v810_v0, %v748_v4 }
 0x12b   :  { %v910_v12 = vadd.f32 %v1761_v29, %v811_v5 }
 0x12d   :  { %v931_v15 = vmax.f32 %v910_v12, 0.0 }
 0x12e   :  { %v749_v7 = vpop.f32.mrf.mxu2  ;;  %v626_v10 = vpop.f32.mrf.mxu0 }
 0x12f   :  { %v812_v8 = vpop.f32.mrf.mxu3  ;;  %v750_v9 = vadd.f32 %v749_v7, %v687_v6  ;;  %v689_v11 = vpop.f32.mrf.mxu1 }
 0x130   :  { %v690_v17 = vadd.f32 %v689_v11, %v626_v10 }
 0x131   :  { %v813_v13 = vadd.f32 %v812_v8, %v750_v9 }
 0x133   :  { %v911_v14 = vadd.f32 %v1761_v29, %v813_v13 }
 0x135   :  { %v932_v16 = vmax.f32 %v911_v14, 0.0 }
 0x136   :  { %v752_v18 = vpop.f32.mrf.mxu2  ;;  %v628_v21 = vpop.f32.mrf.mxu0 }
 0x137   :  { %v815_v19 = vpop.f32.mrf.mxu3  ;;  %v1385_v20 = vpack.c.bf16 %v932_v16, %v931_v15  ;;  %v691_v22 = vpop.f32.mrf.mxu1  ;;  %v753_v23 = vadd.f32 %v752_v18, %v690_v17 }
 0x138   :  { %v692_v25 = vadd.f32 %v691_v22, %v628_v21 }
 0x139   :  { %1399 = vst [vmem:[%s1826_s3 + $0x40] sm:$0xff] %v1385_v20   ;;  %v816_v24 = vadd.f32 %v815_v19, %v753_v23 }
 0x13b   :  { %v912_v32 = vadd.f32 %v1761_v29, %v816_v24 }
 0x13d   :  { %v933_v36 = vmax.f32 %v912_v32, 0.0 }
 0x13e   :  { %v754_v26 = vpop.f32.mrf.mxu2  ;;  %v631_v30 = vpop.f32.mrf.mxu0 }
 0x13f   :  { %v817_v27 = vpop.f32.mrf.mxu3  ;;  %v755_v28 = vadd.f32 %v754_v26, %v692_v25  ;;  %v694_v31 = vpop.f32.mrf.mxu1 }
 0x140   :  { %v695_v35 = vadd.f32 %v694_v31, %v631_v30 }
 0x141   :  { %v818_v33 = vadd.f32 %v817_v27, %v755_v28 }
 0x143   :  { %v913_v34 = vadd.f32 %v1761_v29, %v818_v33 }
 0x145   :  { %v934_v37 = vmax.f32 %v913_v34, 0.0 }
 0x146   :  { %v757_v38 = vpop.f32.mrf.mxu2  ;;  %v633_v42 = vpop.f32.mrf.mxu0 }
 0x147   :  { %v820_v39 = vpop.f32.mrf.mxu3  ;;  %v1390_v40 = vpack.c.bf16 %v934_v37, %v933_v36  ;;  %v758_v41 = vadd.f32 %v757_v38, %v695_v35  ;;  %v696_v43 = vpop.f32.mrf.mxu1 }
 0x149   :  { %1400 = vst [vmem:[%s1826_s3 + $0x48] sm:$0xff] %v1390_v40   ;;  %v821_v44 = vadd.f32 %v820_v39, %v758_v41 }
 0x14b   :  { %v914_v45 = vadd.f32 %v1761_v29, %v821_v44 }
 0x14d   :  { %v935_v46 = vmax.f32 %v914_v45, 0.0 }
 0x14e   :  { %v759_v47 = vpop.f32.mrf.mxu2 }
 0x14f   :  { %v822_v48 = vpop.f32.mrf.mxu3  ;;  %v956_v49 = vpack.c.bf16 %v935_v46, %v935_v46 }
 0x151   :  { %977 = vst [vmem:[%s1826_s3 + $0x50] sm:$0xf] %v956_v49 }

// kernel: forward.6
= control target key start
LH: loop header
LB: loop body
LE: loop exit
PB: predicated region body
PF: predicated region fallthrough
CT: control target
= control target key end

     0   :  { %s1703_s1 = inlined_call_operand.vmem [shape: bf16[640,128], index: 1, kind: input, shape index: {}]   ;;  %s1704_s0 = inlined_call_operand.vmem [shape: bf16[104,640], index: 0, kind: input, shape index: {}]   ;;  %s1705_s2 = inlined_call_operand.vmem [shape: f32[1,128], index: 2, kind: input, shape index: {}]   ;;  %s1706_s3 = inlined_call_operand.vmem [shape: bf16[104,128], index: 3, kind: output, shape index: {}]  }
   0x1   :  { %v1211_v0 = vld [vmem:[%s1703_s1 + $0x38] sm:$0xff]  ;;  %v1210_v1 = vld [vmem:[%s1703_s1 + $0x30] sm:$0xff]  ;;  %v1209_v2 = vld [vmem:[%s1703_s1 + $0x28] sm:$0xff] }
   0x2   :  { %1279 = vmatpush.bf16.msra.mxu1 %v1211_v0  ;;  %1280 = vmatpush.bf16.msra.mxu2 %v1211_v0  ;;  %v1208_v3 = vld [vmem:[%s1703_s1 + $0x20] sm:$0xff]  ;;  %v1207_v4 = vld [vmem:[%s1703_s1 + $0x18] sm:$0xff]  ;;  %v1206_v5 = vld [vmem:[%s1703_s1 + $0x10] sm:$0xff] }
   0x3   :  { %1281 = vmatpush.bf16.msra.mxu3 %v1211_v0  ;;  %577 = vmatpush.bf16.msra.mxu0 %v1211_v0  ;;  %v1205_v6 = vld [vmem:[%s1703_s1 + $0x8] sm:$0xff]  ;;  %v1348_v7 = vld [vmem:[%s1704_s0 + $0xf0] sm:$0xff]  ;;  %v1204_v8 = vld [vmem:[%s1703_s1] sm:$0xff] }
   0x4   :  { %v936_v9 = vld [vmem:[%s1704_s0 + $0x50] sm:$0xf]  ;;  %v1186_v10 = vld [vmem:[%s1704_s0 + $0x60] sm:$0xf0]  ;;  %v976_v11 = vld [vmem:[%s1704_s0 + $0xa0] sm:$0xf]  ;;  %v262_v15 = vunpack.c.l.b16 %v1348_v7 }
   0x5   :  { %v1196_v12 = vld [vmem:[%s1704_s0 + $0xb0] sm:$0xf0]  ;;  %v896_v13 = vld [vmem:[%s1704_s0] sm:$0xf]  ;;  %v1235_v16 = vld [vmem:[%s1703_s1 + $0xf8] sm:$0xff]  ;;  %v937_v18 = vor.u32 %v1186_v10, %v936_v9 }
   0x6   :  { %1282 = vmatpush.bf16.msra.mxu1 %v1210_v1  ;;  %1283 = vmatpush.bf16.msra.mxu2 %v1210_v1  ;;  %v1176_v14 = vld [vmem:[%s1704_s0 + $0x10] sm:$0xf0]  ;;  %v1227_v17 = vld [vmem:[%s1703_s1 + $0xb8] sm:$0xff]  ;;  %v977_v19 = vor.u32 %v1196_v12, %v976_v11  ;;  %v297_v23 = vpack.c.b16 %v262_v15, %v262_v15  ;;  %v1233_v28 = vld [vmem:[%s1703_s1 + $0xe8] sm:$0xff] }
   0x7   :  { %1284 = vmatpush.bf16.msra.mxu3 %v1210_v1  ;;  %578 = vmatpush.bf16.msra.mxu0 %v1210_v1  ;;  %v1219_v20 = vld [vmem:[%s1703_s1 + $0x78] sm:$0xff]  ;;  %v897_v21 = vor.u32 %v1176_v14, %v896_v13  ;;  %v1234_v24 = vld [vmem:[%s1703_s1 + $0xf0] sm:$0xff]  ;;  %v1225_v29 = vld [vmem:[%s1703_s1 + $0xa8] sm:$0xff] }
   0x8   :  { %v1243_v22 = vld [vmem:[%s1703_s1 + $0x138] sm:$0xff]  ;;  %v1226_v25 = vld [vmem:[%s1703_s1 + $0xb0] sm:$0xff]  ;;  %v1217_v30 = vld [vmem:[%s1703_s1 + $0x68] sm:$0xff] }
   0x9   :  { %v1218_v26 = vld [vmem:[%s1703_s1 + $0x70] sm:$0xff]  ;;  %v1241_v31 = vld [vmem:[%s1703_s1 + $0x128] sm:$0xff]  ;;  %v1232_v32 = vld [vmem:[%s1703_s1 + $0xe0] sm:$0xff] }
   0xa   :  { %1285 = vmatpush.bf16.msra.mxu1 %v1209_v2  ;;  %1286 = vmatpush.bf16.msra.mxu2 %v1209_v2  ;;  %v1242_v27 = vld [vmem:[%s1703_s1 + $0x130] sm:$0xff]  ;;  %v1224_v33 = vld [vmem:[%s1703_s1 + $0xa0] sm:$0xff]  ;;  %v956_v35 = vld [vmem:[%s1704_s0 + $0x78] sm:$0xf] }
   0xb   :  { %1287 = vmatpush.bf16.msra.mxu3 %v1209_v2  ;;  %579 = vmatpush.bf16.msra.mxu0 %v1209_v2  ;;  %v1216_v34 = vld [vmem:[%s1703_s1 + $0x60] sm:$0xff]  ;;  %v1191_v36 = vld [vmem:[%s1704_s0 + $0x88] sm:$0xf0]  ;;  %v996_v37 = vld [vmem:[%s1704_s0 + $0xc8] sm:$0xf] }
   0xc   :  { %v1201_v38 = vld [vmem:[%s1704_s0 + $0xd8] sm:$0xf0]  ;;  %v1240_v39 = vld [vmem:[%s1703_s1 + $0x120] sm:$0xff]  ;;  %v916_v40 = vld [vmem:[%s1704_s0 + $0x28] sm:$0xf]  ;;  %v957_v44 = vor.u32 %v1191_v36, %v956_v35 }
   0xd   :  { %v1181_v41 = vld [vmem:[%s1704_s0 + $0x38] sm:$0xf0]  ;;  %v997_v45 = vor.u32 %v1201_v38, %v996_v37  ;;  %v1230_v49 = vld [vmem:[%s1703_s1 + $0xd0] sm:$0xff]  ;;  %v1229_v53 = vld [vmem:[%s1703_s1 + $0xc8] sm:$0xff] }
   0xe   :  { %1288 = vmatpush.bf16.msra.mxu1 %v1208_v3  ;;  %1289 = vmatpush.bf16.msra.mxu2 %v1208_v3  ;;  %v1231_v42 = vld [vmem:[%s1703_s1 + $0xd8] sm:$0xff]  ;;  %v917_v47 = vor.u32 %v1181_v41, %v916_v40  ;;  %v1222_v50 = vld [vmem:[%s1703_s1 + $0x90] sm:$0xff]  ;;  %v1221_v54 = vld [vmem:[%s1703_s1 + $0x88] sm:$0xff] }
   0xf   :  { %1290 = vmatpush.bf16.msra.mxu3 %v1208_v3  ;;  %580 = vmatpush.bf16.msra.mxu0 %v1208_v3  ;;  %v1223_v43 = vld [vmem:[%s1703_s1 + $0x98] sm:$0xff]  ;;  %v1214_v51 = vld [vmem:[%s1703_s1 + $0x50] sm:$0xff]  ;;  %v1213_v55 = vld [vmem:[%s1703_s1 + $0x48] sm:$0xff] }
  0x10   :  { %v1215_v46 = vld [vmem:[%s1703_s1 + $0x58] sm:$0xff]  ;;  %v1238_v52 = vld [vmem:[%s1703_s1 + $0x110] sm:$0xff]  ;;  %v1228_v56 = vld [vmem:[%s1703_s1 + $0xc0] sm:$0xff] }
  0x11   :  { %v1239_v48 = vld [vmem:[%s1703_s1 + $0x118] sm:$0xff]  ;;  %v1237_v57 = vld [vmem:[%s1703_s1 + $0x108] sm:$0xff]  ;;  %v1220_v58 = vld [vmem:[%s1703_s1 + $0x80] sm:$0xff] }
  0x12   :  { %1291 = vmatpush.bf16.msra.mxu1 %v1207_v4  ;;  %1292 = vmatpush.bf16.msra.mxu2 %v1207_v4  ;;  %v1175_v59 = vld [vmem:[%s1704_s0 + $0xc] sm:$0xf]  ;;  %v906_v60 = vld [vmem:[%s1704_s0 + $0x1c] sm:$0xf0]  ;;  %v1174_v62 = vld [vmem:[%s1704_s0 + $0x4] sm:$0xf] }
  0x13   :  { %1293 = vmatpush.bf16.msra.mxu3 %v1207_v4  ;;  %581 = vmatpush.bf16.msra.mxu0 %v1207_v4  ;;  %v1212_v61 = vld [vmem:[%s1703_s1 + $0x40] sm:$0xff]  ;;  %v898_v63 = vld [vmem:[%s1704_s0 + $0x14] sm:$0xf0]  ;;  %v904_v0 = vld [vmem:[%s1704_s0 + $0x8] sm:$0xf]  ;;  %v909_v2 = vor.u32 %v1175_v59, %v906_v60 }
  0x14   :  { %v1177_v1 = vld [vmem:[%s1704_s0 + $0x18] sm:$0xf0]  ;;  %v1236_v3 = vld [vmem:[%s1703_s1 + $0x100] sm:$0xff]  ;;  %v912_v4 = vld [vmem:[%s1704_s0 + $0x10] sm:$0xf] }
  0x15   :  { %v1180_v10 = vld [vmem:[%s1704_s0 + $0x34] sm:$0xf]  ;;  %v926_v11 = vld [vmem:[%s1704_s0 + $0x44] sm:$0xf0]  ;;  %v1179_v12 = vld [vmem:[%s1704_s0 + $0x2c] sm:$0xf] }
  0x16   :  { %1294 = vmatpush.bf16.msra.mxu1 %v1206_v5  ;;  %1295 = vmatpush.bf16.msra.mxu2 %v1206_v5  ;;  %v918_v13 = vld [vmem:[%s1704_s0 + $0x3c] sm:$0xf0]  ;;  %v924_v14 = vld [vmem:[%s1704_s0 + $0x30] sm:$0xf]  ;;  %v1182_v15 = vld [vmem:[%s1704_s0 + $0x40] sm:$0xf0] }
  0x17   :  { %1296 = vmatpush.bf16.msra.mxu3 %v1206_v5  ;;  %582 = vmatpush.bf16.msra.mxu0 %v1206_v5  ;;  %v1178_v5 = vld [vmem:[%s1704_s0 + $0x20] sm:$0xf0]  ;;  %v966_v35 = vld [vmem:[%s1704_s0 + $0x94] sm:$0xf0]  ;;  %v1189_v36 = vld [vmem:[%s1704_s0 + $0x7c] sm:$0xf] }
  0x18   :  { %v913_v9 = vor.u32 %v1178_v5, %v912_v4  ;;  %v958_v37 = vld [vmem:[%s1704_s0 + $0x8c] sm:$0xf0]  ;;  %v964_v38 = vld [vmem:[%s1704_s0 + $0x80] sm:$0xf]  ;;  %v972_v41 = vld [vmem:[%s1704_s0 + $0x88] sm:$0xf] }
  0x19   :  { %v1006_v59 = vld [vmem:[%s1704_s0 + $0xe4] sm:$0xf0]  ;;  %v1199_v60 = vld [vmem:[%s1704_s0 + $0xcc] sm:$0xf] }
  0x1a   :  { %1297 = vmatpush.bf16.msra.mxu1 %v1205_v6  ;;  %1298 = vmatpush.bf16.msra.mxu2 %v1205_v6 }
  0x1b   :  { %1299 = vmatpush.bf16.msra.mxu3 %v1205_v6  ;;  %583 = vmatpush.bf16.msra.mxu0 %v1205_v6  ;;  %v901_v6 = vor.u32 %v1174_v62, %v898_v63  ;;  %v1004_v62 = vld [vmem:[%s1704_s0 + $0xd0] sm:$0xf]  ;;  %v1202_v63 = vld [vmem:[%s1704_s0 + $0xe0] sm:$0xf0] }
  0x1c   :  { %v1005_v4 = vor.u32 %v1202_v63, %v1004_v62 }
  0x1e   :  { %1300 = vmatpush.bf16.msra.mxu1 %v1204_v8  ;;  %1301 = vmatpush.bf16.msra.mxu2 %v1204_v8 }
  0x1f   :  { %1302 = vmatpush.bf16.msra.mxu3 %v1204_v8  ;;  %584 = vmatpush.bf16.msra.mxu0 %v1204_v8  ;;  %v905_v8 = vor.u32 %v1177_v1, %v904_v0  ;;  %v1012_v1 = vld [vmem:[%s1704_s0 + $0xd8] sm:$0xf] }
  0x21   :  { %595 = vmatmul.bf16.vlgmr.msra.gmra.mxu1 %v937_v18  ;;  %605 = vmatmul.bf16.vlgmr.msra.gmra.mxu2 %v977_v19  ;;  %v1183_v18 = vld [vmem:[%s1704_s0 + $0x48] sm:$0xf0]  ;;  %v921_v19 = vor.u32 %v1179_v12, %v918_v13 }
  0x22   :  { %663 = vmatpush.bf16.msrb.mxu2 %v1227_v17  ;;  %620 = vmatpush.bf16.msrb.mxu1 %v1219_v20  ;;  %v932_v17 = vld [vmem:[%s1704_s0 + $0x38] sm:$0xf]  ;;  %v925_v20 = vor.u32 %v1182_v15, %v924_v14 }
  0x23   :  { %706 = vmatpush.bf16.msrb.mxu3 %v1235_v16  ;;  %585 = vmatmul.bf16.vlgmr.msra.gmra.mxu0 %v897_v21  ;;  %v929_v16 = vor.u32 %v1180_v10, %v926_v11  ;;  %v933_v21 = vor.u32 %v1183_v18, %v932_v17  ;;  %v263_v10 = vunpack.c.h.b16 %v1348_v7 }
  0x24   :  { %749 = vmatpush.bf16.msrb.mxu0 %v1243_v22  ;;  %615 = vmatmul.bf16.vlgmr.msra.gmra.mxu3 %v297_v23  ;;  %v1185_v22 = vld [vmem:[%s1704_s0 + $0x5c] sm:$0xf]  ;;  %v946_v23 = vld [vmem:[%s1704_s0 + $0x6c] sm:$0xf0] }
  0x25   :  { %v298_v14 = vpack.c.b16 %v263_v10, %v263_v10 }
  0x26   :  { %664 = vmatpush.bf16.msrb.mxu2 %v1226_v25  ;;  %621 = vmatpush.bf16.msrb.mxu1 %v1218_v26  ;;  %v938_v25 = vld [vmem:[%s1704_s0 + $0x64] sm:$0xf0]  ;;  %v944_v26 = vld [vmem:[%s1704_s0 + $0x58] sm:$0xf] }
  0x27   :  { %707 = vmatpush.bf16.msrb.mxu3 %v1234_v24  ;;  %v1184_v24 = vld [vmem:[%s1704_s0 + $0x54] sm:$0xf] }
  0x28   :  { %750 = vmatpush.bf16.msrb.mxu0 %v1242_v27  ;;  %v1187_v27 = vld [vmem:[%s1704_s0 + $0x68] sm:$0xf0] }
  0x2a   :  { %665 = vmatpush.bf16.msrb.mxu2 %v1225_v29  ;;  %622 = vmatpush.bf16.msrb.mxu1 %v1217_v30  ;;  %v952_v29 = vld [vmem:[%s1704_s0 + $0x60] sm:$0xf]  ;;  %v1188_v30 = vld [vmem:[%s1704_s0 + $0x70] sm:$0xf0] }
  0x2b   :  { %708 = vmatpush.bf16.msrb.mxu3 %v1233_v28  ;;  %v949_v28 = vor.u32 %v1185_v22, %v946_v23 }
  0x2c   :  { %751 = vmatpush.bf16.msrb.mxu0 %v1241_v31  ;;  %v941_v31 = vor.u32 %v1184_v24, %v938_v25 }
  0x2e   :  { %666 = vmatpush.bf16.msrb.mxu2 %v1224_v33  ;;  %623 = vmatpush.bf16.msrb.mxu1 %v1216_v34  ;;  %v953_v33 = vor.u32 %v1188_v30, %v952_v29  ;;  %v1190_v34 = vld [vmem:[%s1704_s0 + $0x84] sm:$0xf] }
  0x2f   :  { %709 = vmatpush.bf16.msrb.mxu3 %v1232_v32  ;;  %v945_v32 = vor.u32 %v1187_v27, %v944_v26  ;;  %v969_v40 = vor.u32 %v1190_v34, %v966_v35 }
  0x30   :  { %752 = vmatpush.bf16.msrb.mxu0 %v1240_v39  ;;  %v1192_v39 = vld [vmem:[%s1704_s0 + $0x90] sm:$0xf0] }
  0x31   :  { %600 = vmatmul.bf16.gmra.mxu1 %v957_v44  ;;  %610 = vmatmul.bf16.gmra.mxu2 %v997_v45  ;;  %v965_v44 = vor.u32 %v1192_v39, %v964_v38 }
  0x32   :  { %667 = vmatpush.bf16.msrb.mxu2 %v1223_v43  ;;  %624 = vmatpush.bf16.msrb.mxu1 %v1215_v46  ;;  %v961_v43 = vor.u32 %v1189_v36, %v958_v37  ;;  %v1195_v46 = vld [vmem:[%s1704_s0 + $0xac] sm:$0xf] }
  0x33   :  { %710 = vmatpush.bf16.msrb.mxu3 %v1231_v42  ;;  %590 = vmatmul.bf16.gmra.mxu0 %v917_v47  ;;  %v1193_v42 = vld [vmem:[%s1704_s0 + $0x98] sm:$0xf0]  ;;  %v986_v47 = vld [vmem:[%s1704_s0 + $0xbc] sm:$0xf0] }
  0x34   :  { %753 = vmatpush.bf16.msrb.mxu0 %v1239_v48  ;;  %v973_v45 = vor.u32 %v1193_v42, %v972_v41  ;;  %v1194_v48 = vld [vmem:[%s1704_s0 + $0xa4] sm:$0xf] }
  0x36   :  { %668 = vmatpush.bf16.msrb.mxu2 %v1222_v50  ;;  %625 = vmatpush.bf16.msrb.mxu1 %v1214_v51  ;;  %v984_v50 = vld [vmem:[%s1704_s0 + $0xa8] sm:$0xf]  ;;  %v1197_v51 = vld [vmem:[%s1704_s0 + $0xb8] sm:$0xf0] }
  0x37   :  { %711 = vmatpush.bf16.msrb.mxu3 %v1230_v49  ;;  %v978_v49 = vld [vmem:[%s1704_s0 + $0xb4] sm:$0xf0] }
  0x38   :  { %754 = vmatpush.bf16.msrb.mxu0 %v1238_v52  ;;  %v989_v52 = vor.u32 %v1195_v46, %v986_v47 }
  0x3a   :  { %669 = vmatpush.bf16.msrb.mxu2 %v1221_v54  ;;  %626 = vmatpush.bf16.msrb.mxu1 %v1213_v55  ;;  %v1198_v54 = vld [vmem:[%s1704_s0 + $0xc0] sm:$0xf0]  ;;  %v981_v55 = vor.u32 %v1194_v48, %v978_v49 }
  0x3b   :  { %712 = vmatpush.bf16.msrb.mxu3 %v1229_v53  ;;  %v992_v53 = vld [vmem:[%s1704_s0 + $0xb0] sm:$0xf] }
  0x3c   :  { %755 = vmatpush.bf16.msrb.mxu0 %v1237_v57  ;;  %v993_v57 = vor.u32 %v1198_v54, %v992_v53 }
  0x3e   :  { %670 = vmatpush.bf16.msrb.mxu2 %v1220_v58  ;;  %627 = vmatpush.bf16.msrb.mxu1 %v1212_v61  ;;  %v1200_v58 = vld [vmem:[%s1704_s0 + $0xd4] sm:$0xf]  ;;  %v998_v61 = vld [vmem:[%s1704_s0 + $0xdc] sm:$0xf0] }
  0x3f   :  { %713 = vmatpush.bf16.msrb.mxu3 %v1228_v56  ;;  %v985_v56 = vor.u32 %v1197_v51, %v984_v50  ;;  %v1009_v0 = vor.u32 %v1200_v58, %v1006_v59 }
  0x40   :  { %756 = vmatpush.bf16.msrb.mxu0 %v1236_v3  ;;  %v1001_v3 = vor.u32 %v1199_v60, %v998_v61 }
  0x41   :  { %628 = vmatmul.bf16.vlgmr.msrb.gmra.mxu1 %v901_v6  ;;  %671 = vmatmul.bf16.vlgmr.msrb.gmra.mxu2 %v905_v8  ;;  %v81_v6 = vld [vmem:[%s1704_s0 + $0xf8] sm:$0xff] }
  0x42   :  { %714 = vmatmul.bf16.vlgmr.msrb.gmra.mxu3 %v909_v2  ;;  %v1203_v2 = vld [vmem:[%s1704_s0 + $0xe8] sm:$0xf0]  ;;  %v265_v8 = vunpack.c.h.b16 %v81_v6  ;;  %v264_v11 = vunpack.c.l.b16 %v81_v6 }
  0x43   :  { %757 = vmatmul.bf16.vlgmr.msrb.gmra.mxu0 %v913_v9  ;;  %v1013_v5 = vor.u32 %v1203_v2, %v1012_v1  ;;  %v82_v9 = vld [vmem:[%s1704_s0 + $0x100] sm:$0xf] }
  0x44   :  { %v266_v12 = vunpack.c.l.b16 %v82_v9  ;;  %v300_v13 = vpack.c.b16 %v265_v8, %v265_v8  ;;  %v299_v15 = vpack.c.b16 %v264_v11, %v264_v11 }
  0x46   :  { %v301_v17 = vpack.c.b16 %v266_v12, %v266_v12 }
  0x51   :  { %633 = vmatmul.bf16.gmra.mxu1 %v921_v19  ;;  %676 = vmatmul.bf16.gmra.mxu2 %v925_v20 }
  0x52   :  { %719 = vmatmul.bf16.gmra.mxu3 %v929_v16 }
  0x53   :  { %762 = vmatmul.bf16.gmra.mxu0 %v933_v21 }
  0x61   :  { %638 = vmatmul.bf16.gmra.mxu1 %v941_v31  ;;  %681 = vmatmul.bf16.gmra.mxu2 %v945_v32 }
  0x62   :  { %724 = vmatmul.bf16.gmra.mxu3 %v949_v28 }
  0x63   :  { %767 = vmatmul.bf16.gmra.mxu0 %v953_v33 }
  0x71   :  { %643 = vmatmul.bf16.gmra.mxu1 %v961_v43  ;;  %686 = vmatmul.bf16.gmra.mxu2 %v965_v44  ;;  %v1658_v43 = vld [vmem:[%s1705_s2] ss:$0 sm:$0xff] }
  0x72   :  { %729 = vmatmul.bf16.gmra.mxu3 %v969_v40 }
  0x73   :  { %772 = vmatmul.bf16.gmra.mxu0 %v973_v45 }
  0x81   :  { %648 = vmatmul.bf16.gmra.mxu1 %v981_v55  ;;  %691 = vmatmul.bf16.gmra.mxu2 %v985_v56 }
  0x82   :  { %734 = vmatmul.bf16.gmra.mxu3 %v989_v52 }
  0x83   :  { %777 = vmatmul.bf16.gmra.mxu0 %v993_v57 }
  0x91   :  { %653 = vmatmul.bf16.gmra.mxu1 %v1001_v3  ;;  %696 = vmatmul.bf16.gmra.mxu2 %v1005_v4 }
  0x92   :  { %739 = vmatmul.bf16.gmra.mxu3 %v1009_v0 }
  0x93   :  { %782 = vmatmul.bf16.gmra.mxu0 %v1013_v5 }
  0x9e   :  { %v1637_v16 = vpop.f32.mrf.mxu1 }
  0xa0   :  { %v586_v18 = vpop.f32.mrf.mxu0 }
  0xa1   :  { %658 = vmatmul.bf16.gmra.mxu1 %v298_v14  ;;  %701 = vmatmul.bf16.gmra.mxu2 %v299_v15 }
  0xa2   :  { %744 = vmatmul.bf16.gmra.mxu3 %v300_v13 }
  0xa3   :  { %787 = vmatmul.bf16.gmra.mxu0 %v301_v17 }
  0xa4   :  { %v1639_v19 = vpop.f32.mrf.mxu2 }
  0xa6   :  { %v1641_v20 = vpop.f32.mrf.mxu1 }
  0xa7   :  { %v1643_v21 = vpop.f32.mrf.mxu3 }
  0xa8   :  { %v588_v7 = vpop.f32.mrf.mxu0 }
  0xac   :  { %v1645_v22 = vpop.f32.mrf.mxu2 }
  0xae   :  { %v1647_v23 = vpop.f32.mrf.mxu1 }
  0xaf   :  { %v618_v24 = vpop.f32.mrf.mxu3 }
  0xb0   :  { %v591_v25 = vpop.f32.mrf.mxu0 }
  0xb4   :  { %v1649_v26 = vpop.f32.mrf.mxu2 }
  0xb6   :  { %v1651_v27 = vpop.f32.mrf.mxu1 }
  0xb8   :  { %v593_v28 = vpop.f32.mrf.mxu0 }
  0xbc   :  { %v1653_v29 = vpop.f32.mrf.mxu2 }
  0xbe   :  { %v629_v30 = vpop.f32.mrf.mxu1 }
  0xbf   :  { %v630_v33 = vadd.f32 %v629_v30, %v586_v18 }
  0xc0   :  { %v758_v31 = vpop.f32.mrf.mxu0 }
  0xc4   :  { %v672_v34 = vpop.f32.mrf.mxu2 }
  0xc5   :  { %v715_v32 = vpop.f32.mrf.mxu3  ;;  %v673_v35 = vadd.f32 %v672_v34, %v630_v33 }
  0xc6   :  { %v631_v36 = vpop.f32.mrf.mxu1 }
  0xc7   :  { %v716_v38 = vadd.f32 %v715_v32, %v673_v35  ;;  %v632_v40 = vadd.f32 %v631_v36, %v588_v7 }
  0xc8   :  { %v760_v37 = vpop.f32.mrf.mxu0 }
  0xc9   :  { %v759_v42 = vadd.f32 %v758_v31, %v716_v38 }
  0xcb   :  { %v838_v48 = vadd.f32 %v1658_v43, %v759_v42 }
  0xcc   :  { %v674_v41 = vpop.f32.mrf.mxu2 }
  0xcd   :  { %v717_v39 = vpop.f32.mrf.mxu3  ;;  %v675_v44 = vadd.f32 %v674_v41, %v632_v40  ;;  %v851_v54 = vmax.f32 %v838_v48, 0.0 }
  0xce   :  { %v634_v45 = vpop.f32.mrf.mxu1 }
  0xcf   :  { %v718_v46 = vadd.f32 %v717_v39, %v675_v44  ;;  %v635_v52 = vadd.f32 %v634_v45, %v591_v25 }
  0xd0   :  { %v763_v47 = vpop.f32.mrf.mxu0 }
  0xd1   :  { %v761_v49 = vadd.f32 %v760_v37, %v718_v46 }
  0xd3   :  { %v839_v51 = vadd.f32 %v1658_v43, %v761_v49 }
  0xd4   :  { %v677_v53 = vpop.f32.mrf.mxu2 }
  0xd5   :  { %v720_v50 = vpop.f32.mrf.mxu3  ;;  %v852_v55 = vmax.f32 %v839_v51, 0.0  ;;  %v678_v56 = vadd.f32 %v677_v53, %v635_v52 }
  0xd6   :  { %v636_v57 = vpop.f32.mrf.mxu1 }
  0xd7   :  { %v1247_v58 = vpack.c.bf16 %v852_v55, %v851_v54  ;;  %v721_v60 = vadd.f32 %v720_v50, %v678_v56  ;;  %v637_v62 = vadd.f32 %v636_v57, %v593_v28 }
  0xd8   :  { %v765_v59 = vpop.f32.mrf.mxu0 }
  0xd9   :  { %1248 = vst [vmem:[%s1706_s3] sm:$0xff] %v1247_v58   ;;  %v764_v0 = vadd.f32 %v763_v47, %v721_v60 }
  0xdb   :  { %v840_v5 = vadd.f32 %v1658_v43, %v764_v0 }
  0xdc   :  { %v679_v63 = vpop.f32.mrf.mxu2 }
  0xdd   :  { %v722_v61 = vpop.f32.mrf.mxu3  ;;  %v680_v1 = vadd.f32 %v679_v63, %v637_v62  ;;  %v853_v12 = vmax.f32 %v840_v5, 0.0 }
  0xde   :  { %v639_v2 = vpop.f32.mrf.mxu1 }
  0xdf   :  { %v723_v3 = vadd.f32 %v722_v61, %v680_v1  ;;  %v640_v10 = vadd.f32 %v639_v2, %v1637_v16 }
  0xe0   :  { %v768_v4 = vpop.f32.mrf.mxu0 }
  0xe1   :  { %v766_v6 = vadd.f32 %v765_v59, %v723_v3 }
  0xe3   :  { %v841_v9 = vadd.f32 %v1658_v43, %v766_v6 }
  0xe4   :  { %v682_v11 = vpop.f32.mrf.mxu2 }
  0xe5   :  { %v725_v8 = vpop.f32.mrf.mxu3  ;;  %v854_v13 = vmax.f32 %v841_v9, 0.0  ;;  %v683_v14 = vadd.f32 %v682_v11, %v640_v10 }
  0xe6   :  { %v641_v15 = vpop.f32.mrf.mxu1 }
  0xe7   :  { %v1252_v17 = vpack.c.bf16 %v854_v13, %v853_v12  ;;  %v726_v7 = vadd.f32 %v725_v8, %v683_v14  ;;  %v642_v25 = vadd.f32 %v641_v15, %v1641_v20 }
  0xe8   :  { %v770_v18 = vpop.f32.mrf.mxu0 }
  0xe9   :  { %1274 = vst [vmem:[%s1706_s3 + $0x8] sm:$0xff] %v1252_v17   ;;  %v769_v30 = vadd.f32 %v768_v4, %v726_v7 }
  0xeb   :  { %v842_v34 = vadd.f32 %v1658_v43, %v769_v30 }
  0xec   :  { %v684_v28 = vpop.f32.mrf.mxu2 }
  0xed   :  { %v727_v24 = vpop.f32.mrf.mxu3  ;;  %v685_v31 = vadd.f32 %v684_v28, %v642_v25  ;;  %v855_v40 = vmax.f32 %v842_v34, 0.0 }
  0xee   :  { %v644_v32 = vpop.f32.mrf.mxu1 }
  0xef   :  { %v728_v16 = vadd.f32 %v727_v24, %v685_v31  ;;  %v645_v38 = vadd.f32 %v644_v32, %v1647_v23 }
  0xf0   :  { %v773_v33 = vpop.f32.mrf.mxu0 }
  0xf1   :  { %v771_v35 = vadd.f32 %v770_v18, %v728_v16 }
  0xf3   :  { %v843_v37 = vadd.f32 %v1658_v43, %v771_v35 }
  0xf4   :  { %v687_v39 = vpop.f32.mrf.mxu2 }
  0xf5   :  { %v730_v36 = vpop.f32.mrf.mxu3  ;;  %v856_v41 = vmax.f32 %v843_v37, 0.0  ;;  %v688_v42 = vadd.f32 %v687_v39, %v645_v38 }
  0xf6   :  { %v646_v44 = vpop.f32.mrf.mxu1 }
  0xf7   :  { %v1257_v20 = vpack.c.bf16 %v856_v41, %v855_v40  ;;  %v731_v46 = vadd.f32 %v730_v36, %v688_v42  ;;  %v647_v48 = vadd.f32 %v646_v44, %v1651_v27 }
  0xf8   :  { %v775_v45 = vpop.f32.mrf.mxu0 }
  0xf9   :  { %1275 = vst [vmem:[%s1706_s3 + $0x10] sm:$0xff] %v1257_v20   ;;  %v774_v50 = vadd.f32 %v773_v33, %v731_v46 }
  0xfb   :  { %v844_v54 = vadd.f32 %v1658_v43, %v774_v50 }
  0xfc   :  { %v689_v49 = vpop.f32.mrf.mxu2 }
  0xfd   :  { %v732_v47 = vpop.f32.mrf.mxu3  ;;  %v690_v51 = vadd.f32 %v689_v49, %v647_v48  ;;  %v857_v60 = vmax.f32 %v844_v54, 0.0 }
  0xfe   :  { %v649_v52 = vpop.f32.mrf.mxu1 }
  0xff   :  { %v733_v23 = vadd.f32 %v732_v47, %v690_v51  ;;  %v650_v58 = vadd.f32 %v649_v52, %v1639_v19 }
 0x100   :  { %v778_v53 = vpop.f32.mrf.mxu0 }
 0x101   :  { %v776_v55 = vadd.f32 %v775_v45, %v733_v23 }
 0x103   :  { %v845_v57 = vadd.f32 %v1658_v43, %v776_v55 }
 0x104   :  { %v692_v59 = vpop.f32.mrf.mxu2 }
 0x105   :  { %v735_v56 = vpop.f32.mrf.mxu3  ;;  %v858_v61 = vmax.f32 %v845_v57, 0.0  ;;  %v693_v62 = vadd.f32 %v692_v59, %v650_v58 }
 0x106   :  { %v651_v63 = vpop.f32.mrf.mxu1 }
 0x107   :  { %v1262_v27 = vpack.c.bf16 %v858_v61, %v857_v60  ;;  %v736_v1 = vadd.f32 %v735_v56, %v693_v62  ;;  %v652_v3 = vadd.f32 %v651_v63, %v1645_v22 }
 0x108   :  { %v780_v0 = vpop.f32.mrf.mxu0 }
 0x109   :  { %1276 = vst [vmem:[%s1706_s3 + $0x18] sm:$0xff] %v1262_v27   ;;  %v779_v5 = vadd.f32 %v778_v53, %v736_v1 }
 0x10b   :  { %v846_v10 = vadd.f32 %v1658_v43, %v779_v5 }
 0x10c   :  { %v694_v4 = vpop.f32.mrf.mxu2 }
 0x10d   :  { %v737_v2 = vpop.f32.mrf.mxu3  ;;  %v695_v6 = vadd.f32 %v694_v4, %v652_v3  ;;  %v859_v17 = vmax.f32 %v846_v10, 0.0 }
 0x10e   :  { %v654_v8 = vpop.f32.mrf.mxu1 }
 0x10f   :  { %v738_v19 = vadd.f32 %v737_v2, %v695_v6  ;;  %v655_v14 = vadd.f32 %v654_v8, %v1649_v26 }
 0x110   :  { %v783_v9 = vpop.f32.mrf.mxu0 }
 0x111   :  { %v781_v11 = vadd.f32 %v780_v0, %v738_v19 }
 0x113   :  { %v847_v13 = vadd.f32 %v1658_v43, %v781_v11 }
 0x114   :  { %v697_v15 = vpop.f32.mrf.mxu2 }
 0x115   :  { %v740_v12 = vpop.f32.mrf.mxu3  ;;  %v860_v18 = vmax.f32 %v847_v13, 0.0  ;;  %v698_v7 = vadd.f32 %v697_v15, %v655_v14 }
 0x116   :  { %v656_v24 = vpop.f32.mrf.mxu1 }
 0x117   :  { %v1267_v22 = vpack.c.bf16 %v860_v18, %v859_v17  ;;  %v741_v28 = vadd.f32 %v740_v12, %v698_v7  ;;  %v657_v31 = vadd.f32 %v656_v24, %v1653_v29 }
 0x118   :  { %v785_v25 = vpop.f32.mrf.mxu0 }
 0x119   :  { %1277 = vst [vmem:[%s1706_s3 + $0x20] sm:$0xff] %v1267_v22   ;;  %v784_v16 = vadd.f32 %v783_v9, %v741_v28 }
 0x11b   :  { %v848_v36 = vadd.f32 %v1658_v43, %v784_v16 }
 0x11c   :  { %v699_v32 = vpop.f32.mrf.mxu2 }
 0x11d   :  { %v742_v30 = vpop.f32.mrf.mxu3  ;;  %v700_v33 = vadd.f32 %v699_v32, %v657_v31  ;;  %v861_v42 = vmax.f32 %v848_v36, 0.0 }
 0x11e   :  { %v659_v34 = vpop.f32.mrf.mxu1 }
 0x11f   :  { %v743_v26 = vadd.f32 %v742_v30, %v700_v33  ;;  %v660_v40 = vadd.f32 %v659_v34, %v1643_v21 }
 0x120   :  { %v788_v35 = vpop.f32.mrf.mxu0 }
 0x121   :  { %v786_v37 = vadd.f32 %v785_v25, %v743_v26 }
 0x123   :  { %v849_v39 = vadd.f32 %v1658_v43, %v786_v37 }
 0x124   :  { %v702_v41 = vpop.f32.mrf.mxu2 }
 0x125   :  { %v745_v38 = vpop.f32.mrf.mxu3  ;;  %v862_v44 = vmax.f32 %v849_v39, 0.0  ;;  %v703_v20 = vadd.f32 %v702_v41, %v660_v40 }
 0x126   :  { %v661_v45 = vpop.f32.mrf.mxu1 }
 0x127   :  { %v1272_v29 = vpack.c.bf16 %v862_v44, %v861_v42  ;;  %v746_v46 = vadd.f32 %v745_v38, %v703_v20 }
 0x128   :  { %v790_v47 = vpop.f32.mrf.mxu0 }
 0x129   :  { %1278 = vst [vmem:[%s1706_s3 + $0x28] sm:$0xff] %v1272_v29   ;;  %v789_v48 = vadd.f32 %v788_v35, %v746_v46 }
 0x12b   :  { %v850_v50 = vadd.f32 %v1658_v43, %v789_v48 }
 0x12c   :  { %v704_v51 = vpop.f32.mrf.mxu2 }
 0x12d   :  { %v747_v49 = vpop.f32.mrf.mxu3  ;;  %v863_v52 = vmax.f32 %v850_v50, 0.0 }
 0x12f   :  { %v876_v23 = vpack.c.bf16 %v863_v52, %v863_v52 }
 0x131   :  { %889 = vst [vmem:[%s1706_s3 + $0x30] sm:$0xf] %v876_v23 }

// kernel: forward.7
= control target key start
LH: loop header
LB: loop body
LE: loop exit
PB: predicated region body
PF: predicated region fallthrough
CT: control target
= control target key end

     0   :  { %s3011_s18 = smov 0   ;;  %s3013_s19 = smov 0   ;;  %s3512_s0 = inlined_call_operand.vmem [shape: bf16[8,3200], index: 0, kind: input, shape index: {}]   ;;  %s3513_s1 = inlined_call_operand.vmem [shape: bf16[3200,512], index: 1, kind: input, shape index: {}]   ;;  %s3514_s2 = inlined_call_operand.vmem [shape: f32[1,512], index: 2, kind: input, shape index: {}]   ;;  %s3515_s3 = inlined_call_operand.vmem [shape: bf16[512,128], index: 3, kind: input, shape index: {}]   ;;  %s3516_s4 = inlined_call_operand.vmem [shape: f32[1,128], index: 4, kind: input, shape index: {}]   ;;  %s3517_s5 = inlined_call_operand.vmem [shape: f32[8,128], index: 5, kind: output, shape index: {}]  }
   0x1   :  { %s3015_s20 = smov 0  }
   0x2 LB: > { %s24_s21 = sadd.s32 1, %s2974_s19  ;;  %p1960_p0 = scmp.ge.s32.totalorder %s2978_s20, 1  ;;  %s2978_s20 = sphi %s3015_s20, %s15_s20   ;;  %s2974_s19 = sphi %s3013_s19, %s3519_s19   ;;  %s2970_s18 = sphi %s3011_s18, %s3518_s18  }
   0x3   : > { %p25_p1 = scmp.ge.s32.totalorder %s24_s21, 5  ;;  %p218_p2 = scmp.lt.s32.totalorder %s2978_s20, 6 }
   0x5   : > { %s3521_s21 = smov (%p25_p1, %s24_s21), 0  ;;  %p219_p3 = pnand %p1960_p0, %p218_p2 }
   0x6   : > { %s255_s22 = smul.u32 (!%p219_p3), 5, %s2970_s18  ;;  %p1964_p6 = scmp.ne.s32.totalorder (!%p219_p3), %s2970_s18, 0 }
   0x7   : > { %222 = sbr.rel (%p219_p3) target bundleno = 505 (0x1f9), region = 40 }
   0x8   : > { %s265_s23 = smul.u32 (!%p219_p3), 80, %s2970_s18  ;;  %p258_p4 = scmp.lt.s32.totalorder (!%p219_p3), %s255_s22, 24 }
   0xa   : > { %p266_p5 = scmp.lt.s32.totalorder (!%p219_p3), %s265_s23, 399 }
   0xc   : > { %s3523_s22 = smov (!%p258_p4, %s255_s22), 24  ;;  %s3525_s23 = smov (!%p266_p5, %s265_s23), 399 }
   0xd   : > { %s1961_s24 = sshll.u32 %s3523_s22, 2  ;;  %s2737_s28 = sshll.u32 %s3525_s23, 4 }
   0xe   : > { %s3036_s27 = scalar_lea.vmem %s3512_s0, %s1961_s24  ;;  %s3041_s6 = scalar_lea.vmem %s3513_s1, %s2737_s28 }
   0xf   : > { %279 = sbr.rel (%p1964_p6) target bundleno = 25 (0x19), region = 44 }
  0x14   : > { %v2980_v0 = vmov 0.0  }
  0x15   : > { %280 = vst [vmem:[#allocation2 + $0x10] sm:$0xff] %v2980_v0 }
  0x16   : > { %281 = vst [vmem:[#allocation2] sm:$0xff] %v2980_v0 }
  0x17   : > { %282 = vst [vmem:[#allocation2 + $0x18] sm:$0xff] %v2980_v0 }
  0x18   : > { %283 = vst [vmem:[#allocation2 + $0x8] sm:$0xff] %v2980_v0 }
  0x19 PF: > { %v2079_v1 = vld [vmem:[%s3041_s6 + $0xe0] sm:$0xf]  ;;  %v2768_v2 = vld [vmem:[%s3041_s6 + $0xec] sm:$0xf0]  ;;  %p2605_p7 = scmp.ne.s32.totalorder %s2970_s18, 4 }
  0x1a   : > { %v2207_v3 = vld [vmem:[%s3041_s6 + $0x1e0] sm:$0xf]  ;;  %v2080_v4 = vor.u32 %v2768_v2, %v2079_v1  ;;  %v2800_v5 = vld [vmem:[%s3041_s6 + $0x1ec] sm:$0xf0] }
  0x1b   : > { %v2335_v6 = vld [vmem:[%s3041_s6 + $0x2e0] sm:$0xf]  ;;  %v2832_v7 = vld [vmem:[%s3041_s6 + $0x2ec] sm:$0xf0]  ;;  %v2208_v8 = vor.u32 %v2800_v5, %v2207_v3 }
  0x1c   : > { %v2336_v9 = vor.u32 %v2832_v7, %v2335_v6  ;;  %v2463_v10 = vld [vmem:[%s3041_s6 + $0x3e0] sm:$0xf]  ;;  %v2864_v11 = vld [vmem:[%s3041_s6 + $0x3ec] sm:$0xf0]  ;;  %1269 = vmatpush.bf16.msra.mxu0 %v2080_v4 }
  0x1d   : > { %v2063_v12 = vld [vmem:[%s3041_s6 + $0xc0] sm:$0xf]  ;;  %v2464_v13 = vor.u32 %v2864_v11, %v2463_v10  ;;  %v2764_v14 = vld [vmem:[%s3041_s6 + $0xcc] sm:$0xf0]  ;;  %1282 = vmatpush.bf16.msra.mxu1 %v2208_v8 }
  0x1e   : > { %v2191_v15 = vld [vmem:[%s3041_s6 + $0x1c0] sm:$0xf]  ;;  %v2796_v16 = vld [vmem:[%s3041_s6 + $0x1cc] sm:$0xf0]  ;;  %1295 = vmatpush.bf16.msra.mxu2 %v2336_v9  ;;  %v2064_v17 = vor.u32 %v2764_v14, %v2063_v12 }
  0x1f   : > { %v2192_v18 = vor.u32 %v2796_v16, %v2191_v15  ;;  %v2319_v19 = vld [vmem:[%s3041_s6 + $0x2c0] sm:$0xf]  ;;  %v2828_v20 = vld [vmem:[%s3041_s6 + $0x2cc] sm:$0xf0]  ;;  %1308 = vmatpush.bf16.msra.mxu3 %v2464_v13 }
  0x20   : > { %v2447_v21 = vld [vmem:[%s3041_s6 + $0x3c0] sm:$0xf]  ;;  %v2320_v22 = vor.u32 %v2828_v20, %v2319_v19  ;;  %v2860_v23 = vld [vmem:[%s3041_s6 + $0x3cc] sm:$0xf0]  ;;  %1270 = vmatpush.bf16.msra.mxu0 %v2064_v17 }
  0x21   : > { %v2047_v24 = vld [vmem:[%s3041_s6 + $0xa0] sm:$0xf]  ;;  %v2760_v25 = vld [vmem:[%s3041_s6 + $0xac] sm:$0xf0]  ;;  %v2448_v26 = vor.u32 %v2860_v23, %v2447_v21  ;;  %1283 = vmatpush.bf16.msra.mxu1 %v2192_v18 }
  0x22   : > { %v2175_v27 = vld [vmem:[%s3041_s6 + $0x1a0] sm:$0xf]  ;;  %v2792_v28 = vld [vmem:[%s3041_s6 + $0x1ac] sm:$0xf0]  ;;  %v2048_v30 = vor.u32 %v2760_v25, %v2047_v24  ;;  %1296 = vmatpush.bf16.msra.mxu2 %v2320_v22 }
  0x23   : > { %v2303_v29 = vld [vmem:[%s3041_s6 + $0x2a0] sm:$0xf]  ;;  %v2824_v31 = vld [vmem:[%s3041_s6 + $0x2ac] sm:$0xf0]  ;;  %v2176_v34 = vor.u32 %v2792_v28, %v2175_v27  ;;  %1309 = vmatpush.bf16.msra.mxu3 %v2448_v26 }
  0x24   : > { %v2431_v32 = vld [vmem:[%s3041_s6 + $0x3a0] sm:$0xf]  ;;  %v2856_v33 = vld [vmem:[%s3041_s6 + $0x3ac] sm:$0xf0]  ;;  %v2304_v35 = vor.u32 %v2824_v31, %v2303_v29  ;;  %1271 = vmatpush.bf16.msra.mxu0 %v2048_v30  ;;  %v2766_v31 = vld [vmem:[%s3041_s6 + $0xe4] sm:$0xf] }
  0x25   : > { %v2031_v36 = vld [vmem:[%s3041_s6 + $0x80] sm:$0xf]  ;;  %v2756_v37 = vld [vmem:[%s3041_s6 + $0x8c] sm:$0xf0]  ;;  %v2432_v39 = vor.u32 %v2856_v33, %v2431_v32  ;;  %1284 = vmatpush.bf16.msra.mxu1 %v2176_v34  ;;  %v2081_v33 = vld [vmem:[%s3041_s6 + $0xf0] sm:$0xf0] }
  0x26   : > { %v2159_v38 = vld [vmem:[%s3041_s6 + $0x180] sm:$0xf]  ;;  %v2788_v40 = vld [vmem:[%s3041_s6 + $0x18c] sm:$0xf0]  ;;  %v2032_v45 = vor.u32 %v2756_v37, %v2031_v36  ;;  %1297 = vmatpush.bf16.msra.mxu2 %v2304_v35  ;;  %v2798_v34 = vld [vmem:[%s3041_s6 + $0x1e4] sm:$0xf] }
  0x27   : > { %v2287_v41 = vld [vmem:[%s3041_s6 + $0x280] sm:$0xf]  ;;  %v2820_v42 = vld [vmem:[%s3041_s6 + $0x28c] sm:$0xf0]  ;;  %v2160_v46 = vor.u32 %v2788_v40, %v2159_v38  ;;  %1310 = vmatpush.bf16.msra.mxu3 %v2432_v39  ;;  %v2209_v35 = vld [vmem:[%s3041_s6 + $0x1f0] sm:$0xf0] }
  0x28   : > { %v2415_v43 = vld [vmem:[%s3041_s6 + $0x380] sm:$0xf]  ;;  %v2852_v44 = vld [vmem:[%s3041_s6 + $0x38c] sm:$0xf0]  ;;  %v2288_v47 = vor.u32 %v2820_v42, %v2287_v41  ;;  %1272 = vmatpush.bf16.msra.mxu0 %v2032_v45  ;;  %v2830_v38 = vld [vmem:[%s3041_s6 + $0x2e4] sm:$0xf]  ;;  %v2084_v42 = vor.u32 %v2766_v31, %v2081_v33 }
  0x29   : > { %v2015_v48 = vld [vmem:[%s3041_s6 + $0x60] sm:$0xf]  ;;  %v2752_v49 = vld [vmem:[%s3041_s6 + $0x6c] sm:$0xf0]  ;;  %v2416_v51 = vor.u32 %v2852_v44, %v2415_v43  ;;  %1285 = vmatpush.bf16.msra.mxu1 %v2160_v46  ;;  %v2337_v39 = vld [vmem:[%s3041_s6 + $0x2f0] sm:$0xf0]  ;;  %v2212_v43 = vor.u32 %v2798_v34, %v2209_v35 }
  0x2a   : > { %v2143_v50 = vld [vmem:[%s3041_s6 + $0x160] sm:$0xf]  ;;  %v2784_v52 = vld [vmem:[%s3041_s6 + $0x16c] sm:$0xf0]  ;;  %v2016_v57 = vor.u32 %v2752_v49, %v2015_v48  ;;  %1298 = vmatpush.bf16.msra.mxu2 %v2288_v47  ;;  %v2762_v46 = vld [vmem:[%s3041_s6 + $0xc4] sm:$0xf]  ;;  %v2340_v47 = vor.u32 %v2830_v38, %v2337_v39 }
  0x2b   : > { %v2271_v53 = vld [vmem:[%s3041_s6 + $0x260] sm:$0xf]  ;;  %v2816_v54 = vld [vmem:[%s3041_s6 + $0x26c] sm:$0xf0]  ;;  %v2144_v58 = vor.u32 %v2784_v52, %v2143_v50  ;;  %1311 = vmatpush.bf16.msra.mxu3 %v2416_v51  ;;  %v2065_v48 = vld [vmem:[%s3041_s6 + $0xd0] sm:$0xf0] }
  0x2c   : > { %v2399_v55 = vld [vmem:[%s3041_s6 + $0x360] sm:$0xf]  ;;  %v2848_v56 = vld [vmem:[%s3041_s6 + $0x36c] sm:$0xf0]  ;;  %v2272_v59 = vor.u32 %v2816_v54, %v2271_v53  ;;  %1273 = vmatpush.bf16.msra.mxu0 %v2016_v57  ;;  %v2794_v49 = vld [vmem:[%s3041_s6 + $0x1c4] sm:$0xf] }
  0x2d   : > { %v1999_v60 = vld [vmem:[%s3041_s6 + $0x40] sm:$0xf]  ;;  %v2748_v61 = vld [vmem:[%s3041_s6 + $0x4c] sm:$0xf0]  ;;  %v2400_v63 = vor.u32 %v2848_v56, %v2399_v55  ;;  %1286 = vmatpush.bf16.msra.mxu1 %v2144_v58  ;;  %v2193_v50 = vld [vmem:[%s3041_s6 + $0x1d0] sm:$0xf0]  ;;  %v2068_v55 = vor.u32 %v2762_v46, %v2065_v48 }
  0x2e   : > { %v2127_v62 = vld [vmem:[%s3041_s6 + $0x140] sm:$0xf]  ;;  %v2780_v0 = vld [vmem:[%s3041_s6 + $0x14c] sm:$0xf0]  ;;  %v2000_v5 = vor.u32 %v2748_v61, %v1999_v60  ;;  %1299 = vmatpush.bf16.msra.mxu2 %v2272_v59  ;;  %v2826_v51 = vld [vmem:[%s3041_s6 + $0x2c4] sm:$0xf]  ;;  %v2196_v56 = vor.u32 %v2794_v49, %v2193_v50 }
  0x2f   : > { %v2255_v1 = vld [vmem:[%s3041_s6 + $0x240] sm:$0xf]  ;;  %v2812_v2 = vld [vmem:[%s3041_s6 + $0x24c] sm:$0xf0]  ;;  %v2128_v6 = vor.u32 %v2780_v0, %v2127_v62  ;;  %1312 = vmatpush.bf16.msra.mxu3 %v2400_v63  ;;  %v2321_v52 = vld [vmem:[%s3041_s6 + $0x2d0] sm:$0xf0] }
  0x30   : > { %v2383_v3 = vld [vmem:[%s3041_s6 + $0x340] sm:$0xf]  ;;  %v2844_v4 = vld [vmem:[%s3041_s6 + $0x34c] sm:$0xf0]  ;;  %v2256_v7 = vor.u32 %v2812_v2, %v2255_v1  ;;  %1274 = vmatpush.bf16.msra.mxu0 %v2000_v5  ;;  %v2758_v58 = vld [vmem:[%s3041_s6 + $0xa4] sm:$0xf]  ;;  %v2324_v60 = vor.u32 %v2826_v51, %v2321_v52 }
  0x31   : > { %v1983_v8 = vld [vmem:[%s3041_s6 + $0x20] sm:$0xf]  ;;  %v2744_v9 = vld [vmem:[%s3041_s6 + $0x2c] sm:$0xf0]  ;;  %v2384_v11 = vor.u32 %v2844_v4, %v2383_v3  ;;  %1287 = vmatpush.bf16.msra.mxu1 %v2128_v6  ;;  %v2049_v59 = vld [vmem:[%s3041_s6 + $0xb0] sm:$0xf0] }
  0x32   : > { %v2111_v10 = vld [vmem:[%s3041_s6 + $0x120] sm:$0xf]  ;;  %v2776_v12 = vld [vmem:[%s3041_s6 + $0x12c] sm:$0xf0]  ;;  %v1984_v17 = vor.u32 %v2744_v9, %v1983_v8  ;;  %1300 = vmatpush.bf16.msra.mxu2 %v2256_v7  ;;  %v2790_v61 = vld [vmem:[%s3041_s6 + $0x1a4] sm:$0xf]  ;;  %v2052_v2 = vor.u32 %v2758_v58, %v2049_v59 }
  0x33   : > { %v2239_v13 = vld [vmem:[%s3041_s6 + $0x220] sm:$0xf]  ;;  %v2808_v14 = vld [vmem:[%s3041_s6 + $0x22c] sm:$0xf0]  ;;  %v2112_v20 = vor.u32 %v2776_v12, %v2111_v10  ;;  %1313 = vmatpush.bf16.msra.mxu3 %v2384_v11  ;;  %v2177_v62 = vld [vmem:[%s3041_s6 + $0x1b0] sm:$0xf0] }
  0x34   : > { %v2367_v15 = vld [vmem:[%s3041_s6 + $0x320] sm:$0xf]  ;;  %v2840_v16 = vld [vmem:[%s3041_s6 + $0x32c] sm:$0xf0]  ;;  %v2240_v21 = vor.u32 %v2808_v14, %v2239_v13  ;;  %1275 = vmatpush.bf16.msra.mxu0 %v1984_v17  ;;  %v2822_v63 = vld [vmem:[%s3041_s6 + $0x2a4] sm:$0xf]  ;;  %v2180_v5 = vor.u32 %v2790_v61, %v2177_v62 }
  0x35   : > { %v1967_v18 = vld [vmem:[%s3041_s6] sm:$0xf]  ;;  %v2740_v19 = vld [vmem:[%s3041_s6 + $0xc] sm:$0xf0]  ;;  %v2368_v25 = vor.u32 %v2840_v16, %v2367_v15  ;;  %1288 = vmatpush.bf16.msra.mxu1 %v2112_v20  ;;  %v2305_v0 = vld [vmem:[%s3041_s6 + $0x2b0] sm:$0xf0] }
  0x36   : > { %v2095_v22 = vld [vmem:[%s3041_s6 + $0x100] sm:$0xf]  ;;  %v2772_v23 = vld [vmem:[%s3041_s6 + $0x10c] sm:$0xf0]  ;;  %v1968_v32 = vor.u32 %v2740_v19, %v1967_v18  ;;  %1301 = vmatpush.bf16.msra.mxu2 %v2240_v21  ;;  %v289_v4 = vld [vmem:[%s3036_s27 + $0x8] sm:$0xff]  ;;  %v2308_v12 = vor.u32 %v2822_v63, %v2305_v0 }
  0x37   : > { %v2223_v24 = vld [vmem:[%s3041_s6 + $0x200] sm:$0xf]  ;;  %v2804_v26 = vld [vmem:[%s3041_s6 + $0x20c] sm:$0xf0]  ;;  %v2096_v36 = vor.u32 %v2772_v23, %v2095_v22  ;;  %1314 = vmatpush.bf16.msra.mxu3 %v2368_v25  ;;  %v2754_v8 = vld [vmem:[%s3041_s6 + $0x84] sm:$0xf]  ;;  %v456_v10 = vunpack.c.l.b16 %v289_v4  ;;  %v457_v11 = vunpack.c.h.b16 %v289_v4 }
  0x38   : > { %v2351_v27 = vld [vmem:[%s3041_s6 + $0x300] sm:$0xf]  ;;  %v2836_v28 = vld [vmem:[%s3041_s6 + $0x30c] sm:$0xf0]  ;;  %v2224_v37 = vor.u32 %v2804_v26, %v2223_v24  ;;  %1276 = vmatpush.bf16.msra.mxu0 %v1968_v32  ;;  %v2033_v13 = vld [vmem:[%s3041_s6 + $0x90] sm:$0xf0] }
  0x39   : > { %v2591_v29 = vld [vmem:[%s3041_s6 + $0x4e0] sm:$0xf]  ;;  %v2896_v30 = vld [vmem:[%s3041_s6 + $0x4ec] sm:$0xf0]  ;;  %v2352_v40 = vor.u32 %v2836_v28, %v2351_v27  ;;  %1289 = vmatpush.bf16.msra.mxu1 %v2096_v36  ;;  %v2786_v14 = vld [vmem:[%s3041_s6 + $0x184] sm:$0xf]  ;;  %v3144_v20 = vpack.c.b16 %v456_v10, %v456_v10  ;;  %v3146_v21 = vpack.c.b16 %v457_v11, %v457_v11  ;;  %v2036_v24 = vor.u32 %v2754_v8, %v2033_v13 }
  0x3a   : > { %v2592_v41 = vor.u32 %v2896_v30, %v2591_v29  ;;  %v2575_v44 = vld [vmem:[%s3041_s6 + $0x4c0] sm:$0xf]  ;;  %v2892_v45 = vld [vmem:[%s3041_s6 + $0x4cc] sm:$0xf0]  ;;  %1302 = vmatpush.bf16.msra.mxu2 %v2224_v37  ;;  %v2161_v15 = vld [vmem:[%s3041_s6 + $0x190] sm:$0xf0] }
  0x3b   : > { %1315 = vmatpush.bf16.msra.mxu3 %v2352_v40  ;;  %v2576_v53 = vor.u32 %v2892_v45, %v2575_v44  ;;  %v2559_v54 = vld [vmem:[%s3041_s6 + $0x4a0] sm:$0xf]  ;;  %v2888_v57 = vld [vmem:[%s3041_s6 + $0x4ac] sm:$0xf0]  ;;  %v2818_v17 = vld [vmem:[%s3041_s6 + $0x284] sm:$0xf]  ;;  %v2164_v25 = vor.u32 %v2786_v14, %v2161_v15 }
  0x3c   : > { %1321 = vmatpush.bf16.msrb.mxu0 %v2592_v41  ;;  %v2560_v1 = vor.u32 %v2888_v57, %v2559_v54  ;;  %v288_v3 = vld [vmem:[%s3036_s27] sm:$0xff]  ;;  %v2884_v7 = vld [vmem:[%s3041_s6 + $0x48c] sm:$0xf0]  ;;  %v2289_v18 = vld [vmem:[%s3041_s6 + $0x290] sm:$0xf0] }
  0x3d   : > { %1334 = vmatpush.bf16.msrb.mxu1 %v2084_v42  ;;  %v2543_v6 = vld [vmem:[%s3041_s6 + $0x480] sm:$0xf]  ;;  %v454_v9 = vunpack.c.l.b16 %v288_v3  ;;  %v455_v16 = vunpack.c.h.b16 %v288_v3  ;;  %v2880_v27 = vld [vmem:[%s3041_s6 + $0x46c] sm:$0xf0]  ;;  %v2750_v28 = vld [vmem:[%s3041_s6 + $0x64] sm:$0xf]  ;;  %v2292_v29 = vor.u32 %v2818_v17, %v2289_v18  ;;  %1303 = vmatmul.bf16.vlgmr.msra.gmra.mxu2 %v3144_v20 }
  0x3e   : > { %1347 = vmatpush.bf16.msrb.mxu2 %v2212_v43  ;;  %v2544_v22 = vor.u32 %v2884_v7, %v2543_v6  ;;  %v2527_v26 = vld [vmem:[%s3041_s6 + $0x460] sm:$0xf]  ;;  %v2017_v30 = vld [vmem:[%s3041_s6 + $0x70] sm:$0xf0]  ;;  %v2782_v31 = vld [vmem:[%s3041_s6 + $0x164] sm:$0xf]  ;;  %1316 = vmatmul.bf16.vlgmr.msra.gmra.mxu3 %v3146_v21 }
  0x3f   : > { %1360 = vmatpush.bf16.msrb.mxu3 %v2340_v47  ;;  %v3142_v19 = vpack.c.b16 %v454_v9, %v454_v9  ;;  %v3148_v23 = vpack.c.b16 %v455_v16, %v455_v16  ;;  %v2145_v32 = vld [vmem:[%s3041_s6 + $0x170] sm:$0xf0]  ;;  %v2814_v33 = vld [vmem:[%s3041_s6 + $0x264] sm:$0xf]  ;;  %v2528_v35 = vor.u32 %v2880_v27, %v2527_v26  ;;  %v2020_v36 = vor.u32 %v2750_v28, %v2017_v30  ;;  %v2511_v38 = vld [vmem:[%s3041_s6 + $0x440] sm:$0xf] }
  0x40   : > { %1322 = vmatpush.bf16.msrb.mxu0 %v2576_v53  ;;  %v2273_v34 = vld [vmem:[%s3041_s6 + $0x270] sm:$0xf0]  ;;  %v2148_v37 = vor.u32 %v2782_v31, %v2145_v32  ;;  %v2876_v39 = vld [vmem:[%s3041_s6 + $0x44c] sm:$0xf0]  ;;  %v2746_v40 = vld [vmem:[%s3041_s6 + $0x44] sm:$0xf] }
  0x41   : > { %1335 = vmatpush.bf16.msrb.mxu1 %v2068_v55  ;;  %1277 = vmatmul.bf16.vlgmr.msra.gmra.mxu0 %v3142_v19  ;;  %v2276_v41 = vor.u32 %v2814_v33, %v2273_v34  ;;  %v2001_v42 = vld [vmem:[%s3041_s6 + $0x50] sm:$0xf0]  ;;  %v2778_v43 = vld [vmem:[%s3041_s6 + $0x144] sm:$0xf]  ;;  %v2512_v47 = vor.u32 %v2876_v39, %v2511_v38  ;;  %v2495_v50 = vld [vmem:[%s3041_s6 + $0x420] sm:$0xf] }
  0x42   : > { %1348 = vmatpush.bf16.msrb.mxu2 %v2196_v56  ;;  %1290 = vmatmul.bf16.vlgmr.msra.gmra.mxu1 %v3148_v23  ;;  %v2129_v44 = vld [vmem:[%s3041_s6 + $0x150] sm:$0xf0]  ;;  %v2810_v45 = vld [vmem:[%s3041_s6 + $0x244] sm:$0xf]  ;;  %v2004_v48 = vor.u32 %v2746_v40, %v2001_v42  ;;  %v2872_v51 = vld [vmem:[%s3041_s6 + $0x42c] sm:$0xf0] }
  0x43   : > { %1361 = vmatpush.bf16.msrb.mxu3 %v2324_v60  ;;  %v2257_v46 = vld [vmem:[%s3041_s6 + $0x250] sm:$0xf0]  ;;  %v2132_v49 = vor.u32 %v2778_v43, %v2129_v44  ;;  %v2742_v52 = vld [vmem:[%s3041_s6 + $0x24] sm:$0xf]  ;;  %v2496_v59 = vor.u32 %v2872_v51, %v2495_v50  ;;  %v2479_v60 = vld [vmem:[%s3041_s6 + $0x400] sm:$0xf] }
  0x44   : > { %1323 = vmatpush.bf16.msrb.mxu0 %v2560_v1  ;;  %v2260_v53 = vor.u32 %v2810_v45, %v2257_v46  ;;  %v1985_v54 = vld [vmem:[%s3041_s6 + $0x30] sm:$0xf0]  ;;  %v2774_v55 = vld [vmem:[%s3041_s6 + $0x124] sm:$0xf]  ;;  %v2868_v61 = vld [vmem:[%s3041_s6 + $0x40c] sm:$0xf0] }
  0x45   : > { %1336 = vmatpush.bf16.msrb.mxu1 %v2052_v2  ;;  %v2113_v56 = vld [vmem:[%s3041_s6 + $0x130] sm:$0xf0]  ;;  %v2806_v57 = vld [vmem:[%s3041_s6 + $0x224] sm:$0xf]  ;;  %v1988_v63 = vor.u32 %v2742_v52, %v1985_v54  ;;  %v290_v3 = vld [vmem:[%s3036_s27 + $0x10] sm:$0xf]  ;;  %v2480_v11 = vor.u32 %v2868_v61, %v2479_v60 }
  0x46   : > { %1349 = vmatpush.bf16.msrb.mxu2 %v2180_v5  ;;  %v2241_v58 = vld [vmem:[%s3041_s6 + $0x230] sm:$0xf0]  ;;  %v2738_v62 = vld [vmem:[%s3041_s6 + $0x4] sm:$0xf]  ;;  %v2116_v0 = vor.u32 %v2774_v55, %v2113_v56  ;;  %v2087_v13 = vld [vmem:[%s3041_s6 + $0xe8] sm:$0xf]  ;;  %v458_v15 = vunpack.c.l.b16 %v290_v3 }
  0x47   : > { %1362 = vmatpush.bf16.msrb.mxu3 %v2308_v12  ;;  %v1969_v1 = vld [vmem:[%s3041_s6 + $0x10] sm:$0xf0]  ;;  %v2770_v2 = vld [vmem:[%s3041_s6 + $0x104] sm:$0xf]  ;;  %v2244_v4 = vor.u32 %v2806_v57, %v2241_v58  ;;  %v2769_v14 = vld [vmem:[%s3041_s6 + $0xf4] sm:$0xf0] }
  0x48   : > { %1324 = vmatpush.bf16.msrb.mxu0 %v2544_v22  ;;  %v2097_v5 = vld [vmem:[%s3041_s6 + $0x110] sm:$0xf0]  ;;  %v2802_v6 = vld [vmem:[%s3041_s6 + $0x204] sm:$0xf]  ;;  %v1972_v16 = vor.u32 %v2738_v62, %v1969_v1  ;;  %v2215_v18 = vld [vmem:[%s3041_s6 + $0x1e8] sm:$0xf]  ;;  %v2088_v27 = vor.u32 %v2769_v14, %v2087_v13 }
  0x49   : > { %1337 = vmatpush.bf16.msrb.mxu1 %v2036_v24  ;;  %v2225_v7 = vld [vmem:[%s3041_s6 + $0x210] sm:$0xf0]  ;;  %v2862_v8 = vld [vmem:[%s3041_s6 + $0x3e4] sm:$0xf]  ;;  %v2100_v17 = vor.u32 %v2770_v2, %v2097_v5  ;;  %v2801_v22 = vld [vmem:[%s3041_s6 + $0x1f4] sm:$0xf0] }
  0x4a   : > { %1350 = vmatpush.bf16.msrb.mxu2 %v2164_v25  ;;  %v2465_v9 = vld [vmem:[%s3041_s6 + $0x3f0] sm:$0xf0]  ;;  %v2894_v10 = vld [vmem:[%s3041_s6 + $0x4e4] sm:$0xf]  ;;  %v2228_v24 = vor.u32 %v2802_v6, %v2225_v7  ;;  %v2216_v31 = vor.u32 %v2801_v22, %v2215_v18  ;;  %v2071_v33 = vld [vmem:[%s3041_s6 + $0xc8] sm:$0xf] }
  0x4b   : > { %1363 = vmatpush.bf16.msrb.mxu3 %v2292_v29  ;;  %v2593_v12 = vld [vmem:[%s3041_s6 + $0x4f0] sm:$0xf0]  ;;  %v2468_v25 = vor.u32 %v2862_v8, %v2465_v9  ;;  %v2858_v28 = vld [vmem:[%s3041_s6 + $0x3c4] sm:$0xf]  ;;  %v2765_v34 = vld [vmem:[%s3041_s6 + $0xd4] sm:$0xf0] }
  0x4c   : > { %1325 = vmatpush.bf16.msrb.mxu0 %v2528_v35  ;;  %v2596_v26 = vor.u32 %v2894_v10, %v2593_v12  ;;  %v2449_v29 = vld [vmem:[%s3041_s6 + $0x3d0] sm:$0xf0]  ;;  %v2890_v30 = vld [vmem:[%s3041_s6 + $0x4c4] sm:$0xf]  ;;  %v3201_v35 = vpack.c.b16 %v458_v15, %v458_v15  ;;  %v2072_v40 = vor.u32 %v2765_v34, %v2071_v33  ;;  %v2055_v46 = vld [vmem:[%s3041_s6 + $0xa8] sm:$0xf] }
  0x4d   : > { %1338 = vmatpush.bf16.msrb.mxu1 %v2020_v36  ;;  %v2577_v32 = vld [vmem:[%s3041_s6 + $0x4d0] sm:$0xf0]  ;;  %v2199_v36 = vld [vmem:[%s3041_s6 + $0x1c8] sm:$0xf]  ;;  %v2452_v38 = vor.u32 %v2858_v28, %v2449_v29  ;;  %v2886_v43 = vld [vmem:[%s3041_s6 + $0x4a4] sm:$0xf] }
  0x4e   : > { %1351 = vmatpush.bf16.msrb.mxu2 %v2148_v37  ;;  %v2797_v37 = vld [vmem:[%s3041_s6 + $0x1d4] sm:$0xf0]  ;;  %v2580_v39 = vor.u32 %v2890_v30, %v2577_v32  ;;  %v2433_v42 = vld [vmem:[%s3041_s6 + $0x3b0] sm:$0xf0]  ;;  %v2882_v55 = vld [vmem:[%s3041_s6 + $0x484] sm:$0xf] }
  0x4f   : > { %1364 = vmatpush.bf16.msrb.mxu3 %v2276_v41  ;;  %v2854_v41 = vld [vmem:[%s3041_s6 + $0x3a4] sm:$0xf]  ;;  %v2200_v44 = vor.u32 %v2797_v37, %v2199_v36  ;;  %v2561_v45 = vld [vmem:[%s3041_s6 + $0x4b0] sm:$0xf0]  ;;  %v2039_v58 = vld [vmem:[%s3041_s6 + $0x88] sm:$0xf] }
  0x50   : > { %1326 = vmatpush.bf16.msrb.mxu0 %v2512_v47  ;;  %v2761_v47 = vld [vmem:[%s3041_s6 + $0xb4] sm:$0xf0]  ;;  %v2436_v50 = vor.u32 %v2854_v41, %v2433_v42  ;;  %v2564_v51 = vor.u32 %v2886_v43, %v2561_v45  ;;  %v2417_v54 = vld [vmem:[%s3041_s6 + $0x390] sm:$0xf0]  ;;  %v2167_v60 = vld [vmem:[%s3041_s6 + $0x188] sm:$0xf] }
  0x51   : > { %1339 = vmatpush.bf16.msrb.mxu1 %v2004_v48  ;;  %v2183_v48 = vld [vmem:[%s3041_s6 + $0x1a8] sm:$0xf]  ;;  %v2056_v52 = vor.u32 %v2761_v47, %v2055_v46  ;;  %v2545_v57 = vld [vmem:[%s3041_s6 + $0x490] sm:$0xf0]  ;;  %v2789_v61 = vld [vmem:[%s3041_s6 + $0x194] sm:$0xf0] }
  0x52   : > { %1352 = vmatpush.bf16.msrb.mxu2 %v2132_v49  ;;  %v2793_v49 = vld [vmem:[%s3041_s6 + $0x1b4] sm:$0xf0]  ;;  %v2846_v1 = vld [vmem:[%s3041_s6 + $0x364] sm:$0xf]  ;;  %v2401_v2 = vld [vmem:[%s3041_s6 + $0x370] sm:$0xf0] }
  0x53   : > { %1365 = vmatpush.bf16.msrb.mxu3 %v2260_v53  ;;  %v2850_v53 = vld [vmem:[%s3041_s6 + $0x384] sm:$0xf]  ;;  %v2184_v56 = vor.u32 %v2793_v49, %v2183_v48  ;;  %v2529_v5 = vld [vmem:[%s3041_s6 + $0x470] sm:$0xf0]  ;;  %v2023_v6 = vld [vmem:[%s3041_s6 + $0x68] sm:$0xf]  ;;  %v2404_v10 = vor.u32 %v2846_v1, %v2401_v2 }
  0x54   : > { %1327 = vmatpush.bf16.msrb.mxu0 %v2496_v59  ;;  %v2757_v59 = vld [vmem:[%s3041_s6 + $0x94] sm:$0xf0]  ;;  %v2420_v62 = vor.u32 %v2850_v53, %v2417_v54  ;;  %v2878_v3 = vld [vmem:[%s3041_s6 + $0x464] sm:$0xf]  ;;  %v2151_v8 = vld [vmem:[%s3041_s6 + $0x168] sm:$0xf] }
  0x55   : > { %1340 = vmatpush.bf16.msrb.mxu1 %v1988_v63  ;;  %v2548_v63 = vor.u32 %v2882_v55, %v2545_v57  ;;  %v2753_v7 = vld [vmem:[%s3041_s6 + $0x74] sm:$0xf0]  ;;  %v2842_v13 = vld [vmem:[%s3041_s6 + $0x344] sm:$0xf]  ;;  %v2385_v14 = vld [vmem:[%s3041_s6 + $0x350] sm:$0xf0] }
  0x56   : > { %1353 = vmatpush.bf16.msrb.mxu2 %v2116_v0  ;;  %v2040_v0 = vor.u32 %v2757_v59, %v2039_v58  ;;  %v2785_v9 = vld [vmem:[%s3041_s6 + $0x174] sm:$0xf0]  ;;  %v2024_v12 = vor.u32 %v2753_v7, %v2023_v6  ;;  %v2874_v15 = vld [vmem:[%s3041_s6 + $0x444] sm:$0xf]  ;;  %v2007_v18 = vld [vmem:[%s3041_s6 + $0x48] sm:$0xf] }
  0x57   : > { %1366 = vmatpush.bf16.msrb.mxu3 %v2244_v4  ;;  %v2168_v4 = vor.u32 %v2789_v61, %v2167_v60  ;;  %v2749_v22 = vld [vmem:[%s3041_s6 + $0x54] sm:$0xf0]  ;;  %v2838_v29 = vld [vmem:[%s3041_s6 + $0x324] sm:$0xf]  ;;  %v2369_v30 = vld [vmem:[%s3041_s6 + $0x330] sm:$0xf0] }
  0x58   : > { %1328 = vmatpush.bf16.msrb.mxu0 %v2480_v11  ;;  %v2532_v11 = vor.u32 %v2878_v3, %v2529_v5  ;;  %v2008_v28 = vor.u32 %v2749_v22, %v2007_v18  ;;  %v2497_v33 = vld [vmem:[%s3041_s6 + $0x430] sm:$0xf0]  ;;  %v1991_v34 = vld [vmem:[%s3041_s6 + $0x28] sm:$0xf]  ;;  %v2745_v36 = vld [vmem:[%s3041_s6 + $0x34] sm:$0xf0] }
  0x59   : > { %1341 = vmatpush.bf16.msrb.mxu1 %v1972_v16  ;;  %v2152_v16 = vor.u32 %v2785_v9, %v2151_v8  ;;  %v2119_v37 = vld [vmem:[%s3041_s6 + $0x128] sm:$0xf]  ;;  %v2353_v41 = vld [vmem:[%s3041_s6 + $0x310] sm:$0xf0]  ;;  %v1992_v43 = vor.u32 %v2745_v36, %v1991_v34  ;;  %v2741_v48 = vld [vmem:[%s3041_s6 + $0x14] sm:$0xf0] }
  0x5a   : > { %1354 = vmatpush.bf16.msrb.mxu2 %v2100_v17  ;;  %v2513_v17 = vld [vmem:[%s3041_s6 + $0x450] sm:$0xf0]  ;;  %v1975_v46 = vld [vmem:[%s3041_s6 + $0x8] sm:$0xf]  ;;  %v2865_v55 = vld [vmem:[%s3041_s6 + $0x3f4] sm:$0xf0] }
  0x5b   : > { %1367 = vmatpush.bf16.msrb.mxu3 %v2228_v24  ;;  %1329 = vmatmul.bf16.vlgmr.msrb.gmra.mxu0 %v3201_v35  ;;  %v2135_v24 = vld [vmem:[%s3041_s6 + $0x148] sm:$0xf]  ;;  %v2481_v45 = vld [vmem:[%s3041_s6 + $0x410] sm:$0xf0]  ;;  %v2897_v57 = vld [vmem:[%s3041_s6 + $0x4f4] sm:$0xf0]  ;;  %v1976_v59 = vor.u32 %v2741_v48, %v1975_v46 }
  0x5c   : > { %1373 = vmatpush.bf16.msra.mxu0 %v2468_v25  ;;  %1342 = vmatmul.bf16.vlgmr.msrb.gmra.mxu1 %v3142_v19  ;;  %v2781_v25 = vld [vmem:[%s3041_s6 + $0x154] sm:$0xf0]  ;;  %v2103_v49 = vld [vmem:[%s3041_s6 + $0x108] sm:$0xf]  ;;  %v2767_v60 = vld [vmem:[%s3041_s6 + $0xec] sm:$0xf] }
  0x5d   : > { %1386 = vmatpush.bf16.msra.mxu1 %v2596_v26  ;;  %1355 = vmatmul.bf16.vlgmr.msrb.gmra.mxu2 %v3148_v23  ;;  %v2388_v26 = vor.u32 %v2842_v13, %v2385_v14  ;;  %v2136_v32 = vor.u32 %v2781_v25, %v2135_v24  ;;  %v2471_v53 = vld [vmem:[%s3041_s6 + $0x3e8] sm:$0xf]  ;;  %v2089_v61 = vld [vmem:[%s3041_s6 + $0xf8] sm:$0xf0]  ;;  %v2829_v3 = vld [vmem:[%s3041_s6 + $0x2d4] sm:$0xf0] }
  0x5e   : > { %1399 = vmatpush.bf16.msra.mxu2 %v2088_v27  ;;  %1368 = vmatmul.bf16.vlgmr.msrb.gmra.mxu3 %v3144_v20  ;;  %v2516_v27 = vor.u32 %v2874_v15, %v2513_v17  ;;  %v2327_v2 = vld [vmem:[%s3041_s6 + $0x2c8] sm:$0xf]  ;;  %v2092_v5 = vor.u32 %v2767_v60, %v2089_v61  ;;  %v2861_v6 = vld [vmem:[%s3041_s6 + $0x3d4] sm:$0xf0]  ;;  %v2763_v9 = vld [vmem:[%s3041_s6 + $0xcc] sm:$0xf] }
  0x5f   : > { %1412 = vmatpush.bf16.msra.mxu3 %v2216_v31  ;;  %v2870_v31 = vld [vmem:[%s3041_s6 + $0x424] sm:$0xf]  ;;  %v2583_v7 = vld [vmem:[%s3041_s6 + $0x4c8] sm:$0xf]  ;;  %v2893_v8 = vld [vmem:[%s3041_s6 + $0x4d4] sm:$0xf0] }
  0x60   : > { %1374 = vmatpush.bf16.msra.mxu0 %v2452_v38  ;;  %v2777_v38 = vld [vmem:[%s3041_s6 + $0x134] sm:$0xf0]  ;;  %v2500_v42 = vor.u32 %v2870_v31, %v2497_v33  ;;  %v2584_v13 = vor.u32 %v2893_v8, %v2583_v7  ;;  %v2311_v14 = vld [vmem:[%s3041_s6 + $0x2a8] sm:$0xf]  ;;  %v2759_v25 = vld [vmem:[%s3041_s6 + $0xac] sm:$0xf] }
  0x61   : > { %1387 = vmatpush.bf16.msra.mxu1 %v2580_v39  ;;  %v2372_v39 = vor.u32 %v2838_v29, %v2369_v30  ;;  %v2120_v47 = vor.u32 %v2777_v38, %v2119_v37  ;;  %v2825_v15 = vld [vmem:[%s3041_s6 + $0x2b4] sm:$0xf0]  ;;  %v2567_v22 = vld [vmem:[%s3041_s6 + $0x4a8] sm:$0xf]  ;;  %v2755_v38 = vld [vmem:[%s3041_s6 + $0x8c] sm:$0xf] }
  0x62   : > { %1400 = vmatpush.bf16.msra.mxu2 %v2072_v40  ;;  %v2834_v40 = vld [vmem:[%s3041_s6 + $0x304] sm:$0xf]  ;;  %v2857_v18 = vld [vmem:[%s3041_s6 + $0x3b4] sm:$0xf0]  ;;  %v2295_v30 = vld [vmem:[%s3041_s6 + $0x288] sm:$0xf] }
  0x63   : > { %1413 = vmatpush.bf16.msra.mxu3 %v2200_v44  ;;  %v2866_v44 = vld [vmem:[%s3041_s6 + $0x404] sm:$0xf]  ;;  %v2356_v54 = vor.u32 %v2834_v40, %v2353_v41  ;;  %v2889_v24 = vld [vmem:[%s3041_s6 + $0x4b4] sm:$0xf0]  ;;  %v2551_v36 = vld [vmem:[%s3041_s6 + $0x488] sm:$0xf] }
  0x64   : > { %1375 = vmatpush.bf16.msra.mxu0 %v2436_v50  ;;  %v2773_v50 = vld [vmem:[%s3041_s6 + $0x114] sm:$0xf0]  ;;  %v2484_v58 = vor.u32 %v2866_v44, %v2481_v45  ;;  %v2568_v29 = vor.u32 %v2889_v24, %v2567_v22  ;;  %v2407_v45 = vld [vmem:[%s3041_s6 + $0x368] sm:$0xf] }
  0x65   : > { %1388 = vmatpush.bf16.msra.mxu1 %v2564_v51  ;;  %v2343_v51 = vld [vmem:[%s3041_s6 + $0x2e8] sm:$0xf]  ;;  %v2821_v31 = vld [vmem:[%s3041_s6 + $0x294] sm:$0xf0] }
  0x66   : > { %1401 = vmatpush.bf16.msra.mxu2 %v2056_v52  ;;  %v2833_v52 = vld [vmem:[%s3041_s6 + $0x2f4] sm:$0xf0]  ;;  %v2296_v40 = vor.u32 %v2821_v31, %v2295_v30  ;;  %v2535_v48 = vld [vmem:[%s3041_s6 + $0x468] sm:$0xf]  ;;  %v2831_v30 = vld [vmem:[%s3041_s6 + $0x2ec] sm:$0xf] }
  0x67   : > { %1414 = vmatpush.bf16.msra.mxu3 %v2184_v56  ;;  %v2599_v56 = vld [vmem:[%s3041_s6 + $0x4e8] sm:$0xf]  ;;  %v2853_v34 = vld [vmem:[%s3041_s6 + $0x394] sm:$0xf0] }
  0x68   : > { %1376 = vmatpush.bf16.msra.mxu0 %v2420_v62  ;;  %v2104_v62 = vor.u32 %v2773_v50, %v2103_v49  ;;  %v2600_v1 = vor.u32 %v2897_v57, %v2599_v56  ;;  %v2885_v37 = vld [vmem:[%s3041_s6 + $0x494] sm:$0xf0]  ;;  %v2751_v50 = vld [vmem:[%s3041_s6 + $0x6c] sm:$0xf]  ;;  %v2391_v57 = vld [vmem:[%s3041_s6 + $0x348] sm:$0xf] }
  0x69   : > { %1389 = vmatpush.bf16.msra.mxu1 %v2548_v63  ;;  %v2344_v63 = vor.u32 %v2833_v52, %v2343_v51  ;;  %v2817_v44 = vld [vmem:[%s3041_s6 + $0x274] sm:$0xf0]  ;;  %v2025_v51 = vld [vmem:[%s3041_s6 + $0x78] sm:$0xf0]  ;;  %v2519_v60 = vld [vmem:[%s3041_s6 + $0x448] sm:$0xf] }
  0x6a   : > { %1402 = vmatpush.bf16.msra.mxu2 %v2040_v0  ;;  %v2472_v0 = vor.u32 %v2865_v55, %v2471_v53  ;;  %v2881_v49 = vld [vmem:[%s3041_s6 + $0x474] sm:$0xf0]  ;;  %v2263_v55 = vld [vmem:[%s3041_s6 + $0x248] sm:$0xf] }
  0x6b   : > { %1415 = vmatpush.bf16.msra.mxu3 %v2168_v4  ;;  %v2455_v4 = vld [vmem:[%s3041_s6 + $0x3c8] sm:$0xf]  ;;  %v2813_v56 = vld [vmem:[%s3041_s6 + $0x254] sm:$0xf0] }
  0x6c   : > { %1377 = vmatpush.bf16.msra.mxu0 %v2404_v10  ;;  %v2073_v10 = vld [vmem:[%s3041_s6 + $0xd8] sm:$0xf0]  ;;  %v2877_v61 = vld [vmem:[%s3041_s6 + $0x454] sm:$0xf0]  ;;  %v2503_v8 = vld [vmem:[%s3041_s6 + $0x428] sm:$0xf] }
  0x6d   : > { %1390 = vmatpush.bf16.msra.mxu1 %v2532_v11  ;;  %v2328_v11 = vor.u32 %v2829_v3, %v2327_v2  ;;  %v2076_v17 = vor.u32 %v2763_v9, %v2073_v10  ;;  %v2520_v2 = vor.u32 %v2877_v61, %v2519_v60  ;;  %v2247_v3 = vld [vmem:[%s3041_s6 + $0x228] sm:$0xf]  ;;  %v2841_v7 = vld [vmem:[%s3041_s6 + $0x334] sm:$0xf0]  ;;  %v2743_v10 = vld [vmem:[%s3041_s6 + $0x2c] sm:$0xf] }
  0x6e   : > { %1403 = vmatpush.bf16.msra.mxu2 %v2024_v12  ;;  %v2456_v12 = vor.u32 %v2861_v6, %v2455_v4  ;;  %v2809_v4 = vld [vmem:[%s3041_s6 + $0x234] sm:$0xf0]  ;;  %v2487_v22 = vld [vmem:[%s3041_s6 + $0x408] sm:$0xf]  ;;  %v2313_v60 = vld [vmem:[%s3041_s6 + $0x2b8] sm:$0xf0] }
  0x6f   : > { %1416 = vmatpush.bf16.msra.mxu3 %v2152_v16  ;;  %v2439_v16 = vld [vmem:[%s3041_s6 + $0x3a8] sm:$0xf]  ;;  %v2873_v9 = vld [vmem:[%s3041_s6 + $0x434] sm:$0xf0]  ;;  %v2855_v61 = vld [vmem:[%s3041_s6 + $0x3ac] sm:$0xf] }
  0x70   : > { %1378 = vmatpush.bf16.msra.mxu0 %v2388_v26  ;;  %v2057_v26 = vld [vmem:[%s3041_s6 + $0xb8] sm:$0xf0] }
  0x71   : > { %1391 = vmatpush.bf16.msra.mxu1 %v2516_v27  ;;  %v2312_v27 = vor.u32 %v2825_v15, %v2311_v14  ;;  %v2060_v33 = vor.u32 %v2759_v25, %v2057_v26  ;;  %v2805_v14 = vld [vmem:[%s3041_s6 + $0x214] sm:$0xf0]  ;;  %v2739_v26 = vld [vmem:[%s3041_s6 + $0xc] sm:$0xf] }
  0x72   : > { %1404 = vmatpush.bf16.msra.mxu2 %v2008_v28  ;;  %v2440_v28 = vor.u32 %v2857_v18, %v2439_v16  ;;  %v2504_v16 = vor.u32 %v2873_v9, %v2503_v8  ;;  %v2837_v18 = vld [vmem:[%s3041_s6 + $0x314] sm:$0xf0]  ;;  %v2851_v8 = vld [vmem:[%s3041_s6 + $0x38c] sm:$0xf]  ;;  %v2425_v9 = vld [vmem:[%s3041_s6 + $0x398] sm:$0xf0] }
  0x73   : > { %1417 = vmatpush.bf16.msra.mxu3 %v2136_v32  ;;  %v2423_v32 = vld [vmem:[%s3041_s6 + $0x388] sm:$0xf]  ;;  %v2869_v25 = vld [vmem:[%s3041_s6 + $0x414] sm:$0xf0] }
  0x74   : > { %1379 = vmatpush.bf16.msra.mxu0 %v2372_v39  ;;  %v2041_v39 = vld [vmem:[%s3041_s6 + $0x98] sm:$0xf0]  ;;  %v2424_v41 = vor.u32 %v2853_v34, %v2423_v32 }
  0x75   : > { %1392 = vmatpush.bf16.msra.mxu1 %v2500_v42  ;;  %v2552_v42 = vor.u32 %v2885_v37, %v2551_v36  ;;  %v2044_v46 = vor.u32 %v2755_v38, %v2041_v39  ;;  %v2345_v32 = vld [vmem:[%s3041_s6 + $0x2f8] sm:$0xf0]  ;;  %v2488_v37 = vor.u32 %v2869_v25, %v2487_v22  ;;  %v2895_v38 = vld [vmem:[%s3041_s6 + $0x4ec] sm:$0xf] }
  0x76   : > { %1405 = vmatpush.bf16.msra.mxu2 %v1992_v43  ;;  %v2279_v43 = vld [vmem:[%s3041_s6 + $0x268] sm:$0xf]  ;;  %v2473_v34 = vld [vmem:[%s3041_s6 + $0x3f8] sm:$0xf0] }
  0x77   : > { %1418 = vmatpush.bf16.msra.mxu3 %v2120_v47  ;;  %v2849_v47 = vld [vmem:[%s3041_s6 + $0x374] sm:$0xf0]  ;;  %v2280_v52 = vor.u32 %v2817_v44, %v2279_v43  ;;  %v2601_v39 = vld [vmem:[%s3041_s6 + $0x4f8] sm:$0xf0]  ;;  %v2795_v44 = vld [vmem:[%s3041_s6 + $0x1cc] sm:$0xf] }
  0x78   : > { %1380 = vmatpush.bf16.msra.mxu0 %v2356_v54  ;;  %v2408_v53 = vor.u32 %v2849_v47, %v2407_v45  ;;  %v2536_v54 = vor.u32 %v2881_v49, %v2535_v48  ;;  %v2201_v45 = vld [vmem:[%s3041_s6 + $0x1d8] sm:$0xf0]  ;;  %v2604_v47 = vor.u32 %v2895_v38, %v2601_v39  ;;  %v2859_v49 = vld [vmem:[%s3041_s6 + $0x3cc] sm:$0xf] }
  0x79   : > { %1393 = vmatpush.bf16.msra.mxu1 %v2484_v58  ;;  %v2028_v58 = vor.u32 %v2751_v50, %v2025_v51  ;;  %v2329_v48 = vld [vmem:[%s3041_s6 + $0x2d8] sm:$0xf0]  ;;  %v2891_v51 = vld [vmem:[%s3041_s6 + $0x4cc] sm:$0xf] }
  0x7a   : > { %1406 = vmatpush.bf16.msra.mxu2 %v1976_v59  ;;  %v2845_v59 = vld [vmem:[%s3041_s6 + $0x354] sm:$0xf0]  ;;  %v2457_v50 = vld [vmem:[%s3041_s6 + $0x3d8] sm:$0xf0]  ;;  %v2875_v39 = vld [vmem:[%s3041_s6 + $0x44c] sm:$0xf] }
  0x7b   : > { %1419 = vmatpush.bf16.msra.mxu3 %v2104_v62  ;;  %1381 = vmatmul.bf16.vlgmr.msra.gmra.mxu0 %v3146_v21  ;;  %v2747_v62 = vld [vmem:[%s3041_s6 + $0x4c] sm:$0xf]  ;;  %v2281_v22 = vld [vmem:[%s3041_s6 + $0x278] sm:$0xf0] }
  0x7c   : > { %1425 = vmatpush.bf16.msrb.mxu0 %v2344_v63  ;;  %1394 = vmatmul.bf16.vlgmr.msra.gmra.mxu1 %v3201_v35  ;;  %v2009_v63 = vld [vmem:[%s3041_s6 + $0x58] sm:$0xf0] }
  0x7d   : > { %1438 = vmatpush.bf16.msrb.mxu1 %v2472_v0  ;;  %1407 = vmatmul.bf16.vlgmr.msra.gmra.mxu2 %v3142_v19  ;;  %v2264_v0 = vor.u32 %v2813_v56, %v2263_v55  ;;  %v2012_v6 = vor.u32 %v2747_v62, %v2009_v63  ;;  %v2460_v55 = vor.u32 %v2859_v49, %v2457_v50  ;;  %v2791_v56 = vld [vmem:[%s3041_s6 + $0x1ac] sm:$0xf]  ;;  %v2441_v62 = vld [vmem:[%s3041_s6 + $0x3b8] sm:$0xf0] }
  0x7e   : > { %1451 = vmatpush.bf16.msrb.mxu2 %v2600_v1  ;;  %1420 = vmatmul.bf16.vlgmr.msra.gmra.mxu3 %v3148_v23  ;;  %v2392_v1 = vor.u32 %v2845_v59, %v2391_v57  ;;  %v2185_v57 = vld [vmem:[%s3041_s6 + $0x1b8] sm:$0xf0]  ;;  %v2887_v63 = vld [vmem:[%s3041_s6 + $0x4ac] sm:$0xf] }
  0x7f   : > { %1464 = vmatpush.bf16.msrb.mxu3 %v2092_v5  ;;  %v2375_v5 = vld [vmem:[%s3041_s6 + $0x328] sm:$0xf]  ;;  %v2409_v25 = vld [vmem:[%s3041_s6 + $0x378] sm:$0xf0]  ;;  %v2839_v49 = vld [vmem:[%s3041_s6 + $0x32c] sm:$0xf] }
  0x80   : > { %1426 = vmatpush.bf16.msrb.mxu0 %v2328_v11  ;;  %v1993_v11 = vld [vmem:[%s3041_s6 + $0x38] sm:$0xf0]  ;;  %v2376_v15 = vor.u32 %v2841_v7, %v2375_v5 }
  0x81   : > { %1439 = vmatpush.bf16.msrb.mxu1 %v2456_v12  ;;  %v2248_v12 = vor.u32 %v2809_v4, %v2247_v3  ;;  %v1996_v24 = vor.u32 %v2743_v10, %v1993_v11  ;;  %v2444_v3 = vor.u32 %v2855_v61, %v2441_v62  ;;  %v2787_v4 = vld [vmem:[%s3041_s6 + $0x18c] sm:$0xf]  ;;  %v2169_v5 = vld [vmem:[%s3041_s6 + $0x198] sm:$0xf0] }
  0x82   : > { %1452 = vmatpush.bf16.msrb.mxu2 %v2584_v13  ;;  %v2231_v13 = vld [vmem:[%s3041_s6 + $0x208] sm:$0xf]  ;;  %v2297_v7 = vld [vmem:[%s3041_s6 + $0x298] sm:$0xf0]  ;;  %v2883_v10 = vld [vmem:[%s3041_s6 + $0x48c] sm:$0xf] }
  0x83   : > { %1465 = vmatpush.bf16.msrb.mxu3 %v2076_v17  ;;  %v2359_v17 = vld [vmem:[%s3041_s6 + $0x308] sm:$0xf]  ;;  %v2232_v31 = vor.u32 %v2805_v14, %v2231_v13  ;;  %v2553_v11 = vld [vmem:[%s3041_s6 + $0x498] sm:$0xf0]  ;;  %v2428_v14 = vor.u32 %v2851_v8, %v2425_v9  ;;  %v2835_v61 = vld [vmem:[%s3041_s6 + $0x30c] sm:$0xf] }
  0x84   : > { %1427 = vmatpush.bf16.msrb.mxu0 %v2312_v27  ;;  %v1977_v27 = vld [vmem:[%s3041_s6 + $0x18] sm:$0xf0]  ;;  %v2360_v36 = vor.u32 %v2837_v18, %v2359_v17  ;;  %v2815_v17 = vld [vmem:[%s3041_s6 + $0x26c] sm:$0xf]  ;;  %v2556_v18 = vor.u32 %v2883_v10, %v2553_v11 }
  0x85   : > { %1440 = vmatpush.bf16.msrb.mxu1 %v2440_v28  ;;  %v2799_v28 = vld [vmem:[%s3041_s6 + $0x1ec] sm:$0xf]  ;;  %v2393_v38 = vld [vmem:[%s3041_s6 + $0x358] sm:$0xf0] }
  0x86   : > { %1453 = vmatpush.bf16.msrb.mxu2 %v2568_v29  ;;  %v2217_v29 = vld [vmem:[%s3041_s6 + $0x1f8] sm:$0xf0] }
  0x87   : > { %1466 = vmatpush.bf16.msrb.mxu3 %v2060_v33  ;;  %v2863_v33 = vld [vmem:[%s3041_s6 + $0x3ec] sm:$0xf]  ;;  %v2377_v50 = vld [vmem:[%s3041_s6 + $0x338] sm:$0xf0] }
  0x88   : > { %1428 = vmatpush.bf16.msrb.mxu0 %v2296_v40  ;;  %v1980_v40 = vor.u32 %v2739_v26, %v1977_v27  ;;  %v2476_v43 = vor.u32 %v2863_v33, %v2473_v34  ;;  %v2879_v26 = vld [vmem:[%s3041_s6 + $0x46c] sm:$0xf]  ;;  %v2537_v27 = vld [vmem:[%s3041_s6 + $0x478] sm:$0xf0] }
  0x89   : > { %1441 = vmatpush.bf16.msrb.mxu1 %v2424_v41  ;;  %v2220_v41 = vor.u32 %v2799_v28, %v2217_v29  ;;  %v2284_v29 = vor.u32 %v2815_v17, %v2281_v22  ;;  %v2811_v33 = vld [vmem:[%s3041_s6 + $0x24c] sm:$0xf]  ;;  %v2540_v34 = vor.u32 %v2879_v26, %v2537_v27  ;;  %v2361_v62 = vld [vmem:[%s3041_s6 + $0x318] sm:$0xf0] }
  0x8a   : > { %1454 = vmatpush.bf16.msrb.mxu2 %v2552_v42  ;;  %v2348_v42 = vor.u32 %v2831_v30, %v2345_v32  ;;  %v2137_v32 = vld [vmem:[%s3041_s6 + $0x158] sm:$0xf0] }
  0x8b   : > { %1467 = vmatpush.bf16.msrb.mxu3 %v2044_v46  ;;  %v2827_v46 = vld [vmem:[%s3041_s6 + $0x2cc] sm:$0xf] }
  0x8c   : > { %1429 = vmatpush.bf16.msrb.mxu0 %v2280_v52  ;;  %v2585_v52 = vld [vmem:[%s3041_s6 + $0x4d8] sm:$0xf0] }
  0x8d   : > { %1442 = vmatpush.bf16.msrb.mxu1 %v2408_v53  ;;  %v2204_v53 = vor.u32 %v2795_v44, %v2201_v45  ;;  %v2588_v59 = vor.u32 %v2891_v51, %v2585_v52  ;;  %v2775_v44 = vld [vmem:[%s3041_s6 + $0x12c] sm:$0xf]  ;;  %v2121_v45 = vld [vmem:[%s3041_s6 + $0x138] sm:$0xf0] }
  0x8e   : > { %1455 = vmatpush.bf16.msrb.mxu2 %v2536_v54  ;;  %v2332_v54 = vor.u32 %v2827_v46, %v2329_v48  ;;  %v2807_v46 = vld [vmem:[%s3041_s6 + $0x22c] sm:$0xf]  ;;  %v2249_v48 = vld [vmem:[%s3041_s6 + $0x238] sm:$0xf0] }
  0x8f   : > { %1468 = vmatpush.bf16.msrb.mxu3 %v2028_v58  ;;  %v2823_v58 = vld [vmem:[%s3041_s6 + $0x2ac] sm:$0xf]  ;;  %v2505_v52 = vld [vmem:[%s3041_s6 + $0x438] sm:$0xf0] }
  0x90   : > { %1430 = vmatpush.bf16.msrb.mxu0 %v2264_v0  ;;  %v2569_v0 = vld [vmem:[%s3041_s6 + $0x4b8] sm:$0xf0]  ;;  %v2871_v51 = vld [vmem:[%s3041_s6 + $0x42c] sm:$0xf] }
  0x91   : > { %1443 = vmatpush.bf16.msrb.mxu1 %v2392_v1  ;;  %v2188_v1 = vor.u32 %v2791_v56, %v2185_v57  ;;  %v2771_v56 = vld [vmem:[%s3041_s6 + $0x10c] sm:$0xf]  ;;  %v2105_v57 = vld [vmem:[%s3041_s6 + $0x118] sm:$0xf0] }
  0x92   : > { %1456 = vmatpush.bf16.msrb.mxu2 %v2520_v2  ;;  %v2316_v2 = vor.u32 %v2823_v58, %v2313_v60  ;;  %v2803_v58 = vld [vmem:[%s3041_s6 + $0x20c] sm:$0xf]  ;;  %v2233_v60 = vld [vmem:[%s3041_s6 + $0x218] sm:$0xf0] }
  0x93   : > { %1469 = vmatpush.bf16.msrb.mxu3 %v2012_v6  ;;  %v2819_v6 = vld [vmem:[%s3041_s6 + $0x28c] sm:$0xf] }
  0x94   : > { %1431 = vmatpush.bf16.msrb.mxu0 %v2248_v12  ;;  %v2172_v12 = vor.u32 %v2787_v4, %v2169_v5  ;;  %v2300_v13 = vor.u32 %v2819_v6, %v2297_v7 }
  0x95   : > { %1444 = vmatpush.bf16.msrb.mxu1 %v2376_v15  ;;  %v2783_v15 = vld [vmem:[%s3041_s6 + $0x16c] sm:$0xf] }
  0x96   : > { %1457 = vmatpush.bf16.msrb.mxu2 %v2504_v16  ;;  %v2153_v16 = vld [vmem:[%s3041_s6 + $0x178] sm:$0xf0] }
  0x97   : > { %1470 = vmatpush.bf16.msrb.mxu3 %v1996_v24  ;;  %v2847_v24 = vld [vmem:[%s3041_s6 + $0x36c] sm:$0xf]  ;;  %v2156_v28 = vor.u32 %v2783_v15, %v2153_v16  ;;  %v284_v15 = vld [vmem:[#allocation2 + $0x10] sm:$0xff] }
  0x98   : > { %1432 = vmatpush.bf16.msrb.mxu0 %v2232_v31  ;;  %v2412_v30 = vor.u32 %v2847_v24, %v2409_v25  ;;  %v2779_v31 = vld [vmem:[%s3041_s6 + $0x14c] sm:$0xf] }
  0x99   : > { %1445 = vmatpush.bf16.msrb.mxu1 %v2360_v36  ;;  %v2265_v36 = vld [vmem:[%s3041_s6 + $0x258] sm:$0xf0] }
  0x9a   : > { %1458 = vmatpush.bf16.msrb.mxu2 %v2488_v37  ;;  %v2843_v37 = vld [vmem:[%s3041_s6 + $0x34c] sm:$0xf] }
  0x9b   : > { %1471 = vmatpush.bf16.msrb.mxu3 %v1980_v40  ;;  %1433 = vmatmul.bf16.vlgmr.msrb.gmra.mxu0 %v3144_v20  ;;  %v2521_v40 = vld [vmem:[%s3041_s6 + $0x458] sm:$0xf0] }
  0x9c   : > { %1477 = vmatpush.bf16.msra.mxu0 %v2220_v41  ;;  %1446 = vmatmul.bf16.vlgmr.msrb.gmra.mxu1 %v3146_v21  ;;  %v2140_v41 = vor.u32 %v2779_v31, %v2137_v32  ;;  %v285_v31 = vld [vmem:[#allocation2] sm:$0xff] }
  0x9d   : > { %1490 = vmatpush.bf16.msra.mxu1 %v2348_v42  ;;  %1459 = vmatmul.bf16.vlgmr.msrb.gmra.mxu2 %v3201_v35  ;;  %v2268_v42 = vor.u32 %v2811_v33, %v2265_v36 }
  0x9e   : > { %1503 = vmatpush.bf16.msra.mxu2 %v2476_v43  ;;  %1472 = vmatmul.bf16.vlgmr.msrb.gmra.mxu3 %v3142_v19  ;;  %v2572_v19 = vor.u32 %v2887_v63, %v2569_v0  ;;  %v2396_v43 = vor.u32 %v2843_v37, %v2393_v38  ;;  %v2867_v63 = vld [vmem:[%s3041_s6 + $0x40c] sm:$0xf]  ;;  %v2489_v0 = vld [vmem:[%s3041_s6 + $0x418] sm:$0xf0] }
  0x9f   : > { %1516 = vmatpush.bf16.msra.mxu3 %v2604_v47  ;;  %v2524_v47 = vor.u32 %v2875_v39, %v2521_v40  ;;  %v2492_v4 = vor.u32 %v2867_v63, %v2489_v0  ;;  %v287_v63 = vld [vmem:[#allocation2 + $0x8] sm:$0xff] }
  0xa0   : > { %1478 = vmatpush.bf16.msra.mxu0 %v2204_v53  ;;  %v2124_v53 = vor.u32 %v2775_v44, %v2121_v45 }
  0xa1   : > { %1491 = vmatpush.bf16.msra.mxu1 %v2332_v54  ;;  %v2252_v54 = vor.u32 %v2807_v46, %v2249_v48  ;;  %v286_v46 = vld [vmem:[#allocation2 + $0x18] sm:$0xff] }
  0xa2   : > { %1504 = vmatpush.bf16.msra.mxu2 %v2460_v55  ;;  %v2380_v55 = vor.u32 %v2839_v49, %v2377_v50 }
  0xa3   : > { %1517 = vmatpush.bf16.msra.mxu3 %v2588_v59  ;;  %v2508_v59 = vor.u32 %v2871_v51, %v2505_v52 }
  0xa4   : > { %1479 = vmatpush.bf16.msra.mxu0 %v2188_v1  ;;  %v2108_v1 = vor.u32 %v2771_v56, %v2105_v57 }
  0xa5   : > { %1492 = vmatpush.bf16.msra.mxu1 %v2316_v2  ;;  %v2236_v2 = vor.u32 %v2803_v58, %v2233_v60 }
  0xa6   : > { %1505 = vmatpush.bf16.msra.mxu2 %v2444_v3  ;;  %v2364_v3 = vor.u32 %v2835_v61, %v2361_v62 }
  0xa7   : > { %1518 = vmatpush.bf16.msra.mxu3 %v2572_v19 }
  0xa8   : > { %1480 = vmatpush.bf16.msra.mxu0 %v2172_v12 }
  0xa9   : > { %1493 = vmatpush.bf16.msra.mxu1 %v2300_v13 }
  0xaa   : > { %1506 = vmatpush.bf16.msra.mxu2 %v2428_v14 }
  0xab   : > { %1519 = vmatpush.bf16.msra.mxu3 %v2556_v18 }
  0xac   : > { %1481 = vmatpush.bf16.msra.mxu0 %v2156_v28 }
  0xad   : > { %1494 = vmatpush.bf16.msra.mxu1 %v2284_v29 }
  0xae   : > { %1507 = vmatpush.bf16.msra.mxu2 %v2412_v30 }
  0xaf   : > { %1520 = vmatpush.bf16.msra.mxu3 %v2540_v34 }
  0xb0   : > { %1482 = vmatpush.bf16.msra.mxu0 %v2140_v41 }
  0xb1   : > { %1495 = vmatpush.bf16.msra.mxu1 %v2268_v42 }
  0xb2   : > { %1508 = vmatpush.bf16.msra.mxu2 %v2396_v43 }
  0xb3   : > { %1521 = vmatpush.bf16.msra.mxu3 %v2524_v47 }
  0xb4   : > { %1483 = vmatpush.bf16.msra.mxu0 %v2124_v53 }
  0xb5   : > { %1496 = vmatpush.bf16.msra.mxu1 %v2252_v54 }
  0xb6   : > { %1509 = vmatpush.bf16.msra.mxu2 %v2380_v55 }
  0xb7   : > { %1522 = vmatpush.bf16.msra.mxu3 %v2508_v59 }
  0xb8   : > { %1484 = vmatpush.bf16.msra.mxu0 %v2108_v1 }
  0xb9   : > { %1497 = vmatpush.bf16.msra.mxu1 %v2236_v2 }
  0xba   : > { %1510 = vmatpush.bf16.msra.mxu2 %v2364_v3 }
  0xbb   : > { %1523 = vmatpush.bf16.msra.mxu3 %v2492_v4  ;;  %1485 = vmatmul.bf16.vlgmr.msra.gmra.mxu0 %v3148_v23 }
  0xbc   : > { %1498 = vmatmul.bf16.vlgmr.msra.gmra.mxu1 %v3144_v20 }
  0xbd   : > { %1511 = vmatmul.bf16.vlgmr.msra.gmra.mxu2 %v3146_v21 }
  0xbe   : > { %1524 = vmatmul.bf16.vlgmr.msra.gmra.mxu3 %v3201_v35  ;;  %v1278_v5 = vpop.f32.mrf.mxu0 }
  0xbf   : > { %v1291_v6 = vpop.f32.mrf.mxu1 }
  0xc0   : > { %v1304_v19 = vpop.f32.mrf.mxu2  ;;  %v1292_v10 = vadd.f32 %v1291_v6, %v1278_v5 }
  0xc1   : > { %v1317_v7 = vpop.f32.mrf.mxu3 }
  0xc2   : > { %v1305_v11 = vadd.f32 %v1304_v19, %v1292_v10 }
  0xc4   : > { %v1318_v14 = vadd.f32 %v1317_v7, %v1305_v11 }
  0xc6   : > { %v1280_v8 = vpop.f32.mrf.mxu0 }
  0xc7   : > { %v1293_v9 = vpop.f32.mrf.mxu1 }
  0xc8   : > { %v1306_v12 = vpop.f32.mrf.mxu2 }
  0xc9   : > { %v1319_v13 = vpop.f32.mrf.mxu3 }
  0xd8   : > { %v1330_v16 = vpop.f32.mrf.mxu0 }
  0xd9   : > { %v1331_v23 = vadd.f32 %v1330_v16, %v1318_v14  ;;  %v1343_v17 = vpop.f32.mrf.mxu1 }
  0xdb   : > { %v1529_v20 = vadd.f32 %v1331_v23, %v284_v15 }
  0xdd   : > { %1533 = vst [vmem:[#allocation2 + $0x10] sm:$0xff] %v1529_v20 }
  0xe0   : > { %v1356_v21 = vpop.f32.mrf.mxu2  ;;  %v1332_v35 = vpop.f32.mrf.mxu0 }
  0xe1   : > { %v1369_v18 = vpop.f32.mrf.mxu3  ;;  %v1345_v22 = vpop.f32.mrf.mxu1  ;;  %v1357_v26 = vadd.f32 %v1356_v21, %v1343_v17 }
  0xe3   : > { %v1370_v27 = vadd.f32 %v1369_v18, %v1357_v26 }
  0xe8   : > { %v1358_v24 = vpop.f32.mrf.mxu2 }
  0xe9   : > { %v1371_v25 = vpop.f32.mrf.mxu3 }
  0xf8   : > { %v1382_v28 = vpop.f32.mrf.mxu0 }
  0xf9   : > { %v1383_v29 = vadd.f32 %v1382_v28, %v1370_v27  ;;  %v1395_v30 = vpop.f32.mrf.mxu1 }
  0xfb   : > { %v1396_v32 = vadd.f32 %v1395_v30, %v1383_v29 }
  0xfd   : > { %v1530_v33 = vadd.f32 %v1396_v32, %v285_v31 }
  0xff   : > { %1534 = vst [vmem:[#allocation2] sm:$0xff] %v1530_v33 }
 0x100   : > { %v1408_v34 = vpop.f32.mrf.mxu2  ;;  %v1384_v37 = vpop.f32.mrf.mxu0 }
 0x101   : > { %v1421_v36 = vpop.f32.mrf.mxu3  ;;  %v1397_v38 = vpop.f32.mrf.mxu1 }
 0x102   : > { %v1422_v41 = vadd.f32 %v1421_v36, %v1408_v34 }
 0x108   : > { %v1410_v39 = vpop.f32.mrf.mxu2 }
 0x109   : > { %v1423_v40 = vpop.f32.mrf.mxu3 }
 0x118   : > { %v1434_v42 = vpop.f32.mrf.mxu0 }
 0x119   : > { %v1435_v43 = vadd.f32 %v1434_v42, %v1422_v41  ;;  %v1447_v44 = vpop.f32.mrf.mxu1 }
 0x11b   : > { %v1448_v45 = vadd.f32 %v1447_v44, %v1435_v43 }
 0x120   : > { %v1460_v47 = vpop.f32.mrf.mxu2  ;;  %v1436_v51 = vpop.f32.mrf.mxu0 }
 0x121   : > { %v1461_v48 = vadd.f32 %v1460_v47, %v1448_v45  ;;  %v1473_v49 = vpop.f32.mrf.mxu3  ;;  %v1449_v52 = vpop.f32.mrf.mxu1 }
 0x123   : > { %v1531_v50 = vadd.f32 %v1461_v48, %v286_v46 }
 0x125   : > { %1535 = vst [vmem:[#allocation2 + $0x18] sm:$0xff] %v1531_v50 }
 0x128   : > { %v1462_v53 = vpop.f32.mrf.mxu2 }
 0x129   : > { %v1475_v54 = vpop.f32.mrf.mxu3 }
 0x138   : > { %v1486_v55 = vpop.f32.mrf.mxu0 }
 0x139   : > { %v1499_v56 = vpop.f32.mrf.mxu1  ;;  %v1487_v57 = vadd.f32 %v1486_v55, %v1473_v49 }
 0x13b   : > { %v1500_v58 = vadd.f32 %v1499_v56, %v1487_v57 }
 0x140   : > { %v1512_v59 = vpop.f32.mrf.mxu2  ;;  %v1488_v62 = vpop.f32.mrf.mxu0 }
 0x141   : > { %v1513_v60 = vadd.f32 %v1512_v59, %v1500_v58  ;;  %v1525_v61 = vpop.f32.mrf.mxu3  ;;  %v1501_v0 = vpop.f32.mrf.mxu1 }
 0x143   : > { %v1526_v1 = vadd.f32 %v1525_v61, %v1513_v60 }
 0x145   : > { %v1532_v2 = vadd.f32 %v1526_v1, %v287_v63  ;;  %1540 = sbr.rel (%p2605_p7) target bundleno = 505 (0x1f9), region = 48 }
 0x147   : > { %1536 = vst [vmem:[#allocation2 + $0x8] sm:$0xff] %v1532_v2 }
 0x148   : > { %v1514_v3 = vpop.f32.mrf.mxu2 }
 0x149   : > { %v1527_v4 = vpop.f32.mrf.mxu3 }
 0x14a   : > { %v2905_v5 = vld [vmem:[%s3515_s3 + $0x38] sm:$0xff]  ;;  %v2904_v8 = vld [vmem:[%s3515_s3 + $0x30] sm:$0xff]  ;;  %v2903_v12 = vld [vmem:[%s3515_s3 + $0x28] sm:$0xff] }
 0x14b   : > { %v2913_v6 = vld [vmem:[%s3515_s3 + $0x78] sm:$0xff]  ;;  %1827 = vmatpush.bf16.msra.mxu0 %v2905_v5  ;;  %v2912_v9 = vld [vmem:[%s3515_s3 + $0x70] sm:$0xff]  ;;  %v2911_v13 = vld [vmem:[%s3515_s3 + $0x68] sm:$0xff] }
 0x14c   : > { %v2921_v19 = vld [vmem:[%s3515_s3 + $0xb8] sm:$0xff]  ;;  %1840 = vmatpush.bf16.msra.mxu1 %v2913_v6  ;;  %v2920_v10 = vld [vmem:[%s3515_s3 + $0xb0] sm:$0xff]  ;;  %v2919_v14 = vld [vmem:[%s3515_s3 + $0xa8] sm:$0xff] }
 0x14d   : > { %v2929_v7 = vld [vmem:[%s3515_s3 + $0xf8] sm:$0xff]  ;;  %1853 = vmatpush.bf16.msra.mxu2 %v2921_v19  ;;  %v2928_v11 = vld [vmem:[%s3515_s3 + $0xf0] sm:$0xff]  ;;  %v2927_v15 = vld [vmem:[%s3515_s3 + $0xe8] sm:$0xff] }
 0x14e   : > { %1866 = vmatpush.bf16.msra.mxu3 %v2929_v7  ;;  %v2902_v16 = vld [vmem:[%s3515_s3 + $0x20] sm:$0xff]  ;;  %v2901_v21 = vld [vmem:[%s3515_s3 + $0x18] sm:$0xff]  ;;  %v2900_v25 = vld [vmem:[%s3515_s3 + $0x10] sm:$0xff] }
 0x14f   : > { %1828 = vmatpush.bf16.msra.mxu0 %v2904_v8  ;;  %v2910_v23 = vld [vmem:[%s3515_s3 + $0x60] sm:$0xff]  ;;  %v2909_v18 = vld [vmem:[%s3515_s3 + $0x58] sm:$0xff]  ;;  %v2908_v26 = vld [vmem:[%s3515_s3 + $0x50] sm:$0xff] }
 0x150   : > { %1841 = vmatpush.bf16.msra.mxu1 %v2912_v9  ;;  %v2918_v17 = vld [vmem:[%s3515_s3 + $0xa0] sm:$0xff]  ;;  %v2917_v22 = vld [vmem:[%s3515_s3 + $0x98] sm:$0xff]  ;;  %v2916_v29 = vld [vmem:[%s3515_s3 + $0x90] sm:$0xff] }
 0x151   : > { %1854 = vmatpush.bf16.msra.mxu2 %v2920_v10  ;;  %v2926_v20 = vld [vmem:[%s3515_s3 + $0xe0] sm:$0xff]  ;;  %v2925_v24 = vld [vmem:[%s3515_s3 + $0xd8] sm:$0xff]  ;;  %v1541_v30 = vld [vmem:[#allocation2 + $0x10] sm:$0xff] }
 0x152   : > { %1867 = vmatpush.bf16.msra.mxu3 %v2928_v11  ;;  %v1545_v35 = vld [vmem:[%s3514_s2] sm:$0xf]  ;;  %v2924_v34 = vld [vmem:[%s3515_s3 + $0xd0] sm:$0xff]  ;;  %v1543_v36 = vld [vmem:[#allocation2 + $0x18] sm:$0xff] }
 0x153   : > { %1829 = vmatpush.bf16.msra.mxu0 %v2903_v12  ;;  %v1547_v27 = vperm.slane %v1545_v35, 0  ;;  %v1548_v28 = vperm.slane %v1545_v35, 1  ;;  %v1542_v31 = vld [vmem:[#allocation2] sm:$0xff]  ;;  %v1549_v32 = vperm.slane %v1545_v35, 2  ;;  %v1550_v33 = vperm.slane %v1545_v35, 3  ;;  %v1544_v37 = vld [vmem:[#allocation2 + $0x8] sm:$0xff] }
 0x154   : > { %1842 = vmatpush.bf16.msra.mxu1 %v2911_v13  ;;  %v2899_v40 = vld [vmem:[%s3515_s3 + $0x8] sm:$0xff]  ;;  %v2898_v48 = vld [vmem:[%s3515_s3] sm:$0xff] }
 0x155   : > { %1855 = vmatpush.bf16.msra.mxu2 %v2919_v14  ;;  %v1555_v38 = vadd.f32 %v1547_v27, %v1541_v30  ;;  %v1556_v39 = vadd.f32 %v1548_v28, %v1542_v31  ;;  %v2907_v41 = vld [vmem:[%s3515_s3 + $0x48] sm:$0xff]  ;;  %v1557_v42 = vadd.f32 %v1549_v32, %v1543_v36  ;;  %v1558_v43 = vadd.f32 %v1550_v33, %v1544_v37  ;;  %v2906_v49 = vld [vmem:[%s3515_s3 + $0x40] sm:$0xff] }
 0x156   : > { %1868 = vmatpush.bf16.msra.mxu3 %v2927_v15  ;;  %v2915_v44 = vld [vmem:[%s3515_s3 + $0x88] sm:$0xff]  ;;  %v2914_v52 = vld [vmem:[%s3515_s3 + $0x80] sm:$0xff] }
 0x157   : > { %1830 = vmatpush.bf16.msra.mxu0 %v2902_v16  ;;  %v2923_v45 = vld [vmem:[%s3515_s3 + $0xc8] sm:$0xff]  ;;  %v1559_v46 = vmax.f32 %v1555_v38, 0.0  ;;  %v1560_v47 = vmax.f32 %v1556_v39, 0.0  ;;  %v1561_v50 = vmax.f32 %v1557_v42, 0.0  ;;  %v1562_v51 = vmax.f32 %v1558_v43, 0.0  ;;  %v2922_v53 = vld [vmem:[%s3515_s3 + $0xc0] sm:$0xff] }
 0x158   : > { %1843 = vmatpush.bf16.msra.mxu1 %v2910_v23  ;;  %v2955_v58 = vld [vmem:[%s3516_s4] ss:$0 sm:$0xff] }
 0x159   : > { %1856 = vmatpush.bf16.msra.mxu2 %v2918_v17  ;;  %v1563_v54 = vpack.c.bf16 %v1559_v46, %v1559_v46  ;;  %v1564_v55 = vpack.c.bf16 %v1560_v47, %v1560_v47  ;;  %v1565_v56 = vpack.c.bf16 %v1561_v50, %v1561_v50  ;;  %v1566_v57 = vpack.c.bf16 %v1562_v51, %v1562_v51 }
 0x15a   : > { %1869 = vmatpush.bf16.msra.mxu3 %v2926_v20 }
 0x15b   : > { %1831 = vmatpush.bf16.msra.mxu0 %v2901_v21 }
 0x15c   : > { %1844 = vmatpush.bf16.msra.mxu1 %v2909_v18 }
 0x15d   : > { %1857 = vmatpush.bf16.msra.mxu2 %v2917_v22 }
 0x15e   : > { %1870 = vmatpush.bf16.msra.mxu3 %v2925_v24 }
 0x15f   : > { %1832 = vmatpush.bf16.msra.mxu0 %v2900_v25 }
 0x160   : > { %1845 = vmatpush.bf16.msra.mxu1 %v2908_v26 }
 0x161   : > { %1858 = vmatpush.bf16.msra.mxu2 %v2916_v29 }
 0x162   : > { %1871 = vmatpush.bf16.msra.mxu3 %v2924_v34 }
 0x163   : > { %1833 = vmatpush.bf16.msra.mxu0 %v2899_v40 }
 0x164   : > { %1846 = vmatpush.bf16.msra.mxu1 %v2907_v41 }
 0x165   : > { %1859 = vmatpush.bf16.msra.mxu2 %v2915_v44 }
 0x166   : > { %1872 = vmatpush.bf16.msra.mxu3 %v2923_v45 }
 0x167   : > { %1834 = vmatpush.bf16.msra.mxu0 %v2898_v48 }
 0x168   : > { %1847 = vmatpush.bf16.msra.mxu1 %v2906_v49 }
 0x169   : > { %1860 = vmatpush.bf16.msra.mxu2 %v2914_v52 }
 0x16a   : > { %1873 = vmatpush.bf16.msra.mxu3 %v2922_v53  ;;  %1835 = vmatmul.bf16.vlgmr.msra.gmra.mxu0 %v1563_v54 }
 0x16b   : > { %1848 = vmatmul.bf16.vlgmr.msra.gmra.mxu1 %v1564_v55 }
 0x16c   : > { %1861 = vmatmul.bf16.vlgmr.msra.gmra.mxu2 %v1565_v56 }
 0x16d   : > { %1874 = vmatmul.bf16.vlgmr.msra.gmra.mxu3 %v1566_v57 }
 0x1e7   : > { %v1836_v59 = vpop.f32.mrf.mxu0 }
 0x1e8   : > { %v1849_v60 = vpop.f32.mrf.mxu1  ;;  %v1837_v61 = vadd.f32 %v2955_v58, %v1836_v59 }
 0x1ea   : > { %v1850_v62 = vadd.f32 %v1849_v60, %v1837_v61 }
 0x1ef   : > { %v1862_v63 = vpop.f32.mrf.mxu2  ;;  %v1838_v2 = vpop.f32.mrf.mxu0 }
 0x1f0   : > { %v1875_v0 = vpop.f32.mrf.mxu3  ;;  %v1863_v1 = vadd.f32 %v1862_v63, %v1850_v62  ;;  %v1851_v3 = vpop.f32.mrf.mxu1 }
 0x1f2   : > { %v1876_v4 = vadd.f32 %v1875_v0, %v1863_v1 }
 0x1f4   : > { %1879 = vst [vmem:[%s3517_s5] sm:$0xff] %v1876_v4 }
 0x1f7   : > { %v1864_v5 = vpop.f32.mrf.mxu2 }
 0x1f8   : > { %v1877_v6 = vpop.f32.mrf.mxu3 }
 0x1f9 PF: > { %s15_s20 = sadd.s32 1, %s2978_s20   ;;  %s3518_s18 = smov %s2974_s19 }
 0x1fa   : > { %p12_p8 = scmp.ge.s32.totalorder %s15_s20, 7   ;;  %s3519_s19 = smov %s3521_s21 }
 0x1fc   :  { %14 = sbr.rel (!%p12_p8) target bundleno = 2 (0x2), region = 81 }

</bundles_post_ra>
